<compile_context>
chip_gen: v7x
topology: tpu7x:2x2x1
jax: 0.10.0
libtpu: 0.0.40
codegen_flags: <defaults>
</compile_context>

<pallas_src>
import jax
import jax.numpy as jnp
from jax.experimental import pallas as pl
from jax.experimental.pallas import tpu as pltpu

EPS = 1e-5  # nn.BatchNorm2d default eps


# ----------------------------- Pallas kernels ------------------------------

def _pconv_bn_relu_kernel(a_ref, b_ref, g_ref, bt_ref, o_ref):
    """Per grid step: one phase/tap matmul, stored into the VMEM-resident output.

    On the last step: exact BatchNorm (batch stats over all phases/rows) + ReLU,
    applied in place to the whole resident (S, R, C) output block.
    """
    s = pl.program_id(0)
    o_ref[s] = jnp.dot(a_ref[...], b_ref[...], preferred_element_type=jnp.float32)

    @pl.when(s == pl.num_programs(0) - 1)
    def _():
        y = o_ref[...]                                     # (S, R, C) f32, resident
        n = y.shape[0] * y.shape[1]
        mean = jnp.sum(jnp.sum(y, axis=0, keepdims=True), axis=1, keepdims=True) / n
        d = y - mean
        var = jnp.sum(jnp.sum(d * d, axis=0, keepdims=True), axis=1, keepdims=True) / n
        yn = d * jax.lax.rsqrt(var + EPS) * g_ref[...] + bt_ref[...]
        o_ref[...] = jnp.maximum(yn, 0.0)


def _pconv_tanh_kernel(a_ref, b_ref, o_ref):
    """Per grid step: one phase matmul followed by tanh (no cross-phase state)."""
    y = jnp.dot(a_ref[...], b_ref[...], preferred_element_type=jnp.float32)
    o_ref[...] = jnp.tanh(y)


# --------------------------- pallas_call wrappers ---------------------------

def _phase_matmul_bn_relu(A, B, gamma, beta):
    """A: (SA, R, K) bf16 (SA==1 means shared across steps), B: (S, K, C) bf16."""
    SA, R, K = A.shape
    S, _, C = B.shape
    g = gamma.reshape(1, 1, C).astype(jnp.float32)
    bt = beta.reshape(1, 1, C).astype(jnp.float32)
    a_map = (lambda s: (0, 0, 0)) if SA == 1 else (lambda s: (s, 0, 0))
    return pl.pallas_call(
        _pconv_bn_relu_kernel,
        grid=(S,),
        in_specs=[
            pl.BlockSpec((None, R, K), a_map),
            pl.BlockSpec((None, K, C), lambda s: (s, 0, 0)),
            pl.BlockSpec((1, 1, C), lambda s: (0, 0, 0)),
            pl.BlockSpec((1, 1, C), lambda s: (0, 0, 0)),
        ],
        out_specs=pl.BlockSpec((S, R, C), lambda s: (0, 0, 0)),
        out_shape=jax.ShapeDtypeStruct((S, R, C), jnp.float32),
        compiler_params=pltpu.CompilerParams(dimension_semantics=("arbitrary",)),
        cost_estimate=pl.CostEstimate(
            flops=2 * S * R * K * C,
            transcendentals=0,
            bytes_accessed=A.size * 2 + B.size * 2 + S * R * C * 4),
    )(A, B, g, bt)


def _phase_matmul_tanh(A, B):
    S, R, K = A.shape
    C = B.shape[2]
    return pl.pallas_call(
        _pconv_tanh_kernel,
        grid=(S,),
        in_specs=[
            pl.BlockSpec((None, R, K), lambda s: (s, 0, 0)),
            pl.BlockSpec((None, K, C), lambda s: (s, 0, 0)),
        ],
        out_specs=pl.BlockSpec((None, R, C), lambda s: (s, 0, 0)),
        out_shape=jax.ShapeDtypeStruct((S, R, C), jnp.float32),
        compiler_params=pltpu.CompilerParams(dimension_semantics=("parallel",)),
        cost_estimate=pl.CostEstimate(
            flops=2 * S * R * K * C,
            transcendentals=S * R * C,
            bytes_accessed=A.size * 2 + B.size * 2 + S * R * C * 4),
    )(A, B)


# ------------------------------ layer glue ----------------------------------

def _stride2_layer(x, w, padding, gamma=None, beta=None):
    """ConvTranspose2d(k=4, stride=2, pad=padding) via 4 sub-pixel phase matmuls.

    x: (N, H, W, Cin) f32 NHWC.  w: (Cin, Cout, 4, 4) f32 (PyTorch layout).
    gamma/beta given  -> fused BN(batch stats)+ReLU;  None -> fused Tanh.
    Returns NHWC (N, OH, OW, Cout) f32.
    """
    N, H, Wd, Cin = x.shape
    Cout = w.shape[1]
    OH = (H - 1) * 2 - 2 * padding + 4
    OW = (Wd - 1) * 2 - 2 * padding + 4
    oh2, ow2 = OH // 2, OW // 2
    Cp = ((Cout + 127) // 128) * 128                       # lane-dense output channels

    # For output parity r (oh = 2i + r): valid kernel rows kh and input offsets dh
    # with  kh = oh + padding - 2h  in [0,4)  =>  h = i + dh,  dh = (r+padding-kh)/2.
    taps = []
    for r in (0, 1):
        k0 = (r + padding) % 2
        taps.append([(k, (r + padding - k) // 2) for k in (k0, k0 + 2)])

    offs = [d for pr in taps for _, d in pr]
    pad_lo = max(0, -min(offs))
    pad_hi = max(0, max(offs) + oh2 - H)
    xb = x.astype(jnp.bfloat16)
    xp = jnp.pad(xb, ((0, 0), (pad_lo, pad_hi), (pad_lo, pad_hi), (0, 0)))

    A_phases, B_phases = [], []
    for r in (0, 1):
        for c in (0, 1):
            cols, rows = [], []
            for kh, dh in taps[r]:
                for kw, dw in taps[c]:
                    hs, ws = pad_lo + dh, pad_lo + dw
                    cols.append(xp[:, hs:hs + oh2, ws:ws + ow2, :])   # (N,oh2,ow2,Cin)
                    rows.append(w[:, :, kh, kw])                      # (Cin,Cout)
            A_phases.append(jnp.stack(cols, axis=3).reshape(N * oh2 * ow2, 4 * Cin))
            B_phases.append(jnp.concatenate(rows, axis=0))
    A = jnp.stack(A_phases, axis=0)                                   # (4, R, 4*Cin) bf16
    B = jnp.stack(B_phases, axis=0).astype(jnp.bfloat16)              # (4, 4*Cin, Cout)
    if Cp != Cout:
        B = jnp.pad(B, ((0, 0), (0, 0), (0, Cp - Cout)))

    if gamma is not None:
        g = jnp.pad(gamma, (0, Cp - Cout), constant_values=1.0) if Cp != Cout else gamma
        bt = jnp.pad(beta, (0, Cp - Cout)) if Cp != Cout else beta
        out = _phase_matmul_bn_relu(A, B, g, bt)                      # (4, R, Cp)
    else:
        out = _phase_matmul_tanh(A, B)                                # (4, R, Cp)

    out = out[..., :Cout]
    # interleave phases back to NHWC:  phase s = 2*r + c,  rows enumerate (n, i, j)
    out = out.reshape(2, 2, N, oh2, ow2, Cout).transpose(2, 3, 0, 4, 1, 5)
    return out.reshape(N, OH, OW, Cout)


def generator_forward(z, params):
    """z: (N, z_dim, 1, 1) NCHW -> (N, 1, 28, 28) NCHW."""
    N = z.shape[0]
    zc = z.reshape(N, -1)

    # Layer 1: ConvTranspose(z_dim, 256, 4, 1, 0) on a 1x1 input == 16 per-position
    # matmuls z @ w[:, :, kh, kw]; grid over the 16 spatial taps, BN fused at the end.
    w1 = params["w1"]
    Cin, C1 = w1.shape[0], w1.shape[1]
    Kp = 128  # pad the contraction dim to a lane-aligned width (zeros contribute nothing)
    A1 = jnp.pad(zc.astype(jnp.bfloat16), ((0, 0), (0, Kp - Cin)))[None]       # (1, N, 128)
    B1 = jnp.pad(w1.transpose(2, 3, 0, 1).reshape(16, Cin, C1),
                 ((0, 0), (0, Kp - Cin), (0, 0))).astype(jnp.bfloat16)         # (16, 128, 256)
    o1 = _phase_matmul_bn_relu(A1, B1, params["g1"], params["b1"])             # (16, N, 256)
    x = o1.transpose(1, 0, 2).reshape(N, 4, 4, C1)                             # NHWC

    # Layers 2-4: stride-2 ConvTranspose via sub-pixel phase decomposition.
    x = _stride2_layer(x, params["w2"], padding=1, gamma=params["g2"], beta=params["b2"])
    x = _stride2_layer(x, params["w3"], padding=1, gamma=params["g3"], beta=params["b3"])
    x = _stride2_layer(x, params["w4"], padding=3)                             # Tanh

    return x.transpose(0, 3, 1, 2)                                             # NCHW


# -------------------------- pure-JAX reference -----------------------------

_REF_LAYERS = (("w1", "g1", "b1", 1, 0, True),
               ("w2", "g2", "b2", 2, 1, True),
               ("w3", "g3", "b3", 2, 1, True),
               ("w4", None, None, 2, 3, False))


def _conv_transpose_ref(x, w, stride, padding):
    # ConvTranspose2d == lhs-dilated forward conv with the spatially flipped kernel.
    kern = jnp.flip(w, axis=(2, 3)).transpose(1, 0, 2, 3)       # (Cout, Cin, KH, KW)
    q = 4 - 1 - padding
    return jax.lax.conv_general_dilated(
        x.astype(jnp.bfloat16), kern.astype(jnp.bfloat16),
        window_strides=(1, 1), padding=((q, q), (q, q)),
        lhs_dilation=(stride, stride),
        dimension_numbers=("NCHW", "OIHW", "NCHW"),
        preferred_element_type=jnp.float32)


def _reference_forward(z, params):
    x = z
    for wn, gn, bn, s, p, has_bn in _REF_LAYERS:
        y = _conv_transpose_ref(x, params[wn], s, p)
        if has_bn:
            mean = y.mean(axis=(0, 2, 3), keepdims=True)
            var = ((y - mean) ** 2).mean(axis=(0, 2, 3), keepdims=True)
            y = (y - mean) * jax.lax.rsqrt(var + EPS)
            y = y * params[gn].reshape(1, -1, 1, 1) + params[bn].reshape(1, -1, 1, 1)
            x = jnp.maximum(y, 0.0)
        else:
            x = jnp.tanh(y)
    return x


# --------------------------------- main -------------------------------------

if __name__ == "__main__":
    key = jax.random.PRNGKey(0)
    z_dim, batch = 32, 2
    k1, k2, k3, k4, kz = jax.random.split(key, 5)

    # ConvTranspose2d weights: (Cin, Cout, KH, KW); BN gamma=1, beta=0 (PyTorch defaults)
    params = {
        "w1": 0.02 * jax.random.normal(k1, (z_dim, 256, 4, 4), jnp.float32),
        "g1": jnp.ones((256,), jnp.float32), "b1": jnp.zeros((256,), jnp.float32),
        "w2": 0.02 * jax.random.normal(k2, (256, 128, 4, 4), jnp.float32),
        "g2": jnp.ones((128,), jnp.float32), "b2": jnp.zeros((128,), jnp.float32),
        "w3": 0.02 * jax.random.normal(k3, (128, 64, 4, 4), jnp.float32),
        "g3": jnp.ones((64,), jnp.float32), "b3": jnp.zeros((64,), jnp.float32),
        "w4": 0.02 * jax.random.normal(k4, (64, 1, 4, 4), jnp.float32),
    }
    z = jax.random.normal(kz, (batch, z_dim, 1, 1), jnp.float32)

    out = jax.block_until_ready(jax.jit(generator_forward)(z, params))
    assert out.shape == (batch, 1, 28, 28), out.shape

    ref = _reference_forward(z, params)
    err = float(jnp.max(jnp.abs(out - ref)))
    # Both paths use bf16 operands with f32 accumulation; residual difference is
    # accumulation-order / bf16-rounding noise only.
    assert jnp.allclose(out, ref, atol=1e-2, rtol=1e-2), err

    print("KERNEL_OK")
</pallas_src>

<mosaic_0001>
module attributes {stable_mosaic.version = 11 : i64} {
  func.func @_pconv_bn_relu_kernel(%arg0: i32, %arg1: memref<1x2x128xbf16, #tpu.memory_space<vmem>>, %arg2: memref<1x128x256xbf16, #tpu.memory_space<vmem>>, %arg3: memref<1x1x256xf32, #tpu.memory_space<vmem>>, %arg4: memref<1x1x256xf32, #tpu.memory_space<vmem>>, %arg5: memref<16x2x256xf32, #tpu.memory_space<vmem>>) attributes {dimension_semantics = [#tpu.dimension_semantics<arbitrary>], iteration_bounds = array<i64: 16>, scalar_prefetch = 0 : i64, scratch_operands = 0 : i64, tpu.core_type = #tpu.core_type<tc>, window_params = [{pipeline_mode = #tpu.pipeline_mode<synchronous>, transform_indices = @transform_0, window_bounds = array<i64: 1, 2, 128>}, {transform_indices = @transform_1, window_bounds = array<i64: 1, 128, 256>}, {pipeline_mode = #tpu.pipeline_mode<synchronous>, transform_indices = @transform_2, window_bounds = array<i64: 1, 1, 256>}, {pipeline_mode = #tpu.pipeline_mode<synchronous>, transform_indices = @transform_3, window_bounds = array<i64: 1, 1, 256>}, {pipeline_mode = #tpu.pipeline_mode<synchronous>, transform_indices = @transform_4, window_bounds = array<i64: 16, 2, 256>}]} {
    %c0 = arith.constant 0 : index
    %c0_0 = arith.constant 0 : index
    %c0_1 = arith.constant 0 : index
    %0 = vector.load %arg1[%c0, %c0_0, %c0_1] : memref<1x2x128xbf16, #tpu.memory_space<vmem>>, vector<1x2x128xbf16>
    %1 = vector.shape_cast %0 : vector<1x2x128xbf16> to vector<2x128xbf16>
    %c0_2 = arith.constant 0 : index
    %c0_3 = arith.constant 0 : index
    %c0_4 = arith.constant 0 : index
    %2 = vector.load %arg2[%c0_2, %c0_3, %c0_4] : memref<1x128x256xbf16, #tpu.memory_space<vmem>>, vector<1x128x256xbf16>
    %3 = vector.shape_cast %2 : vector<1x128x256xbf16> to vector<128x256xbf16>
    %cst = arith.constant dense<0.000000e+00> : vector<2x256xf32>
    %4 = tpu.matmul %1, %3, %cst {dimension_numbers = #tpu.dot_dimension_numbers<[1], [0], [0], [1], [0, 0, 1, 1], [], []>} : vector<2x128xbf16>, vector<128x256xbf16>, vector<2x256xf32> -> vector<2x256xf32>
    %5 = arith.index_cast %arg0 : i32 to index
    %c0_5 = arith.constant 0 : index
    %c0_6 = arith.constant 0 : index
    %6 = vector.load %arg5[%5, %c0_5, %c0_6] : memref<16x2x256xf32, #tpu.memory_space<vmem>>, vector<1x2x256xf32>
    %7 = vector.shape_cast %6 : vector<1x2x256xf32> to vector<2x256xf32>
    %8 = vector.shape_cast %4 : vector<2x256xf32> to vector<1x2x256xf32>
    tpu.vector_store %arg5[%5, %c0_5, %c0_6], %8 {strides = array<i32>} : memref<16x2x256xf32, #tpu.memory_space<vmem>>, vector<1x2x256xf32>,
    %c15_i32 = arith.constant 15 : i32
    %9 = arith.cmpi eq, %arg0, %c15_i32 : i32
    %10 = arith.extui %9 : i1 to i32
    %c0_i32 = arith.constant 0 : i32
    %11 = arith.cmpi ne, %10, %c0_i32 : i32
    scf.if %11 {
      %c0_7 = arith.constant 0 : index
      %c0_8 = arith.constant 0 : index
      %c0_9 = arith.constant 0 : index
      %12 = vector.load %arg5[%c0_7, %c0_8, %c0_9] : memref<16x2x256xf32, #tpu.memory_space<vmem>>, vector<16x2x256xf32>
      %cst_10 = arith.constant dense<0.000000e+00> : vector<2x256xf32>
      %13 = vector.multi_reduction <add>, %12, %cst_10 [0] : vector<16x2x256xf32> to vector<2x256xf32>
      %14 = vector.shape_cast %13 : vector<2x256xf32> to vector<1x2x256xf32>
      %cst_11 = arith.constant dense<0.000000e+00> : vector<1x256xf32>
      %15 = vector.multi_reduction <add>, %14, %cst_11 [1] : vector<1x2x256xf32> to vector<1x256xf32>
      %16 = vector.shape_cast %15 : vector<1x256xf32> to vector<1x1x256xf32>
      %cst_12 = arith.constant 3.200000e+01 : f32
      %17 = vector.broadcast %cst_12 : f32 to vector<1x1x256xf32>
      %18 = arith.divf %16, %17 : vector<1x1x256xf32>
      %19 = vector.broadcast %18 : vector<1x1x256xf32> to vector<16x2x256xf32>
      %20 = arith.subf %12, %19 : vector<16x2x256xf32>
      %21 = arith.mulf %20, %20 : vector<16x2x256xf32>
      %cst_13 = arith.constant dense<0.000000e+00> : vector<2x256xf32>
      %22 = vector.multi_reduction <add>, %21, %cst_13 [0] : vector<16x2x256xf32> to vector<2x256xf32>
      %23 = vector.shape_cast %22 : vector<2x256xf32> to vector<1x2x256xf32>
      %cst_14 = arith.constant dense<0.000000e+00> : vector<1x256xf32>
      %24 = vector.multi_reduction <add>, %23, %cst_14 [1] : vector<1x2x256xf32> to vector<1x256xf32>
      %25 = vector.shape_cast %24 : vector<1x256xf32> to vector<1x1x256xf32>
      %cst_15 = arith.constant 3.200000e+01 : f32
      %26 = vector.broadcast %cst_15 : f32 to vector<1x1x256xf32>
      %27 = arith.divf %25, %26 : vector<1x1x256xf32>
      %cst_16 = arith.constant 9.99999974E-6 : f32
      %28 = vector.broadcast %cst_16 : f32 to vector<1x1x256xf32>
      %29 = arith.addf %27, %28 : vector<1x1x256xf32>
      %30 = math.rsqrt %29 : vector<1x1x256xf32>
      %31 = vector.broadcast %30 : vector<1x1x256xf32> to vector<16x2x256xf32>
      %32 = arith.mulf %20, %31 : vector<16x2x256xf32>
      %c0_17 = arith.constant 0 : index
      %c0_18 = arith.constant 0 : index
      %c0_19 = arith.constant 0 : index
      %33 = vector.load %arg3[%c0_17, %c0_18, %c0_19] : memref<1x1x256xf32, #tpu.memory_space<vmem>>, vector<1x1x256xf32>
      %34 = vector.broadcast %33 : vector<1x1x256xf32> to vector<16x2x256xf32>
      %35 = arith.mulf %32, %34 : vector<16x2x256xf32>
      %c0_20 = arith.constant 0 : index
      %c0_21 = arith.constant 0 : index
      %c0_22 = arith.constant 0 : index
      %36 = vector.load %arg4[%c0_20, %c0_21, %c0_22] : memref<1x1x256xf32, #tpu.memory_space<vmem>>, vector<1x1x256xf32>
      %37 = vector.broadcast %36 : vector<1x1x256xf32> to vector<16x2x256xf32>
      %38 = arith.addf %35, %37 : vector<16x2x256xf32>
      %cst_23 = arith.constant 0.000000e+00 : f32
      %39 = vector.broadcast %cst_23 : f32 to vector<16x2x256xf32>
      %40 = arith.maximumf %38, %39 : vector<16x2x256xf32>
      %c0_24 = arith.constant 0 : index
      %c0_25 = arith.constant 0 : index
      %c0_26 = arith.constant 0 : index
      %41 = vector.load %arg5[%c0_24, %c0_25, %c0_26] : memref<16x2x256xf32, #tpu.memory_space<vmem>>, vector<16x2x256xf32>
      tpu.vector_store %arg5[%c0_24, %c0_25, %c0_26], %40 {strides = array<i32>} : memref<16x2x256xf32, #tpu.memory_space<vmem>>, vector<16x2x256xf32>,
    } else {
    }
    return
  }
  func.func @transform_0(%arg0: i32) -> (i32, i32, i32) {
    %c0_i32 = arith.constant 0 : i32
    %c0_i32_0 = arith.constant 0 : i32
    %c0_i32_1 = arith.constant 0 : i32
    %c0_i32_2 = arith.constant 0 : i32
    return %c0_i32, %c0_i32_0, %c0_i32_1 : i32, i32, i32
  }
  func.func @transform_1(%arg0: i32) -> (i32, i32, i32) {
    %c0_i32 = arith.constant 0 : i32
    %c0_i32_0 = arith.constant 0 : i32
    %c0_i32_1 = arith.constant 0 : i32
    return %arg0, %c0_i32, %c0_i32_0 : i32, i32, i32
  }
  func.func @transform_2(%arg0: i32) -> (i32, i32, i32) {
    %c0_i32 = arith.constant 0 : i32
    %c0_i32_0 = arith.constant 0 : i32
    %c0_i32_1 = arith.constant 0 : i32
    %c0_i32_2 = arith.constant 0 : i32
    return %c0_i32, %c0_i32_0, %c0_i32_1 : i32, i32, i32
  }
  func.func @transform_3(%arg0: i32) -> (i32, i32, i32) {
    %c0_i32 = arith.constant 0 : i32
    %c0_i32_0 = arith.constant 0 : i32
    %c0_i32_1 = arith.constant 0 : i32
    %c0_i32_2 = arith.constant 0 : i32
    return %c0_i32, %c0_i32_0, %c0_i32_1 : i32, i32, i32
  }
  func.func @transform_4(%arg0: i32) -> (i32, i32, i32) {
    %c0_i32 = arith.constant 0 : i32
    %c0_i32_0 = arith.constant 0 : i32
    %c0_i32_1 = arith.constant 0 : i32
    %c0_i32_2 = arith.constant 0 : i32
    return %c0_i32, %c0_i32_0, %c0_i32_1 : i32, i32, i32
  }
}

module attributes {stable_mosaic.version = 11 : i64} {
  func.func @_pconv_bn_relu_kernel(%arg0: i32, %arg1: memref<1x32x1024xbf16, #tpu.memory_space<vmem>>, %arg2: memref<1x1024x128xbf16, #tpu.memory_space<vmem>>, %arg3: memref<1x1x128xf32, #tpu.memory_space<vmem>>, %arg4: memref<1x1x128xf32, #tpu.memory_space<vmem>>, %arg5: memref<4x32x128xf32, #tpu.memory_space<vmem>>) attributes {dimension_semantics = [#tpu.dimension_semantics<arbitrary>], iteration_bounds = array<i64: 4>, scalar_prefetch = 0 : i64, scratch_operands = 0 : i64, tpu.core_type = #tpu.core_type<tc>, window_params = [{transform_indices = @transform_0, window_bounds = array<i64: 1, 32, 1024>}, {transform_indices = @transform_1, window_bounds = array<i64: 1, 1024, 128>}, {pipeline_mode = #tpu.pipeline_mode<synchronous>, transform_indices = @transform_2, window_bounds = array<i64: 1, 1, 128>}, {pipeline_mode = #tpu.pipeline_mode<synchronous>, transform_indices = @transform_3, window_bounds = array<i64: 1, 1, 128>}, {pipeline_mode = #tpu.pipeline_mode<synchronous>, transform_indices = @transform_4, window_bounds = array<i64: 4, 32, 128>}]} {
    %c0 = arith.constant 0 : index
    %c0_0 = arith.constant 0 : index
    %c0_1 = arith.constant 0 : index
    %0 = vector.load %arg1[%c0, %c0_0, %c0_1] : memref<1x32x1024xbf16, #tpu.memory_space<vmem>>, vector<1x32x1024xbf16>
    %1 = vector.shape_cast %0 : vector<1x32x1024xbf16> to vector<32x1024xbf16>
    %c0_2 = arith.constant 0 : index
    %c0_3 = arith.constant 0 : index
    %c0_4 = arith.constant 0 : index
    %2 = vector.load %arg2[%c0_2, %c0_3, %c0_4] : memref<1x1024x128xbf16, #tpu.memory_space<vmem>>, vector<1x1024x128xbf16>
    %3 = vector.shape_cast %2 : vector<1x1024x128xbf16> to vector<1024x128xbf16>
    %cst = arith.constant dense<0.000000e+00> : vector<32x128xf32>
    %4 = tpu.matmul %1, %3, %cst {dimension_numbers = #tpu.dot_dimension_numbers<[1], [0], [0], [1], [0, 0, 1, 1], [], []>} : vector<32x1024xbf16>, vector<1024x128xbf16>, vector<32x128xf32> -> vector<32x128xf32>
    %5 = arith.index_cast %arg0 : i32 to index
    %c0_5 = arith.constant 0 : index
    %c0_6 = arith.constant 0 : index
    %6 = vector.load %arg5[%5, %c0_5, %c0_6] : memref<4x32x128xf32, #tpu.memory_space<vmem>>, vector<1x32x128xf32>
    %7 = vector.shape_cast %6 : vector<1x32x128xf32> to vector<32x128xf32>
    %8 = vector.shape_cast %4 : vector<32x128xf32> to vector<1x32x128xf32>
    tpu.vector_store %arg5[%5, %c0_5, %c0_6], %8 {strides = array<i32>} : memref<4x32x128xf32, #tpu.memory_space<vmem>>, vector<1x32x128xf32>,
    %c3_i32 = arith.constant 3 : i32
    %9 = arith.cmpi eq, %arg0, %c3_i32 : i32
    %10 = arith.extui %9 : i1 to i32
    %c0_i32 = arith.constant 0 : i32
    %11 = arith.cmpi ne, %10, %c0_i32 : i32
    scf.if %11 {
      %c0_7 = arith.constant 0 : index
      %c0_8 = arith.constant 0 : index
      %c0_9 = arith.constant 0 : index
      %12 = vector.load %arg5[%c0_7, %c0_8, %c0_9] : memref<4x32x128xf32, #tpu.memory_space<vmem>>, vector<4x32x128xf32>
      %cst_10 = arith.constant dense<0.000000e+00> : vector<32x128xf32>
      %13 = vector.multi_reduction <add>, %12, %cst_10 [0] : vector<4x32x128xf32> to vector<32x128xf32>
      %14 = vector.shape_cast %13 : vector<32x128xf32> to vector<1x32x128xf32>
      %cst_11 = arith.constant dense<0.000000e+00> : vector<1x128xf32>
      %15 = vector.multi_reduction <add>, %14, %cst_11 [1] : vector<1x32x128xf32> to vector<1x128xf32>
      %16 = vector.shape_cast %15 : vector<1x128xf32> to vector<1x1x128xf32>
      %cst_12 = arith.constant 1.280000e+02 : f32
      %17 = vector.broadcast %cst_12 : f32 to vector<1x1x128xf32>
      %18 = arith.divf %16, %17 : vector<1x1x128xf32>
      %19 = vector.broadcast %18 : vector<1x1x128xf32> to vector<4x32x128xf32>
      %20 = arith.subf %12, %19 : vector<4x32x128xf32>
      %21 = arith.mulf %20, %20 : vector<4x32x128xf32>
      %cst_13 = arith.constant dense<0.000000e+00> : vector<32x128xf32>
      %22 = vector.multi_reduction <add>, %21, %cst_13 [0] : vector<4x32x128xf32> to vector<32x128xf32>
      %23 = vector.shape_cast %22 : vector<32x128xf32> to vector<1x32x128xf32>
      %cst_14 = arith.constant dense<0.000000e+00> : vector<1x128xf32>
      %24 = vector.multi_reduction <add>, %23, %cst_14 [1] : vector<1x32x128xf32> to vector<1x128xf32>
      %25 = vector.shape_cast %24 : vector<1x128xf32> to vector<1x1x128xf32>
      %cst_15 = arith.constant 1.280000e+02 : f32
      %26 = vector.broadcast %cst_15 : f32 to vector<1x1x128xf32>
      %27 = arith.divf %25, %26 : vector<1x1x128xf32>
      %cst_16 = arith.constant 9.99999974E-6 : f32
      %28 = vector.broadcast %cst_16 : f32 to vector<1x1x128xf32>
      %29 = arith.addf %27, %28 : vector<1x1x128xf32>
      %30 = math.rsqrt %29 : vector<1x1x128xf32>
      %31 = vector.broadcast %30 : vector<1x1x128xf32> to vector<4x32x128xf32>
      %32 = arith.mulf %20, %31 : vector<4x32x128xf32>
      %c0_17 = arith.constant 0 : index
      %c0_18 = arith.constant 0 : index
      %c0_19 = arith.constant 0 : index
      %33 = vector.load %arg3[%c0_17, %c0_18, %c0_19] : memref<1x1x128xf32, #tpu.memory_space<vmem>>, vector<1x1x128xf32>
      %34 = vector.broadcast %33 : vector<1x1x128xf32> to vector<4x32x128xf32>
      %35 = arith.mulf %32, %34 : vector<4x32x128xf32>
      %c0_20 = arith.constant 0 : index
      %c0_21 = arith.constant 0 : index
      %c0_22 = arith.constant 0 : index
      %36 = vector.load %arg4[%c0_20, %c0_21, %c0_22] : memref<1x1x128xf32, #tpu.memory_space<vmem>>, vector<1x1x128xf32>
      %37 = vector.broadcast %36 : vector<1x1x128xf32> to vector<4x32x128xf32>
      %38 = arith.addf %35, %37 : vector<4x32x128xf32>
      %cst_23 = arith.constant 0.000000e+00 : f32
      %39 = vector.broadcast %cst_23 : f32 to vector<4x32x128xf32>
      %40 = arith.maximumf %38, %39 : vector<4x32x128xf32>
      %c0_24 = arith.constant 0 : index
      %c0_25 = arith.constant 0 : index
      %c0_26 = arith.constant 0 : index
      %41 = vector.load %arg5[%c0_24, %c0_25, %c0_26] : memref<4x32x128xf32, #tpu.memory_space<vmem>>, vector<4x32x128xf32>
      tpu.vector_store %arg5[%c0_24, %c0_25, %c0_26], %40 {strides = array<i32>} : memref<4x32x128xf32, #tpu.memory_space<vmem>>, vector<4x32x128xf32>,
    } else {
    }
    return
  }
  func.func @transform_0(%arg0: i32) -> (i32, i32, i32) {
    %c0_i32 = arith.constant 0 : i32
    %c0_i32_0 = arith.constant 0 : i32
    %c0_i32_1 = arith.constant 0 : i32
    return %arg0, %c0_i32, %c0_i32_0 : i32, i32, i32
  }
  func.func @transform_1(%arg0: i32) -> (i32, i32, i32) {
    %c0_i32 = arith.constant 0 : i32
    %c0_i32_0 = arith.constant 0 : i32
    %c0_i32_1 = arith.constant 0 : i32
    return %arg0, %c0_i32, %c0_i32_0 : i32, i32, i32
  }
  func.func @transform_2(%arg0: i32) -> (i32, i32, i32) {
    %c0_i32 = arith.constant 0 : i32
    %c0_i32_0 = arith.constant 0 : i32
    %c0_i32_1 = arith.constant 0 : i32
    %c0_i32_2 = arith.constant 0 : i32
    return %c0_i32, %c0_i32_0, %c0_i32_1 : i32, i32, i32
  }
  func.func @transform_3(%arg0: i32) -> (i32, i32, i32) {
    %c0_i32 = arith.constant 0 : i32
    %c0_i32_0 = arith.constant 0 : i32
    %c0_i32_1 = arith.constant 0 : i32
    %c0_i32_2 = arith.constant 0 : i32
    return %c0_i32, %c0_i32_0, %c0_i32_1 : i32, i32, i32
  }
  func.func @transform_4(%arg0: i32) -> (i32, i32, i32) {
    %c0_i32 = arith.constant 0 : i32
    %c0_i32_0 = arith.constant 0 : i32
    %c0_i32_1 = arith.constant 0 : i32
    %c0_i32_2 = arith.constant 0 : i32
    return %c0_i32, %c0_i32_0, %c0_i32_1 : i32, i32, i32
  }
}

module attributes {stable_mosaic.version = 11 : i64} {
  func.func @_pconv_bn_relu_kernel(%arg0: i32, %arg1: memref<1x128x512xbf16, #tpu.memory_space<vmem>>, %arg2: memref<1x512x128xbf16, #tpu.memory_space<vmem>>, %arg3: memref<1x1x128xf32, #tpu.memory_space<vmem>>, %arg4: memref<1x1x128xf32, #tpu.memory_space<vmem>>, %arg5: memref<4x128x128xf32, #tpu.memory_space<vmem>>) attributes {dimension_semantics = [#tpu.dimension_semantics<arbitrary>], iteration_bounds = array<i64: 4>, scalar_prefetch = 0 : i64, scratch_operands = 0 : i64, tpu.core_type = #tpu.core_type<tc>, window_params = [{transform_indices = @transform_0, window_bounds = array<i64: 1, 128, 512>}, {transform_indices = @transform_1, window_bounds = array<i64: 1, 512, 128>}, {pipeline_mode = #tpu.pipeline_mode<synchronous>, transform_indices = @transform_2, window_bounds = array<i64: 1, 1, 128>}, {pipeline_mode = #tpu.pipeline_mode<synchronous>, transform_indices = @transform_3, window_bounds = array<i64: 1, 1, 128>}, {pipeline_mode = #tpu.pipeline_mode<synchronous>, transform_indices = @transform_4, window_bounds = array<i64: 4, 128, 128>}]} {
    %c0 = arith.constant 0 : index
    %c0_0 = arith.constant 0 : index
    %c0_1 = arith.constant 0 : index
    %0 = vector.load %arg1[%c0, %c0_0, %c0_1] : memref<1x128x512xbf16, #tpu.memory_space<vmem>>, vector<1x128x512xbf16>
    %1 = vector.shape_cast %0 : vector<1x128x512xbf16> to vector<128x512xbf16>
    %c0_2 = arith.constant 0 : index
    %c0_3 = arith.constant 0 : index
    %c0_4 = arith.constant 0 : index
    %2 = vector.load %arg2[%c0_2, %c0_3, %c0_4] : memref<1x512x128xbf16, #tpu.memory_space<vmem>>, vector<1x512x128xbf16>
    %3 = vector.shape_cast %2 : vector<1x512x128xbf16> to vector<512x128xbf16>
    %cst = arith.constant dense<0.000000e+00> : vector<128x128xf32>
    %4 = tpu.matmul %1, %3, %cst {dimension_numbers = #tpu.dot_dimension_numbers<[1], [0], [0], [1], [0, 0, 1, 1], [], []>} : vector<128x512xbf16>, vector<512x128xbf16>, vector<128x128xf32> -> vector<128x128xf32>
    %5 = arith.index_cast %arg0 : i32 to index
    %c0_5 = arith.constant 0 : index
    %c0_6 = arith.constant 0 : index
    %6 = vector.load %arg5[%5, %c0_5, %c0_6] : memref<4x128x128xf32, #tpu.memory_space<vmem>>, vector<1x128x128xf32>
    %7 = vector.shape_cast %6 : vector<1x128x128xf32> to vector<128x128xf32>
    %8 = vector.shape_cast %4 : vector<128x128xf32> to vector<1x128x128xf32>
    tpu.vector_store %arg5[%5, %c0_5, %c0_6], %8 {strides = array<i32>} : memref<4x128x128xf32, #tpu.memory_space<vmem>>, vector<1x128x128xf32>,
    %c3_i32 = arith.constant 3 : i32
    %9 = arith.cmpi eq, %arg0, %c3_i32 : i32
    %10 = arith.extui %9 : i1 to i32
    %c0_i32 = arith.constant 0 : i32
    %11 = arith.cmpi ne, %10, %c0_i32 : i32
    scf.if %11 {
      %c0_7 = arith.constant 0 : index
      %c0_8 = arith.constant 0 : index
      %c0_9 = arith.constant 0 : index
      %12 = vector.load %arg5[%c0_7, %c0_8, %c0_9] : memref<4x128x128xf32, #tpu.memory_space<vmem>>, vector<4x128x128xf32>
      %cst_10 = arith.constant dense<0.000000e+00> : vector<128x128xf32>
      %13 = vector.multi_reduction <add>, %12, %cst_10 [0] : vector<4x128x128xf32> to vector<128x128xf32>
      %14 = vector.shape_cast %13 : vector<128x128xf32> to vector<1x128x128xf32>
      %cst_11 = arith.constant dense<0.000000e+00> : vector<1x128xf32>
      %15 = vector.multi_reduction <add>, %14, %cst_11 [1] : vector<1x128x128xf32> to vector<1x128xf32>
      %16 = vector.shape_cast %15 : vector<1x128xf32> to vector<1x1x128xf32>
      %cst_12 = arith.constant 5.120000e+02 : f32
      %17 = vector.broadcast %cst_12 : f32 to vector<1x1x128xf32>
      %18 = arith.divf %16, %17 : vector<1x1x128xf32>
      %19 = vector.broadcast %18 : vector<1x1x128xf32> to vector<4x128x128xf32>
      %20 = arith.subf %12, %19 : vector<4x128x128xf32>
      %21 = arith.mulf %20, %20 : vector<4x128x128xf32>
      %cst_13 = arith.constant dense<0.000000e+00> : vector<128x128xf32>
      %22 = vector.multi_reduction <add>, %21, %cst_13 [0] : vector<4x128x128xf32> to vector<128x128xf32>
      %23 = vector.shape_cast %22 : vector<128x128xf32> to vector<1x128x128xf32>
      %cst_14 = arith.constant dense<0.000000e+00> : vector<1x128xf32>
      %24 = vector.multi_reduction <add>, %23, %cst_14 [1] : vector<1x128x128xf32> to vector<1x128xf32>
      %25 = vector.shape_cast %24 : vector<1x128xf32> to vector<1x1x128xf32>
      %cst_15 = arith.constant 5.120000e+02 : f32
      %26 = vector.broadcast %cst_15 : f32 to vector<1x1x128xf32>
      %27 = arith.divf %25, %26 : vector<1x1x128xf32>
      %cst_16 = arith.constant 9.99999974E-6 : f32
      %28 = vector.broadcast %cst_16 : f32 to vector<1x1x128xf32>
      %29 = arith.addf %27, %28 : vector<1x1x128xf32>
      %30 = math.rsqrt %29 : vector<1x1x128xf32>
      %31 = vector.broadcast %30 : vector<1x1x128xf32> to vector<4x128x128xf32>
      %32 = arith.mulf %20, %31 : vector<4x128x128xf32>
      %c0_17 = arith.constant 0 : index
      %c0_18 = arith.constant 0 : index
      %c0_19 = arith.constant 0 : index
      %33 = vector.load %arg3[%c0_17, %c0_18, %c0_19] : memref<1x1x128xf32, #tpu.memory_space<vmem>>, vector<1x1x128xf32>
      %34 = vector.broadcast %33 : vector<1x1x128xf32> to vector<4x128x128xf32>
      %35 = arith.mulf %32, %34 : vector<4x128x128xf32>
      %c0_20 = arith.constant 0 : index
      %c0_21 = arith.constant 0 : index
      %c0_22 = arith.constant 0 : index
      %36 = vector.load %arg4[%c0_20, %c0_21, %c0_22] : memref<1x1x128xf32, #tpu.memory_space<vmem>>, vector<1x1x128xf32>
      %37 = vector.broadcast %36 : vector<1x1x128xf32> to vector<4x128x128xf32>
      %38 = arith.addf %35, %37 : vector<4x128x128xf32>
      %cst_23 = arith.constant 0.000000e+00 : f32
      %39 = vector.broadcast %cst_23 : f32 to vector<4x128x128xf32>
      %40 = arith.maximumf %38, %39 : vector<4x128x128xf32>
      %c0_24 = arith.constant 0 : index
      %c0_25 = arith.constant 0 : index
      %c0_26 = arith.constant 0 : index
      %41 = vector.load %arg5[%c0_24, %c0_25, %c0_26] : memref<4x128x128xf32, #tpu.memory_space<vmem>>, vector<4x128x128xf32>
      tpu.vector_store %arg5[%c0_24, %c0_25, %c0_26], %40 {strides = array<i32>} : memref<4x128x128xf32, #tpu.memory_space<vmem>>, vector<4x128x128xf32>,
    } else {
    }
    return
  }
  func.func @transform_0(%arg0: i32) -> (i32, i32, i32) {
    %c0_i32 = arith.constant 0 : i32
    %c0_i32_0 = arith.constant 0 : i32
    %c0_i32_1 = arith.constant 0 : i32
    return %arg0, %c0_i32, %c0_i32_0 : i32, i32, i32
  }
  func.func @transform_1(%arg0: i32) -> (i32, i32, i32) {
    %c0_i32 = arith.constant 0 : i32
    %c0_i32_0 = arith.constant 0 : i32
    %c0_i32_1 = arith.constant 0 : i32
    return %arg0, %c0_i32, %c0_i32_0 : i32, i32, i32
  }
  func.func @transform_2(%arg0: i32) -> (i32, i32, i32) {
    %c0_i32 = arith.constant 0 : i32
    %c0_i32_0 = arith.constant 0 : i32
    %c0_i32_1 = arith.constant 0 : i32
    %c0_i32_2 = arith.constant 0 : i32
    return %c0_i32, %c0_i32_0, %c0_i32_1 : i32, i32, i32
  }
  func.func @transform_3(%arg0: i32) -> (i32, i32, i32) {
    %c0_i32 = arith.constant 0 : i32
    %c0_i32_0 = arith.constant 0 : i32
    %c0_i32_1 = arith.constant 0 : i32
    %c0_i32_2 = arith.constant 0 : i32
    return %c0_i32, %c0_i32_0, %c0_i32_1 : i32, i32, i32
  }
  func.func @transform_4(%arg0: i32) -> (i32, i32, i32) {
    %c0_i32 = arith.constant 0 : i32
    %c0_i32_0 = arith.constant 0 : i32
    %c0_i32_1 = arith.constant 0 : i32
    %c0_i32_2 = arith.constant 0 : i32
    return %c0_i32, %c0_i32_0, %c0_i32_1 : i32, i32, i32
  }
}

module attributes {stable_mosaic.version = 11 : i64} {
  func.func @_pconv_tanh_kernel(%arg0: i32, %arg1: memref<1x392x256xbf16, #tpu.memory_space<vmem>>, %arg2: memref<1x256x128xbf16, #tpu.memory_space<vmem>>, %arg3: memref<1x392x128xf32, #tpu.memory_space<vmem>>) attributes {dimension_semantics = [#tpu.dimension_semantics<parallel>], iteration_bounds = array<i64: 4>, scalar_prefetch = 0 : i64, scratch_operands = 0 : i64, tpu.core_type = #tpu.core_type<tc>, window_params = [{transform_indices = @transform_0, window_bounds = array<i64: 1, 392, 256>}, {transform_indices = @transform_1, window_bounds = array<i64: 1, 256, 128>}, {transform_indices = @transform_2, window_bounds = array<i64: 1, 392, 128>}]} {
    %c0 = arith.constant 0 : index
    %c0_0 = arith.constant 0 : index
    %c0_1 = arith.constant 0 : index
    %0 = vector.load %arg1[%c0, %c0_0, %c0_1] : memref<1x392x256xbf16, #tpu.memory_space<vmem>>, vector<1x392x256xbf16>
    %1 = vector.shape_cast %0 : vector<1x392x256xbf16> to vector<392x256xbf16>
    %c0_2 = arith.constant 0 : index
    %c0_3 = arith.constant 0 : index
    %c0_4 = arith.constant 0 : index
    %2 = vector.load %arg2[%c0_2, %c0_3, %c0_4] : memref<1x256x128xbf16, #tpu.memory_space<vmem>>, vector<1x256x128xbf16>
    %3 = vector.shape_cast %2 : vector<1x256x128xbf16> to vector<256x128xbf16>
    %cst = arith.constant dense<0.000000e+00> : vector<392x128xf32>
    %4 = tpu.matmul %1, %3, %cst {dimension_numbers = #tpu.dot_dimension_numbers<[1], [0], [0], [1], [0, 0, 1, 1], [], []>} : vector<392x256xbf16>, vector<256x128xbf16>, vector<392x128xf32> -> vector<392x128xf32>
    %5 = math.tanh %4 : vector<392x128xf32>
    %c0_5 = arith.constant 0 : index
    %c0_6 = arith.constant 0 : index
    %c0_7 = arith.constant 0 : index
    %6 = vector.load %arg3[%c0_5, %c0_6, %c0_7] : memref<1x392x128xf32, #tpu.memory_space<vmem>>, vector<1x392x128xf32>
    %7 = vector.shape_cast %6 : vector<1x392x128xf32> to vector<392x128xf32>
    %8 = vector.shape_cast %5 : vector<392x128xf32> to vector<1x392x128xf32>
    tpu.vector_store %arg3[%c0_5, %c0_6, %c0_7], %8 {strides = array<i32>} : memref<1x392x128xf32, #tpu.memory_space<vmem>>, vector<1x392x128xf32>,
    return
  }
  func.func @transform_0(%arg0: i32) -> (i32, i32, i32) {
    %c0_i32 = arith.constant 0 : i32
    %c0_i32_0 = arith.constant 0 : i32
    %c0_i32_1 = arith.constant 0 : i32
    return %arg0, %c0_i32, %c0_i32_0 : i32, i32, i32
  }
  func.func @transform_1(%arg0: i32) -> (i32, i32, i32) {
    %c0_i32 = arith.constant 0 : i32
    %c0_i32_0 = arith.constant 0 : i32
    %c0_i32_1 = arith.constant 0 : i32
    return %arg0, %c0_i32, %c0_i32_0 : i32, i32, i32
  }
  func.func @transform_2(%arg0: i32) -> (i32, i32, i32) {
    %c0_i32 = arith.constant 0 : i32
    %c0_i32_0 = arith.constant 0 : i32
    %c0_i32_1 = arith.constant 0 : i32
    return %arg0, %c0_i32, %c0_i32_0 : i32, i32, i32
  }
}

</mosaic_0001>

<bundles_post_ra>
// kernel: generator_forward.4
= control target key start
LH: loop header
LB: loop body
LE: loop exit
PB: predicated region body
PF: predicated region fallthrough
CT: control target
= control target key end

     0   :  { %s1176_s15 = smov 0   ;;  %s1595_s0 = inlined_call_operand.vmem [shape: bf16[1,2,128], index: 0, kind: input, shape index: {}]   ;;  %s1596_s1 = inlined_call_operand.vmem [shape: bf16[16,128,256], index: 1, kind: input, shape index: {}]   ;;  %s1597_s2 = inlined_call_operand.vmem [shape: f32[1,1,256], index: 2, kind: input, shape index: {}]   ;;  %s1598_s3 = inlined_call_operand.vmem [shape: f32[1,1,256], index: 3, kind: input, shape index: {}]   ;;  %s1599_s4 = inlined_call_operand.vmem [shape: f32[16,2,256], index: 4, kind: output, shape index: {}]  }
   0x1 LB: > { %s1182_s16 = sadd.s32 4294967295, %s1147_s15   ;;  %p1076_p0 = scmp.ge.s32.totalorder %s1147_s15, 1  ;;  %s1147_s15 = sphi %s1176_s15, %s14_s15  }
   0x2   : > { %p157_p1 = scmp.lt.s32.totalorder %s1147_s15, 17 }
   0x4   : > { %p158_p2 = pnand %p1076_p0, %p157_p1 }
   0x5   : > { %p178_p3 = scmp.lt.s32.totalorder (!%p158_p2), %s1182_s16, 15  ;;  %v1149_v0 = vmov (!%p158_p2), 0   ;;  %v184_v17 = vld [vmem:[%s1595_s0] sm:$0x1] (!%p158_p2)  ;;  %s1102_s24 = sshll.u32 (!%p158_p2), %s1182_s16, 2 }
   0x6   : > { %161 = sbr.rel (%p158_p2) target bundleno = 422 (0x1a6), region = 36  ;;  %313 = vmatprep.mubr.bf16.mxu0 (!%p158_p2), %v1149_v0  ;;  %s335_s27 = scalar_lea.vmem (!%p158_p2), %s1599_s4, %s1102_s24 }
   0x7   : > { %p1098_p4 = scmp.ne.s32.totalorder (!%p158_p2), %s1182_s16, 15 }
   0xd   : > { %s179_s17 = scalar_select %p178_p3, %s1182_s16, 15 }
   0xe   : > { %v376_v23 = vlaneseq (!%p1098_p4)  ;;  %v1150_v24 = vmov (!%p1098_p4), 1983009808   ;;  %vm533_vm0 = vcmask (!%p1098_p4), 1041408  }
   0xf   : > { %s1101_s18 = sshll.u32 %s179_s17, 7  ;;  %v374_v25 = vunpack.c.l.s4 (!%p1098_p4), %v1150_v24 }
  0x10   : > { %s182_s21 = scalar_lea.vmem %s1596_s1, %s1101_s18  ;;  %v1199_v26 = vshrl.u32 (!%p1098_p4), %v376_v23, 7 }
  0x11   : > { %v1113_v1 = vld [vmem:[%s182_s21 + $0x4] ss:$8 sps:$4 sm:$0xff]   ;;  %v1115_v2 = vld [vmem:[%s182_s21] ss:$8 sps:$4 sm:$0xff]   ;;  %v1116_v3 = vld [vmem:[%s182_s21 + $0x14] ss:$8 sps:$4 sm:$0xff]   ;;  %v375_v27 = vunpack.c.0.s8 (!%p1098_p4), %v374_v25 }
  0x12   : > { %281 = vmatprep.subr.bf16.mxu0 %v1113_v1  ;;  %v1118_v4 = vld [vmem:[%s182_s21 + $0x10] ss:$8 sps:$4 sm:$0xff]   ;;  %v1119_v5 = vld [vmem:[%s182_s21 + $0x24] ss:$8 sps:$4 sm:$0xff]   ;;  %v1121_v6 = vld [vmem:[%s182_s21 + $0x20] ss:$8 sps:$4 sm:$0xff]  }
  0x13   : > { %282 = vmatpush1.bf16.msra.mxu0 %v1115_v2  ;;  %v1122_v7 = vld [vmem:[%s182_s21 + $0x34] ss:$8 sps:$4 sm:$0xff]   ;;  %v1124_v8 = vld [vmem:[%s182_s21 + $0x30] ss:$8 sps:$4 sm:$0xff]   ;;  %v1125_v9 = vld [vmem:[%s182_s21 + $0x44] ss:$8 sps:$4 sm:$0xff]   ;;  %v1202_v28 = vsub.s32 (!%p1098_p4), %v375_v27, %v1199_v26 }
  0x14   : > { %283 = vmatprep.subr.bf16.mxu0 %v1116_v3  ;;  %v1127_v10 = vld [vmem:[%s182_s21 + $0x40] ss:$8 sps:$4 sm:$0xff]   ;;  %v1128_v11 = vld [vmem:[%s182_s21 + $0x54] ss:$8 sps:$4 sm:$0xff]   ;;  %v1130_v12 = vld [vmem:[%s182_s21 + $0x50] ss:$8 sps:$4 sm:$0xff]  }
  0x15   : > { %v1131_v13 = vld [vmem:[%s182_s21 + $0x64] ss:$8 sps:$4 sm:$0xff]   ;;  %v1133_v14 = vld [vmem:[%s182_s21 + $0x60] ss:$8 sps:$4 sm:$0xff]   ;;  %v1134_v15 = vld [vmem:[%s182_s21 + $0x74] ss:$8 sps:$4 sm:$0xff]  }
  0x16   : > { %v1136_v16 = vld [vmem:[%s182_s21 + $0x70] ss:$8 sps:$4 sm:$0xff]  }
  0x17   : > { %284 = vmatpush1.bf16.msra.mxu0 %v1118_v4 }
  0x18   : > { %285 = vmatprep.subr.bf16.mxu0 %v1119_v5 }
  0x1b   : > { %286 = vmatpush1.bf16.msra.mxu0 %v1121_v6 }
  0x1c   : > { %287 = vmatprep.subr.bf16.mxu0 %v1122_v7 }
  0x1f   : > { %288 = vmatpush1.bf16.msra.mxu0 %v1124_v8 }
  0x20   : > { %289 = vmatprep.subr.bf16.mxu0 %v1125_v9 }
  0x23   : > { %290 = vmatpush1.bf16.msra.mxu0 %v1127_v10 }
  0x24   : > { %291 = vmatprep.subr.bf16.mxu0 %v1128_v11 }
  0x27   : > { %292 = vmatpush1.bf16.msra.mxu0 %v1130_v12 }
  0x28   : > { %293 = vmatprep.subr.bf16.mxu0 %v1131_v13 }
  0x2b   : > { %294 = vmatpush1.bf16.msra.mxu0 %v1133_v14 }
  0x2c   : > { %295 = vmatprep.subr.bf16.mxu0 %v1134_v15 }
  0x2f   : > { %296 = vmatpush1.bf16.msra.mxu0 %v1136_v16 }
  0x32   : > { %314 = vmatmul.mubr.bf16.vlgmr.msra.gmra.mrb[0].mxu0 %v184_v17 }
 0x103   : > { %340 = sbr.rel (%p1098_p4) target bundleno = 422 (0x1a6), region = 40 }
 0x105   : > { %v315_v18 = vpop.f32.mrb[0].mxu0 }
 0x106   : > { %v317_v19 = vpop.f32.mrb[1].mxu0 }
 0x107   : > { %v324_v20 = vcombine.low %v315_v18, %v317_v19  ;;  %v319_v21 = vpop.f32.mrb[2].mxu0 }
 0x108   : > { %v320_v22 = vpop.f32.mrb[3].mxu0 }
 0x109   : > { %1097 = vst.sshfl [vmem:[%s335_s27] sm:$0x33 pattern:$0x76325410] %v324_v20 }
 0x110   : > { %v1207_v29 = vld [vmem:[%s1599_s4] sm:$0xf]  ;;  %v1212_v30 = vld [vmem:[%s1599_s4 + $0x4] sm:$0xf]  ;;  %v1217_v31 = vld [vmem:[%s1599_s4 + $0x8] sm:$0xf] }
 0x111   : > { %v1222_v32 = vld [vmem:[%s1599_s4 + $0xc] sm:$0xf]  ;;  %v379_v33 = vrot.slane %v1207_v29, %v1202_v28  ;;  %v1229_v34 = vld [vmem:[%s1599_s4 + $0x10] sm:$0xf]  ;;  %v387_v35 = vrot.slane %v1212_v30, %v1202_v28  ;;  %v395_v36 = vrot.slane %v1217_v31, %v1202_v28  ;;  %v1240_v38 = vld [vmem:[%s1599_s4 + $0x14] sm:$0xf] }
 0x112   : > { %v403_v37 = vrot.slane %v1222_v32, %v1202_v28  ;;  %v411_v40 = vrot.slane %v1229_v34, %v1202_v28  ;;  %v1247_v41 = vld [vmem:[%s1599_s4 + $0x18] sm:$0xf]  ;;  %v419_v49 = vrot.slane %v1240_v38, %v1202_v28  ;;  %v1258_v51 = vld [vmem:[%s1599_s4 + $0x1c] sm:$0xf]  ;;  %v1268_v58 = vld [vmem:[%s1599_s4 + $0x20] sm:$0xf] }
 0x113   : > { %v380_v39 = vcombine.high %v379_v33, %v379_v33  ;;  %v388_v42 = vcombine.high %v387_v35, %v387_v35  ;;  %v534_v43 = vsel %vm533_vm0, %v379_v33, 0.0  ;;  %v535_v44 = vsel %vm533_vm0, %v387_v35, 0.0  ;;  %v1278_v2 = vld [vmem:[%s1599_s4 + $0x24] sm:$0xf]  ;;  %v1287_v9 = vld [vmem:[%s1599_s4 + $0x28] sm:$0xf] }
 0x114   : > { %v537_v45 = vsel %vm533_vm0, %v395_v36, 0.0  ;;  %v396_v46 = vcombine.high %v395_v36, %v395_v36  ;;  %v536_v47 = vadd.f32 %v535_v44, %v534_v43  ;;  %v404_v48 = vcombine.high %v403_v37, %v403_v37  ;;  %v1296_v16 = vld [vmem:[%s1599_s4 + $0x2c] sm:$0xf]  ;;  %v1305_v23 = vld [vmem:[%s1599_s4 + $0x30] sm:$0xf] }
 0x115   : > { %v539_v50 = vsel %vm533_vm0, %v403_v37, 0.0  ;;  %v427_v52 = vrot.slane %v1247_v41, %v1202_v28  ;;  %v412_v54 = vcombine.high %v411_v40, %v411_v40  ;;  %v541_v55 = vsel %vm533_vm0, %v411_v40, 0.0  ;;  %v1314_v37 = vld [vmem:[%s1599_s4 + $0x34] sm:$0xf] }
 0x116   : > { %v538_v53 = vadd.f32 %v537_v45, %v536_v47  ;;  %v565_v56 = vsel %vm533_vm0, %v380_v39, 0.0  ;;  %v566_v57 = vsel %vm533_vm0, %v388_v42, 0.0  ;;  %v568_v61 = vsel %vm533_vm0, %v396_v46, 0.0  ;;  %v1323_v46 = vld [vmem:[%s1599_s4 + $0x38] sm:$0xf] }
 0x117   : > { %v567_v60 = vadd.f32 %v566_v57, %v565_v56  ;;  %v420_v62 = vcombine.high %v419_v49, %v419_v49  ;;  %v435_v63 = vrot.slane %v1258_v51, %v1202_v28  ;;  %v543_v0 = vsel %vm533_vm0, %v419_v49, 0.0 }
 0x118   : > { %v540_v59 = vadd.f32 %v539_v50, %v538_v53  ;;  %v570_v1 = vsel %vm533_vm0, %v404_v48, 0.0  ;;  %v428_v5 = vcombine.high %v427_v52, %v427_v52  ;;  %v443_v6 = vrot.slane %v1268_v58, %v1202_v28 }
 0x119   : > { %v569_v4 = vadd.f32 %v568_v61, %v567_v60  ;;  %v545_v7 = vsel %vm533_vm0, %v427_v52, 0.0  ;;  %v572_v8 = vsel %vm533_vm0, %v412_v54, 0.0  ;;  %v436_v12 = vcombine.high %v435_v63, %v435_v63  ;;  %v1332_v54 = vld [vmem:[%s1599_s4 + $0x3c] sm:$0xf] }
 0x11a   : > { %v542_v3 = vadd.f32 %v541_v55, %v540_v59  ;;  %v451_v13 = vrot.slane %v1278_v2, %v1202_v28  ;;  %v547_v14 = vsel %vm533_vm0, %v435_v63, 0.0  ;;  %v574_v15 = vsel %vm533_vm0, %v420_v62, 0.0 }
 0x11b   : > { %v571_v11 = vadd.f32 %v570_v1, %v569_v4  ;;  %v444_v19 = vcombine.high %v443_v6, %v443_v6  ;;  %v459_v20 = vrot.slane %v1287_v9, %v1202_v28  ;;  %v549_v21 = vsel %vm533_vm0, %v443_v6, 0.0 }
 0x11c   : > { %v544_v10 = vadd.f32 %v543_v0, %v542_v3  ;;  %v576_v22 = vsel %vm533_vm0, %v428_v5, 0.0  ;;  %v452_v27 = vcombine.high %v451_v13, %v451_v13  ;;  %v467_v33 = vrot.slane %v1296_v16, %v1202_v28 }
 0x11d   : > { %v573_v18 = vadd.f32 %v572_v8, %v571_v11  ;;  %v551_v35 = vsel %vm533_vm0, %v451_v13, 0.0  ;;  %v578_v36 = vsel %vm533_vm0, %v436_v12, 0.0  ;;  %v460_v42 = vcombine.high %v459_v20, %v459_v20 }
 0x11e   : > { %v546_v17 = vadd.f32 %v545_v7, %v544_v10  ;;  %v475_v43 = vrot.slane %v1305_v23, %v1202_v28  ;;  %v553_v44 = vsel %vm533_vm0, %v459_v20, 0.0  ;;  %v580_v45 = vsel %vm533_vm0, %v444_v19, 0.0 }
 0x11f   : > { %v575_v25 = vadd.f32 %v574_v15, %v573_v18  ;;  %v468_v49 = vcombine.high %v467_v33, %v467_v33  ;;  %v483_v50 = vrot.slane %v1314_v37, %v1202_v28  ;;  %v555_v52 = vsel %vm533_vm0, %v467_v33, 0.0 }
 0x120   : > { %v548_v24 = vadd.f32 %v547_v14, %v546_v17  ;;  %v582_v53 = vsel %vm533_vm0, %v452_v27, 0.0  ;;  %v476_v57 = vcombine.high %v475_v43, %v475_v43  ;;  %v491_v59 = vrot.slane %v1323_v46, %v1202_v28 }
 0x121   : > { %v577_v40 = vadd.f32 %v576_v22, %v575_v25  ;;  %v557_v60 = vsel %vm533_vm0, %v475_v43, 0.0  ;;  %v584_v61 = vsel %vm533_vm0, %v460_v42, 0.0  ;;  %v484_v0 = vcombine.high %v483_v50, %v483_v50 }
 0x122   : > { %v550_v39 = vadd.f32 %v549_v21, %v548_v24  ;;  %v499_v1 = vrot.slane %v1332_v54, %v1202_v28  ;;  %v559_v3 = vsel %vm533_vm0, %v483_v50, 0.0  ;;  %v586_v4 = vsel %vm533_vm0, %v468_v49, 0.0 }
 0x123   : > { %v579_v48 = vadd.f32 %v578_v36, %v577_v40  ;;  %v492_v7 = vcombine.high %v491_v59, %v491_v59  ;;  %v561_v8 = vsel %vm533_vm0, %v491_v59, 0.0  ;;  %v588_v10 = vsel %vm533_vm0, %v476_v57, 0.0 }
 0x124   : > { %v552_v47 = vadd.f32 %v551_v35, %v550_v39  ;;  %v500_v13 = vcombine.high %v499_v1, %v499_v1  ;;  %v563_v14 = vsel %vm533_vm0, %v499_v1, 0.0  ;;  %v590_v15 = vsel %vm533_vm0, %v484_v0, 0.0 }
 0x125   : > { %v581_v56 = vadd.f32 %v580_v45, %v579_v48  ;;  %v592_v19 = vsel %vm533_vm0, %v492_v7, 0.0 }
 0x126   : > { %v554_v55 = vadd.f32 %v553_v44, %v552_v47  ;;  %v594_v22 = vsel %vm533_vm0, %v500_v13, 0.0 }
 0x127   : > { %v583_v63 = vadd.f32 %v582_v53, %v581_v56 }
 0x128   : > { %v556_v62 = vadd.f32 %v555_v52, %v554_v55 }
 0x129   : > { %v585_v6 = vadd.f32 %v584_v61, %v583_v63 }
 0x12a   : > { %v558_v5 = vadd.f32 %v557_v60, %v556_v62 }
 0x12b   : > { %v587_v12 = vadd.f32 %v586_v4, %v585_v6 }
 0x12c   : > { %v560_v11 = vadd.f32 %v559_v3, %v558_v5 }
 0x12d   : > { %v589_v18 = vadd.f32 %v588_v10, %v587_v12 }
 0x12e   : > { %v562_v17 = vadd.f32 %v561_v8, %v560_v11 }
 0x12f   : > { %v591_v21 = vadd.f32 %v590_v15, %v589_v18 }
 0x130   : > { %v564_v20 = vadd.f32 %v563_v14, %v562_v17 }
 0x131   : > { %v593_v24 = vadd.f32 %v592_v19, %v591_v21 }
 0x132   : > { %v596_v25 = vsel %vm533_vm0, %v564_v20, 0.0 }
 0x133   : > { %v597_v27 = vrot.slane %v596_v25, 4  ;;  %v595_v33 = vadd.f32 %v594_v22, %v593_v24 }
 0x135   : > { %v598_v35 = vadd.f32 %v597_v27, %v596_v25  ;;  %v603_v36 = vsel %vm533_vm0, %v595_v33, 0.0 }
 0x136   : > { %v604_v40 = vrot.slane %v603_v36, 4 }
 0x137   : > { %v599_v39 = vrot.slane %v598_v35, 2 }
 0x138   : > { %v605_v43 = vadd.f32 %v604_v40, %v603_v36 }
 0x139   : > { %v600_v42 = vadd.f32 %v599_v39, %v598_v35 }
 0x13a   : > { %v606_v45 = vrot.slane %v605_v43, 2 }
 0x13b   : > { %v601_v44 = vrot.slane %v600_v42, 1 }
 0x13c   : > { %v607_v48 = vadd.f32 %v606_v45, %v605_v43 }
 0x13d   : > { %v602_v47 = vadd.f32 %v601_v44, %v600_v42 }
 0x13e   : > { %v608_v49 = vrot.slane %v607_v48, 1 }
 0x13f   : > { %v611_v52 = vmul.f32 0.03125, %v602_v47 }
 0x140   : > { %v609_v50 = vadd.f32 %v608_v49, %v607_v48 }
 0x142   : > { %v612_v53 = vmul.f32 0.03125, %v609_v50 }
 0x144   : > { %v615_v55 = vcombine.low %v611_v52, %v612_v53 }
 0x146   : > { %v1351_v56 = vrot.slane %v615_v55, %v1202_v28 }
 0x148   : > { %v1355_v57 = vsub.f32 %v1207_v29, %v1351_v56  ;;  %v1359_v59 = vsub.f32 %v1212_v30, %v1351_v56  ;;  %v1363_v60 = vsub.f32 %v1217_v31, %v1351_v56  ;;  %v1367_v61 = vsub.f32 %v1222_v32, %v1351_v56 }
 0x149   : > { %v1371_v62 = vsub.f32 %v1229_v34, %v1351_v56  ;;  %v1381_v31 = vsub.f32 %v1240_v38, %v1351_v56  ;;  %v1387_v34 = vsub.f32 %v1247_v41, %v1351_v56  ;;  %v1396_v38 = vsub.f32 %v1258_v51, %v1351_v56 }
 0x14a   : > { %v640_v29 = vmul.f32 %v1355_v57, %v1355_v57  ;;  %v641_v63 = vmul.f32 %v1359_v59, %v1359_v59  ;;  %v642_v30 = vmul.f32 %v1363_v60, %v1363_v60  ;;  %v643_v32 = vmul.f32 %v1367_v61, %v1367_v61 }
 0x14b   : > { %v644_v0 = vmul.f32 %v1371_v62, %v1371_v62  ;;  %v645_v5 = vmul.f32 %v1381_v31, %v1381_v31  ;;  %v1403_v41 = vsub.f32 %v1268_v58, %v1351_v56  ;;  %v646_v7 = vmul.f32 %v1387_v34, %v1387_v34 }
 0x14c   : > { %v678_v1 = vrot.slane %v640_v29, %v1202_v28  ;;  %v686_v3 = vrot.slane %v641_v63, %v1202_v28  ;;  %v694_v4 = vrot.slane %v642_v30, %v1202_v28  ;;  %v702_v6 = vrot.slane %v643_v32, %v1202_v28 }
 0x14d   : > { %v710_v10 = vrot.slane %v644_v0, %v1202_v28  ;;  %v1413_v14 = vsub.f32 %v1278_v2, %v1351_v56  ;;  %v1417_v58 = vsub.f32 %v1287_v9, %v1351_v56  ;;  %v647_v18 = vmul.f32 %v1396_v38, %v1396_v38 }
 0x14e   : > { %v679_v8 = vcombine.high %v678_v1, %v678_v1  ;;  %v687_v11 = vcombine.high %v686_v3, %v686_v3  ;;  %v832_v12 = vsel %vm533_vm0, %v678_v1, 0.0  ;;  %v833_v51 = vsel %vm533_vm0, %v686_v3, 0.0 }
 0x14f   : > { %v835_v13 = vsel %vm533_vm0, %v694_v4, 0.0  ;;  %v695_v15 = vcombine.high %v694_v4, %v694_v4  ;;  %v834_v17 = vadd.f32 %v833_v51, %v832_v12  ;;  %v703_v19 = vcombine.high %v702_v6, %v702_v6 }
 0x150   : > { %v718_v20 = vrot.slane %v645_v5, %v1202_v28  ;;  %v837_v21 = vsel %vm533_vm0, %v702_v6, 0.0  ;;  %v1425_v22 = vsub.f32 %v1296_v16, %v1351_v56  ;;  %v648_v2 = vmul.f32 %v1403_v41, %v1403_v41 }
 0x151   : > { %v726_v9 = vrot.slane %v646_v7, %v1202_v28  ;;  %v836_v24 = vadd.f32 %v835_v13, %v834_v17  ;;  %v711_v25 = vcombine.high %v710_v10, %v710_v10  ;;  %v839_v27 = vsel %vm533_vm0, %v710_v10, 0.0 }
 0x152   : > { %v863_v33 = vsel %vm533_vm0, %v679_v8, 0.0  ;;  %v864_v35 = vsel %vm533_vm0, %v687_v11, 0.0  ;;  %v649_v36 = vmul.f32 %v1413_v14, %v1413_v14  ;;  %v866_v16 = vsel %vm533_vm0, %v695_v15, 0.0 }
 0x153   : > { %v838_v39 = vadd.f32 %v837_v21, %v836_v24  ;;  %v865_v40 = vadd.f32 %v864_v35, %v863_v33  ;;  %v719_v42 = vcombine.high %v718_v20, %v718_v20  ;;  %v734_v43 = vrot.slane %v647_v18, %v1202_v28 }
 0x154   : > { %v841_v44 = vsel %vm533_vm0, %v718_v20, 0.0  ;;  %v868_v45 = vsel %vm533_vm0, %v703_v19, 0.0  ;;  %v1441_v47 = vsub.f32 %v1305_v23, %v1351_v56  ;;  %v650_v48 = vmul.f32 %v1417_v58, %v1417_v58 }
 0x155   : > { %v840_v49 = vadd.f32 %v839_v27, %v838_v39  ;;  %v867_v50 = vadd.f32 %v866_v16, %v865_v40  ;;  %v727_v52 = vcombine.high %v726_v9, %v726_v9  ;;  %v742_v53 = vrot.slane %v648_v2, %v1202_v28 }
 0x156   : > { %v843_v55 = vsel %vm533_vm0, %v726_v9, 0.0  ;;  %v870_v29 = vsel %vm533_vm0, %v711_v25, 0.0  ;;  %v1450_v63 = vsub.f32 %v1314_v37, %v1351_v56  ;;  %v651_v23 = vmul.f32 %v1425_v22, %v1425_v22 }
 0x157   : > { %v842_v30 = vadd.f32 %v841_v44, %v840_v49  ;;  %v869_v32 = vadd.f32 %v868_v45, %v867_v50  ;;  %v735_v0 = vcombine.high %v734_v43, %v734_v43  ;;  %v750_v1 = vrot.slane %v649_v36, %v1202_v28 }
 0x158   : > { %v845_v3 = vsel %vm533_vm0, %v734_v43, 0.0  ;;  %v872_v4 = vsel %vm533_vm0, %v719_v42, 0.0  ;;  %v1459_v5 = vsub.f32 %v1323_v46, %v1351_v56  ;;  %v652_v37 = vmul.f32 %v1441_v47, %v1441_v47 }
 0x159   : > { %v844_v6 = vadd.f32 %v843_v55, %v842_v30  ;;  %v871_v7 = vadd.f32 %v870_v29, %v869_v32  ;;  %v743_v8 = vcombine.high %v742_v53, %v742_v53  ;;  %v758_v10 = vrot.slane %v650_v48, %v1202_v28 }
 0x15a   : > { %v847_v11 = vsel %vm533_vm0, %v742_v53, 0.0  ;;  %v874_v12 = vsel %vm533_vm0, %v727_v52, 0.0  ;;  %v1468_v51 = vsub.f32 %v1332_v54, %v1351_v56  ;;  %v653_v46 = vmul.f32 %v1450_v63, %v1450_v63 }
 0x15b   : > { %v846_v13 = vadd.f32 %v845_v3, %v844_v6  ;;  %v873_v15 = vadd.f32 %v872_v4, %v871_v7  ;;  %v751_v17 = vcombine.high %v750_v1, %v750_v1  ;;  %v766_v18 = vrot.slane %v651_v23, %v1202_v28 }
 0x15c   : > { %v849_v19 = vsel %vm533_vm0, %v750_v1, 0.0  ;;  %v876_v20 = vsel %vm533_vm0, %v735_v0, 0.0  ;;  %v654_v21 = vmul.f32 %v1459_v5, %v1459_v5  ;;  %v759_v24 = vcombine.high %v758_v10, %v758_v10 }
 0x15d   : > { %v848_v2 = vadd.f32 %v847_v11, %v846_v13  ;;  %v875_v9 = vadd.f32 %v874_v12, %v873_v15  ;;  %v774_v54 = vrot.slane %v652_v37, %v1202_v28  ;;  %v851_v56 = vsel %vm533_vm0, %v758_v10, 0.0 }
 0x15e   : > { %v878_v25 = vsel %vm533_vm0, %v743_v8, 0.0  ;;  %v655_v27 = vmul.f32 %v1468_v51, %v1468_v51  ;;  %v767_v36 = vcombine.high %v766_v18, %v766_v18  ;;  %v782_v39 = vrot.slane %v653_v46, %v1202_v28 }
 0x15f   : > { %v850_v33 = vadd.f32 %v849_v19, %v848_v2  ;;  %v877_v35 = vadd.f32 %v876_v20, %v875_v9  ;;  %v853_v40 = vsel %vm533_vm0, %v766_v18, 0.0  ;;  %v880_v16 = vsel %vm533_vm0, %v751_v17, 0.0 }
 0x160   : > { %v775_v44 = vcombine.high %v774_v54, %v774_v54  ;;  %v790_v45 = vrot.slane %v654_v21, %v1202_v28  ;;  %v855_v48 = vsel %vm533_vm0, %v774_v54, 0.0  ;;  %v882_v49 = vsel %vm533_vm0, %v759_v24, 0.0 }
 0x161   : > { %v852_v42 = vadd.f32 %v851_v56, %v850_v33  ;;  %v879_v43 = vadd.f32 %v878_v25, %v877_v35  ;;  %v783_v53 = vcombine.high %v782_v39, %v782_v39  ;;  %v798_v55 = vrot.slane %v655_v27, %v1202_v28 }
 0x162   : > { %v857_v29 = vsel %vm533_vm0, %v782_v39, 0.0  ;;  %v884_v23 = vsel %vm533_vm0, %v767_v36, 0.0  ;;  %v791_v0 = vcombine.high %v790_v45, %v790_v45  ;;  %v859_v1 = vsel %vm533_vm0, %v790_v45, 0.0 }
 0x163   : > { %v854_v50 = vadd.f32 %v853_v40, %v852_v42  ;;  %v881_v52 = vadd.f32 %v880_v16, %v879_v43  ;;  %v886_v3 = vsel %vm533_vm0, %v775_v44, 0.0  ;;  %v799_v6 = vcombine.high %v798_v55, %v798_v55 }
 0x164   : > { %v861_v7 = vsel %vm533_vm0, %v798_v55, 0.0  ;;  %v888_v8 = vsel %vm533_vm0, %v783_v53, 0.0  ;;  %v890_v12 = vsel %vm533_vm0, %v791_v0, 0.0  ;;  %v945_v44 = vsub.s32 0, %v1199_v26 }
 0x165   : > { %v856_v30 = vadd.f32 %v855_v48, %v854_v50  ;;  %v883_v32 = vadd.f32 %v882_v49, %v881_v52  ;;  %v892_v15 = vsel %vm533_vm0, %v799_v6, 0.0  ;;  %v949_v45 = vsub.s32 1, %v1199_v26  ;;  %v941_v48 = vld [vmem:[%s1597_s2] sm:$0x3] }
 0x166   : > { %v976_v49 = vld [vmem:[%s1598_s3] sm:$0x3]  ;;  %v946_v50 = vrot.slane %v941_v48, %v945_v44 }
 0x167   : > { %v858_v4 = vadd.f32 %v857_v29, %v856_v30  ;;  %v885_v37 = vadd.f32 %v884_v23, %v883_v32  ;;  %v950_v52 = vrot.slane %v941_v48, %v949_v45  ;;  %v981_v53 = vrot.slane %v976_v49, %v945_v44 }
 0x168   : > { %v985_v55 = vrot.slane %v976_v49, %v949_v45 }
 0x169   : > { %v860_v10 = vadd.f32 %v859_v1, %v858_v4  ;;  %v887_v11 = vadd.f32 %v886_v3, %v885_v37  ;;  %v951_v23 = vcombine.low %v946_v50, %v950_v52 }
 0x16a   : > { %v986_v32 = vcombine.low %v981_v53, %v985_v55 }
 0x16b   : > { %v862_v46 = vadd.f32 %v861_v7, %v860_v10  ;;  %v889_v13 = vadd.f32 %v888_v8, %v887_v11  ;;  %v958_v26 = vrot.slane %v951_v23, %v1202_v28 }
 0x16c   : > { %v1510_v3 = vrot.slane %v986_v32, %v1202_v28 }
 0x16d   : > { %v891_v17 = vadd.f32 %v890_v12, %v889_v13  ;;  %v894_v18 = vsel %vm533_vm0, %v862_v46, 0.0 }
 0x16e   : > { %v895_v19 = vrot.slane %v894_v18, 4 }
 0x16f   : > { %v893_v20 = vadd.f32 %v892_v15, %v891_v17 }
 0x170   : > { %v896_v21 = vadd.f32 %v895_v19, %v894_v18 }
 0x171   : > { %v901_v2 = vsel %vm533_vm0, %v893_v20, 0.0 }
 0x172   : > { %v897_v9 = vrot.slane %v896_v21, 2  ;;  %v902_v24 = vrot.slane %v901_v2, 4 }
 0x174   : > { %v898_v54 = vadd.f32 %v897_v9, %v896_v21  ;;  %v903_v56 = vadd.f32 %v902_v24, %v901_v2 }
 0x176   : > { %v899_v25 = vrot.slane %v898_v54, 1  ;;  %v904_v27 = vrot.slane %v903_v56, 2 }
 0x178   : > { %v900_v33 = vadd.f32 %v899_v25, %v898_v54  ;;  %v905_v35 = vadd.f32 %v904_v27, %v903_v56 }
 0x17a   : > { %v906_v36 = vrot.slane %v905_v35, 1  ;;  %v908_v39 = vmul.f32 0.03125, %v900_v33 }
 0x17c   : > { %v907_v40 = vadd.f32 %v906_v36, %v905_v35  ;;  %v910_v16 = vadd.f32 1e-05, %v908_v39 }
 0x17e   : > { %v909_v42 = vmul.f32 0.03125, %v907_v40  ;;  %1137 = vrsqrt.f32 %v910_v16 }
 0x180   : > { %v911_v43 = vadd.f32 1e-05, %v909_v42 }
 0x182   : > { %1139 = vrsqrt.f32 %v911_v43 }
 0x188   : > { %v1138_v29 = vpop.eup %1137 }
 0x18c   : > { %v1140_v30 = vpop.eup %1139 }
 0x18d   : > { %v916_v0 = vcombine.low %v1138_v29, %v1140_v30 }
 0x18f   : > { %v923_v1 = vrot.slane %v916_v0, %v1202_v28 }
 0x191   : > { %v925_v4 = vmul.f32 %v923_v1, %v1355_v57  ;;  %v926_v37 = vmul.f32 %v923_v1, %v1359_v59  ;;  %v927_v6 = vmul.f32 %v923_v1, %v1363_v60  ;;  %v928_v7 = vmul.f32 %v923_v1, %v1367_v61 }
 0x192   : > { %v929_v8 = vmul.f32 %v923_v1, %v1371_v62  ;;  %v930_v10 = vmul.f32 %v923_v1, %v1381_v31  ;;  %v931_v11 = vmul.f32 %v923_v1, %v1387_v34  ;;  %v932_v12 = vmul.f32 %v923_v1, %v1396_v38 }
 0x193   : > { %v960_v46 = vmul.f32 %v958_v26, %v925_v4  ;;  %v961_v13 = vmul.f32 %v958_v26, %v926_v37  ;;  %v962_v28 = vmul.f32 %v958_v26, %v927_v6  ;;  %v963_v15 = vmul.f32 %v958_v26, %v928_v7 }
 0x194   : > { %v964_v17 = vmul.f32 %v958_v26, %v929_v8  ;;  %v965_v57 = vmul.f32 %v958_v26, %v930_v10  ;;  %v966_v18 = vmul.f32 %v958_v26, %v931_v11  ;;  %v967_v59 = vmul.f32 %v958_v26, %v932_v12 }
 0x195   : > { %v995_v60 = vadd.f32 %v1510_v3, %v960_v46  ;;  %v996_v61 = vadd.f32 %v1510_v3, %v961_v13  ;;  %v997_v62 = vadd.f32 %v1510_v3, %v962_v28  ;;  %v998_v31 = vadd.f32 %v1510_v3, %v963_v15 }
 0x196   : > { %v999_v34 = vadd.f32 %v1510_v3, %v964_v17  ;;  %v1000_v38 = vadd.f32 %v1510_v3, %v965_v57  ;;  %v1001_v19 = vadd.f32 %v1510_v3, %v966_v18  ;;  %v1002_v20 = vadd.f32 %v1510_v3, %v967_v59 }
 0x197   : > { %v1011_v21 = vmax.f32 %v995_v60, 0.0  ;;  %v1012_v2 = vmax.f32 %v996_v61, 0.0  ;;  %v1013_v9 = vmax.f32 %v997_v62, 0.0  ;;  %v1014_v24 = vmax.f32 %v998_v31, 0.0 }
 0x198   : > { %v1015_v54 = vmax.f32 %v999_v34, 0.0  ;;  %v1016_v56 = vmax.f32 %v1000_v38, 0.0  ;;  %v1017_v25 = vmax.f32 %v1001_v19, 0.0  ;;  %v1018_v27 = vmax.f32 %v1002_v20, 0.0 }
 0x199   : > { %1027 = vst [vmem:[%s1599_s4] sm:$0xf] %v1011_v21  ;;  %1028 = vst [vmem:[%s1599_s4 + $0x4] sm:$0xf] %v1012_v2  ;;  %v933_v33 = vmul.f32 %v923_v1, %v1403_v41  ;;  %v934_v35 = vmul.f32 %v923_v1, %v1413_v14  ;;  %v935_v36 = vmul.f32 %v923_v1, %v1417_v58 }
 0x19a   : > { %1029 = vst [vmem:[%s1599_s4 + $0x8] sm:$0xf] %v1013_v9  ;;  %1030 = vst [vmem:[%s1599_s4 + $0xc] sm:$0xf] %v1014_v24  ;;  %v936_v39 = vmul.f32 %v923_v1, %v1425_v22  ;;  %v937_v41 = vmul.f32 %v923_v1, %v1441_v47  ;;  %v938_v14 = vmul.f32 %v923_v1, %v1450_v63 }
 0x19b   : > { %1031 = vst [vmem:[%s1599_s4 + $0x10] sm:$0xf] %v1015_v54  ;;  %1032 = vst [vmem:[%s1599_s4 + $0x14] sm:$0xf] %v1016_v56  ;;  %v939_v58 = vmul.f32 %v923_v1, %v1459_v5  ;;  %v940_v22 = vmul.f32 %v923_v1, %v1468_v51  ;;  %v968_v40 = vmul.f32 %v958_v26, %v933_v33 }
 0x19c   : > { %1033 = vst [vmem:[%s1599_s4 + $0x18] sm:$0xf] %v1017_v25  ;;  %1034 = vst [vmem:[%s1599_s4 + $0x1c] sm:$0xf] %v1018_v27  ;;  %v969_v16 = vmul.f32 %v958_v26, %v934_v35  ;;  %v970_v42 = vmul.f32 %v958_v26, %v935_v36  ;;  %v971_v43 = vmul.f32 %v958_v26, %v936_v39 }
 0x19d   : > { %v972_v44 = vmul.f32 %v958_v26, %v937_v41  ;;  %v973_v45 = vmul.f32 %v958_v26, %v938_v14  ;;  %v974_v48 = vmul.f32 %v958_v26, %v939_v58  ;;  %v975_v49 = vmul.f32 %v958_v26, %v940_v22 }
 0x19e   : > { %v1003_v50 = vadd.f32 %v1510_v3, %v968_v40  ;;  %v1004_v52 = vadd.f32 %v1510_v3, %v969_v16  ;;  %v1005_v47 = vadd.f32 %v1510_v3, %v970_v42  ;;  %v1006_v63 = vadd.f32 %v1510_v3, %v971_v43 }
 0x19f   : > { %v1007_v5 = vadd.f32 %v1510_v3, %v972_v44  ;;  %v1008_v51 = vadd.f32 %v1510_v3, %v973_v45  ;;  %v1009_v53 = vadd.f32 %v1510_v3, %v974_v48  ;;  %v1010_v55 = vadd.f32 %v1510_v3, %v975_v49 }
 0x1a0   : > { %v1019_v29 = vmax.f32 %v1003_v50, 0.0  ;;  %v1020_v23 = vmax.f32 %v1004_v52, 0.0  ;;  %v1021_v30 = vmax.f32 %v1005_v47, 0.0  ;;  %v1022_v32 = vmax.f32 %v1006_v63, 0.0 }
 0x1a1   : > { %v1023_v0 = vmax.f32 %v1007_v5, 0.0  ;;  %v1024_v1 = vmax.f32 %v1008_v51, 0.0  ;;  %v1025_v26 = vmax.f32 %v1009_v53, 0.0  ;;  %v1026_v4 = vmax.f32 %v1010_v55, 0.0 }
 0x1a2   : > { %1035 = vst [vmem:[%s1599_s4 + $0x20] sm:$0xf] %v1019_v29  ;;  %1036 = vst [vmem:[%s1599_s4 + $0x24] sm:$0xf] %v1020_v23 }
 0x1a3   : > { %1037 = vst [vmem:[%s1599_s4 + $0x28] sm:$0xf] %v1021_v30  ;;  %1038 = vst [vmem:[%s1599_s4 + $0x2c] sm:$0xf] %v1022_v32 }
 0x1a4   : > { %1039 = vst [vmem:[%s1599_s4 + $0x30] sm:$0xf] %v1023_v0  ;;  %1040 = vst [vmem:[%s1599_s4 + $0x34] sm:$0xf] %v1024_v1 }
 0x1a5   : > { %1041 = vst [vmem:[%s1599_s4 + $0x38] sm:$0xf] %v1025_v26  ;;  %1042 = vst [vmem:[%s1599_s4 + $0x3c] sm:$0xf] %v1026_v4 }
 0x1a6 PF: > { %s14_s15 = sadd.s32 1, %s1147_s15  }
 0x1a7   : > { %p11_p5 = scmp.ge.s32.totalorder %s14_s15, 18  }
 0x1a9   :  { %13 = sbr.rel (!%p11_p5) target bundleno = 1 (0x1), region = 67 }

// kernel: generator_forward.5
= control target key start
LH: loop header
LB: loop body
LE: loop exit
PB: predicated region body
PF: predicated region fallthrough
CT: control target
= control target key end

     0   :  { %s1564_s15 = smov 0   ;;  %s1820_s0 = inlined_call_operand.vmem [shape: bf16[4,32,1024], index: 0, kind: input, shape index: {}]   ;;  %s1821_s1 = inlined_call_operand.vmem [shape: bf16[4,1024,128], index: 1, kind: input, shape index: {}]   ;;  %s1822_s2 = inlined_call_operand.vmem [shape: f32[1,1,128], index: 2, kind: input, shape index: {}]   ;;  %s1823_s3 = inlined_call_operand.vmem [shape: f32[1,1,128], index: 3, kind: input, shape index: {}]   ;;  %s1824_s4 = inlined_call_operand.vmem [shape: f32[4,32,128], index: 4, kind: output, shape index: {}]  }
   0x1 LB: > { %s1570_s16 = sadd.s32 4294967295, %s1537_s15   ;;  %p1252_p0 = scmp.ge.s32.totalorder %s1537_s15, 1  ;;  %s1537_s15 = sphi %s1564_s15, %s14_s15  }
   0x2   : > { %p167_p1 = scmp.lt.s32.totalorder %s1537_s15, 5 }
   0x4   : > { %p168_p2 = pnand %p1252_p0, %p167_p1 }
   0x5   : > { %p193_p3 = scmp.lt.s32.totalorder (!%p168_p2), %s1570_s16, 3  ;;  %s1337_s26 = sshll.u32 (!%p168_p2), %s1570_s16, 5 }
   0x6   : > { %171 = sbr.rel (%p168_p2) target bundleno = 415 (0x19f), region = 36  ;;  %s1009_s29 = scalar_lea.vmem (!%p168_p2), %s1824_s4, %s1337_s26 }
   0x7   : > { %p1338_p4 = scmp.ne.s32.totalorder (!%p168_p2), %s1570_s16, 3 }
   0xd   : > { %s1576_s17 = scalar_select %p193_p3, %s1570_s16, 3 }
   0xf   : > { %s1344_s18 = sshll.u32 %s1576_s17, 9  ;;  %s1343_s22 = sshll.u32 %s1576_s17, 7 }
  0x10   : > { %s1582_s21 = scalar_lea.vmem %s1821_s1, %s1344_s18  ;;  %s1618_s25 = scalar_lea.vmem %s1820_s0, %s1343_s22 }
  0x11   : > { %v1465_v0 = vld [vmem:[%s1582_s21 + $0x40] sm:$0xff]   ;;  %v1469_v4 = vld [vmem:[%s1582_s21 + $0x48] sm:$0xff]   ;;  %v1473_v8 = vld [vmem:[%s1582_s21 + $0x50] sm:$0xff]  }
  0x12   : > { %v1466_v1 = vld [vmem:[%s1582_s21 + $0xc0] sm:$0xff]   ;;  %1345 = vmatprep.subr.bf16.mxu0 %v1465_v0  ;;  %v1470_v5 = vld [vmem:[%s1582_s21 + $0xc8] sm:$0xff]   ;;  %v1474_v9 = vld [vmem:[%s1582_s21 + $0xd0] sm:$0xff]  }
  0x13   : > { %v1467_v2 = vld [vmem:[%s1582_s21] sm:$0xff]   ;;  %1373 = vmatprep.subr.bf16.mxu1 %v1466_v1  ;;  %v1471_v6 = vld [vmem:[%s1582_s21 + $0x8] sm:$0xff]   ;;  %v1475_v10 = vld [vmem:[%s1582_s21 + $0x10] sm:$0xff]  }
  0x14   : > { %v1468_v3 = vld [vmem:[%s1582_s21 + $0x80] sm:$0xff]   ;;  %1346 = vmatpush3.bf16.msra.mxu0 %v1467_v2  ;;  %v1472_v7 = vld [vmem:[%s1582_s21 + $0x88] sm:$0xff]   ;;  %v1476_v11 = vld [vmem:[%s1582_s21 + $0x90] sm:$0xff]  }
  0x15   : > { %1374 = vmatpush3.bf16.msra.mxu1 %v1468_v3  ;;  %1347 = vmatprep.subr.bf16.mxu0 %v1469_v4  ;;  %v1477_v12 = vld [vmem:[%s1582_s21 + $0x58] sm:$0xff]   ;;  %v1481_v16 = vld [vmem:[%s1582_s21 + $0x60] sm:$0xff]   ;;  %v1485_v20 = vld [vmem:[%s1582_s21 + $0x68] sm:$0xff]  }
  0x16   : > { %1375 = vmatprep.subr.bf16.mxu1 %v1470_v5  ;;  %v1478_v13 = vld [vmem:[%s1582_s21 + $0xd8] sm:$0xff]   ;;  %v1482_v17 = vld [vmem:[%s1582_s21 + $0xe0] sm:$0xff]   ;;  %v1486_v21 = vld [vmem:[%s1582_s21 + $0xe8] sm:$0xff]  }
  0x17   : > { %v1479_v14 = vld [vmem:[%s1582_s21 + $0x18] sm:$0xff]   ;;  %v1483_v18 = vld [vmem:[%s1582_s21 + $0x20] sm:$0xff]   ;;  %v1487_v22 = vld [vmem:[%s1582_s21 + $0x28] sm:$0xff]  }
  0x18   : > { %1348 = vmatpush3.bf16.msra.mxu0 %v1471_v6  ;;  %v1480_v15 = vld [vmem:[%s1582_s21 + $0x98] sm:$0xff]   ;;  %v1484_v19 = vld [vmem:[%s1582_s21 + $0xa0] sm:$0xff]   ;;  %v1488_v23 = vld [vmem:[%s1582_s21 + $0xa8] sm:$0xff]  }
  0x19   : > { %1376 = vmatpush3.bf16.msra.mxu1 %v1472_v7  ;;  %1349 = vmatprep.subr.bf16.mxu0 %v1473_v8  ;;  %v1489_v24 = vld [vmem:[%s1582_s21 + $0x70] sm:$0xff]   ;;  %v1493_v28 = vld [vmem:[%s1582_s21 + $0x78] sm:$0xff]   ;;  %v204_v32 = vld [vmem:[%s1618_s25] sm:$0xff] }
  0x1a   : > { %1377 = vmatprep.subr.bf16.mxu1 %v1474_v9  ;;  %v1490_v25 = vld [vmem:[%s1582_s21 + $0xf0] sm:$0xff]   ;;  %v1494_v29 = vld [vmem:[%s1582_s21 + $0xf8] sm:$0xff]   ;;  %v208_v33 = vld [vmem:[%s1618_s25 + $0x20] sm:$0xff] }
  0x1b   : > { %v1491_v26 = vld [vmem:[%s1582_s21 + $0x30] sm:$0xff]   ;;  %v1495_v30 = vld [vmem:[%s1582_s21 + $0x38] sm:$0xff]   ;;  %v205_v34 = vld [vmem:[%s1618_s25 + $0x8] sm:$0xff]  ;;  %v1257_v35 = vcombine.low %v204_v32, %v208_v33  ;;  %v1258_v36 = vcombine.high %v204_v32, %v208_v33 }
  0x1c   : > { %1350 = vmatpush3.bf16.msra.mxu0 %v1475_v10  ;;  %v1492_v27 = vld [vmem:[%s1582_s21 + $0xb0] sm:$0xff]   ;;  %v1496_v31 = vld [vmem:[%s1582_s21 + $0xb8] sm:$0xff]   ;;  %v209_v37 = vld [vmem:[%s1618_s25 + $0x28] sm:$0xff] }
  0x1d   : > { %1378 = vmatpush3.bf16.msra.mxu1 %v1476_v11  ;;  %1351 = vmatprep.subr.bf16.mxu0 %v1477_v12  ;;  %v1259_v38 = vcombine.low %v205_v34, %v209_v37  ;;  %v1260_v39 = vcombine.high %v205_v34, %v209_v37  ;;  %v1497_v40 = vld [vmem:[%s1582_s21 + $0x140] sm:$0xff]   ;;  %v1501_v44 = vld [vmem:[%s1582_s21 + $0x148] sm:$0xff]   ;;  %v1505_v48 = vld [vmem:[%s1582_s21 + $0x150] sm:$0xff]  }
  0x1e   : > { %1379 = vmatprep.subr.bf16.mxu1 %v1478_v13  ;;  %844 = vmatprep.mubr.bf16.mxu0 %v1258_v36  ;;  %v1498_v41 = vld [vmem:[%s1582_s21 + $0x1c0] sm:$0xff]   ;;  %v1502_v45 = vld [vmem:[%s1582_s21 + $0x1c8] sm:$0xff]   ;;  %v1506_v49 = vld [vmem:[%s1582_s21 + $0x1d0] sm:$0xff]  }
  0x1f   : > { %893 = vmatprep.mubr.bf16.mxu1 %v1260_v39  ;;  %v1499_v42 = vld [vmem:[%s1582_s21 + $0x100] sm:$0xff]   ;;  %v1503_v46 = vld [vmem:[%s1582_s21 + $0x108] sm:$0xff]   ;;  %v1507_v50 = vld [vmem:[%s1582_s21 + $0x110] sm:$0xff]  }
  0x20   : > { %1352 = vmatpush3.bf16.msra.mxu0 %v1479_v14  ;;  %v1500_v43 = vld [vmem:[%s1582_s21 + $0x180] sm:$0xff]   ;;  %v1504_v47 = vld [vmem:[%s1582_s21 + $0x188] sm:$0xff]   ;;  %v1508_v51 = vld [vmem:[%s1582_s21 + $0x190] sm:$0xff]  }
  0x21   : > { %1380 = vmatpush3.bf16.msra.mxu1 %v1480_v15  ;;  %1353 = vmatprep.subr.bf16.mxu0 %v1481_v16  ;;  %v1509_v52 = vld [vmem:[%s1582_s21 + $0x158] sm:$0xff]   ;;  %v1513_v56 = vld [vmem:[%s1582_s21 + $0x160] sm:$0xff]   ;;  %v213_v63 = vld [vmem:[%s1618_s25 + $0x48] sm:$0xff] }
  0x22   : > { %1381 = vmatprep.subr.bf16.mxu1 %v1482_v17  ;;  %v1510_v53 = vld [vmem:[%s1582_s21 + $0x1d8] sm:$0xff]   ;;  %v1514_v57 = vld [vmem:[%s1582_s21 + $0x1e0] sm:$0xff]   ;;  %v217_v0 = vld [vmem:[%s1618_s25 + $0x68] sm:$0xff] }
  0x23   : > { %v1511_v54 = vld [vmem:[%s1582_s21 + $0x118] sm:$0xff]   ;;  %v1515_v58 = vld [vmem:[%s1582_s21 + $0x120] sm:$0xff]   ;;  %v1268_v2 = vcombine.high %v213_v63, %v217_v0  ;;  %v1517_v3 = vld [vmem:[%s1582_s21 + $0x168] sm:$0xff]   ;;  %v1267_v4 = vcombine.low %v213_v63, %v217_v0 }
  0x24   : > { %1354 = vmatpush3.bf16.msra.mxu0 %v1483_v18  ;;  %v1512_v55 = vld [vmem:[%s1582_s21 + $0x198] sm:$0xff]   ;;  %v1516_v59 = vld [vmem:[%s1582_s21 + $0x1a0] sm:$0xff]   ;;  %v1518_v5 = vld [vmem:[%s1582_s21 + $0x1e8] sm:$0xff]  }
  0x25   : > { %1382 = vmatpush3.bf16.msra.mxu1 %v1484_v19  ;;  %1355 = vmatprep.subr.bf16.mxu0 %v1485_v20  ;;  %v212_v60 = vld [vmem:[%s1618_s25 + $0x40] sm:$0xff]  ;;  %v1519_v6 = vld [vmem:[%s1582_s21 + $0x128] sm:$0xff]   ;;  %v1521_v8 = vld [vmem:[%s1582_s21 + $0x170] sm:$0xff]  }
  0x26   : > { %1383 = vmatprep.subr.bf16.mxu1 %v1486_v21  ;;  %v216_v61 = vld [vmem:[%s1618_s25 + $0x60] sm:$0xff]  ;;  %v1520_v7 = vld [vmem:[%s1582_s21 + $0x1a8] sm:$0xff]   ;;  %v1522_v9 = vld [vmem:[%s1582_s21 + $0x1f0] sm:$0xff]  }
  0x27   : > { %v1266_v62 = vcombine.high %v212_v60, %v216_v61  ;;  %v1265_v1 = vcombine.low %v212_v60, %v216_v61  ;;  %v1523_v10 = vld [vmem:[%s1582_s21 + $0x130] sm:$0xff]   ;;  %v1525_v12 = vld [vmem:[%s1582_s21 + $0x178] sm:$0xff]  }
  0x28   : > { %1356 = vmatpush3.bf16.msra.mxu0 %v1487_v22  ;;  %v1524_v11 = vld [vmem:[%s1582_s21 + $0x1b0] sm:$0xff]   ;;  %v1526_v13 = vld [vmem:[%s1582_s21 + $0x1f8] sm:$0xff]  }
  0x29   : > { %1384 = vmatpush3.bf16.msra.mxu1 %v1488_v23  ;;  %1357 = vmatprep.subr.bf16.mxu0 %v1489_v24  ;;  %v1527_v14 = vld [vmem:[%s1582_s21 + $0x138] sm:$0xff]   ;;  %v206_v16 = vld [vmem:[%s1618_s25 + $0x10] sm:$0xff] }
  0x2a   : > { %1385 = vmatprep.subr.bf16.mxu1 %v1490_v25  ;;  %v1528_v15 = vld [vmem:[%s1582_s21 + $0x1b8] sm:$0xff]   ;;  %v210_v17 = vld [vmem:[%s1618_s25 + $0x30] sm:$0xff] }
  0x2b   : > { %v207_v18 = vld [vmem:[%s1618_s25 + $0x18] sm:$0xff]  ;;  %v1261_v20 = vcombine.low %v206_v16, %v210_v17  ;;  %v1262_v21 = vcombine.high %v206_v16, %v210_v17  ;;  %v214_v24 = vld [vmem:[%s1618_s25 + $0x50] sm:$0xff] }
  0x2c   : > { %1358 = vmatpush3.bf16.msra.mxu0 %v1491_v26  ;;  %v211_v19 = vld [vmem:[%s1618_s25 + $0x38] sm:$0xff]  ;;  %v218_v25 = vld [vmem:[%s1618_s25 + $0x70] sm:$0xff] }
  0x2d   : > { %1386 = vmatpush3.bf16.msra.mxu1 %v1492_v27  ;;  %1359 = vmatprep.subr.bf16.mxu0 %v1493_v28  ;;  %v1263_v22 = vcombine.low %v207_v18, %v211_v19  ;;  %v1264_v23 = vcombine.high %v207_v18, %v211_v19  ;;  %v215_v26 = vld [vmem:[%s1618_s25 + $0x58] sm:$0xff]  ;;  %v1270_v27 = vcombine.high %v214_v24, %v218_v25 }
  0x2e   : > { %1387 = vmatprep.subr.bf16.mxu1 %v1494_v29  ;;  %v219_v28 = vld [vmem:[%s1618_s25 + $0x78] sm:$0xff] }
  0x2f   : > { %v1272_v29 = vcombine.high %v215_v26, %v219_v28 }
  0x30   : > { %1360 = vmatpush3.bf16.msra.mxu0 %v1495_v30  ;;  %v1269_v30 = vcombine.low %v214_v24, %v218_v25 }
  0x31   : > { %1388 = vmatpush3.bf16.msra.mxu1 %v1496_v31  ;;  %1401 = vmatprep.subr.bf16.mxu0 %v1497_v40  ;;  %v1271_v31 = vcombine.low %v215_v26, %v219_v28 }
  0x32   : > { %1429 = vmatprep.subr.bf16.mxu1 %v1498_v41 }
  0x33   : > { %845 = vmatmul.mubr.bf16.vlgmr.msra.gmra.mrb[0].mxu0 %v1257_v35 }
  0x34   : > { %894 = vmatmul.mubr.bf16.vlgmr.msra.gmra.mrb[0].mxu1 %v1259_v38  ;;  %1402 = vmatpush3.bf16.msra.mxu0 %v1499_v42 }
  0x35   : > { %1430 = vmatpush3.bf16.msra.mxu1 %v1500_v43  ;;  %1403 = vmatprep.subr.bf16.mxu0 %v1501_v44 }
  0x36   : > { %1431 = vmatprep.subr.bf16.mxu1 %v1502_v45  ;;  %852 = vmatprep.mubr.bf16.mxu0 %v1266_v62 }
  0x37   : > { %901 = vmatprep.mubr.bf16.mxu1 %v1268_v2 }
  0x38   : > { %1404 = vmatpush3.bf16.msra.mxu0 %v1503_v46 }
  0x39   : > { %1432 = vmatpush3.bf16.msra.mxu1 %v1504_v47  ;;  %1405 = vmatprep.subr.bf16.mxu0 %v1505_v48 }
  0x3a   : > { %1433 = vmatprep.subr.bf16.mxu1 %v1506_v49 }
  0x3b   : > { %853 = vmatmul.mubr.bf16.gmra.mrb[4].mxu0 %v1265_v1 }
  0x3c   : > { %1406 = vmatpush3.bf16.msra.mxu0 %v1507_v50  ;;  %902 = vmatmul.mubr.bf16.gmra.mrb[4].mxu1 %v1267_v4 }
  0x3d   : > { %1434 = vmatpush3.bf16.msra.mxu1 %v1508_v51  ;;  %1407 = vmatprep.subr.bf16.mxu0 %v1509_v52 }
  0x3e   : > { %1435 = vmatprep.subr.bf16.mxu1 %v1510_v53  ;;  %942 = vmatprep.mubr.bf16.mxu0 %v1262_v21 }
  0x3f   : > { %991 = vmatprep.mubr.bf16.mxu1 %v1264_v23 }
  0x40   : > { %1408 = vmatpush3.bf16.msra.mxu0 %v1511_v54 }
  0x41   : > { %1436 = vmatpush3.bf16.msra.mxu1 %v1512_v55  ;;  %1409 = vmatprep.subr.bf16.mxu0 %v1513_v56 }
  0x42   : > { %1437 = vmatprep.subr.bf16.mxu1 %v1514_v57 }
  0x44   : > { %1410 = vmatpush3.bf16.msra.mxu0 %v1515_v58 }
  0x45   : > { %1438 = vmatpush3.bf16.msra.mxu1 %v1516_v59  ;;  %1411 = vmatprep.subr.bf16.mxu0 %v1517_v3 }
  0x46   : > { %1439 = vmatprep.subr.bf16.mxu1 %v1518_v5 }
  0x48   : > { %1412 = vmatpush3.bf16.msra.mxu0 %v1519_v6 }
  0x49   : > { %1440 = vmatpush3.bf16.msra.mxu1 %v1520_v7  ;;  %1413 = vmatprep.subr.bf16.mxu0 %v1521_v8 }
  0x4a   : > { %1441 = vmatprep.subr.bf16.mxu1 %v1522_v9 }
  0x4c   : > { %1414 = vmatpush3.bf16.msra.mxu0 %v1523_v10 }
  0x4d   : > { %1442 = vmatpush3.bf16.msra.mxu1 %v1524_v11  ;;  %1415 = vmatprep.subr.bf16.mxu0 %v1525_v12 }
  0x4e   : > { %1443 = vmatprep.subr.bf16.mxu1 %v1526_v13 }
  0x50   : > { %1416 = vmatpush3.bf16.msra.mxu0 %v1527_v14 }
  0x51   : > { %1444 = vmatpush3.bf16.msra.mxu1 %v1528_v15 }
  0x53   : > { %943 = vmatmul.mubr.bf16.vlgmr.msra.gmra.mrb[8].mxu0 %v1261_v20 }
  0x54   : > { %992 = vmatmul.mubr.bf16.vlgmr.msra.gmra.mrb[8].mxu1 %v1263_v22  ;;  %950 = vmatprep.mubr.bf16.mxu0 %v1270_v27 }
  0x55   : > { %999 = vmatprep.mubr.bf16.mxu1 %v1272_v29 }
  0x5b   : > { %951 = vmatmul.mubr.bf16.gmra.mrb[12].mxu0 %v1269_v30 }
  0x5c   : > { %1000 = vmatmul.mubr.bf16.gmra.mrb[12].mxu1 %v1271_v31 }
 0x106   : > { %v1361_v32 = vpop.f32.mrb[0].mxu0 }
 0x107   : > { %v1389_v33 = vpop.f32.mrb[0].mxu1  ;;  %v1362_v34 = vpop.f32.mrb[1].mxu0 }
 0x108   : > { %v1363_v35 = vadd.f32 %v1362_v34, %v1361_v32  ;;  %v1390_v36 = vpop.f32.mrb[1].mxu1  ;;  %v1364_v37 = vpop.f32.mrb[2].mxu0 }
 0x109   : > { %v1391_v38 = vadd.f32 %v1390_v36, %v1389_v33  ;;  %v1392_v39 = vpop.f32.mrb[2].mxu1  ;;  %v1365_v40 = vpop.f32.mrb[3].mxu0 }
 0x10a   : > { %v1366_v41 = vadd.f32 %v1365_v40, %v1364_v37  ;;  %v1393_v42 = vpop.f32.mrb[3].mxu1 }
 0x10b   : > { %v896_v43 = vadd.f32 %v1391_v38, %v1363_v35  ;;  %v1394_v44 = vadd.f32 %v1393_v42, %v1392_v39 }
 0x10d   : > { %v899_v45 = vadd.f32 %v1394_v44, %v1366_v41 }
 0x10e   : > { %v1367_v46 = vpop.f32.mrb[4].mxu0 }
 0x10f   : > { %v1395_v47 = vpop.f32.mrb[4].mxu1  ;;  %v1368_v48 = vpop.f32.mrb[5].mxu0 }
 0x110   : > { %v1369_v49 = vadd.f32 %v1368_v48, %v1367_v46  ;;  %v1396_v50 = vpop.f32.mrb[5].mxu1  ;;  %v1370_v51 = vpop.f32.mrb[6].mxu0 }
 0x111   : > { %v1397_v52 = vadd.f32 %v1396_v50, %v1395_v47  ;;  %v1398_v53 = vpop.f32.mrb[6].mxu1  ;;  %v1371_v54 = vpop.f32.mrb[7].mxu0 }
 0x112   : > { %v1372_v55 = vadd.f32 %v1371_v54, %v1370_v51  ;;  %v1399_v56 = vpop.f32.mrb[7].mxu1 }
 0x113   : > { %v904_v57 = vadd.f32 %v1397_v52, %v1369_v49  ;;  %v1400_v58 = vadd.f32 %v1399_v56, %v1398_v53 }
 0x115   : > { %v907_v59 = vadd.f32 %v1400_v58, %v1372_v55 }
 0x126   : > { %v1417_v60 = vpop.f32.mrb[8].mxu0 }
 0x127   : > { %v1445_v61 = vpop.f32.mrb[8].mxu1  ;;  %v1418_v62 = vpop.f32.mrb[9].mxu0 }
 0x128   : > { %v1446_v63 = vpop.f32.mrb[9].mxu1  ;;  %v1419_v0 = vadd.f32 %v1418_v62, %v1417_v60  ;;  %v1420_v2 = vpop.f32.mrb[10].mxu0 }
 0x129   : > { %v1447_v1 = vadd.f32 %v1446_v63, %v1445_v61  ;;  %v1448_v3 = vpop.f32.mrb[10].mxu1  ;;  %v1421_v4 = vpop.f32.mrb[11].mxu0 }
 0x12a   : > { %v1449_v5 = vpop.f32.mrb[11].mxu1  ;;  %v945_v6 = vadd.f32 %v1419_v0, %v896_v43  ;;  %v1422_v7 = vadd.f32 %v1421_v4, %v1420_v2 }
 0x12b   : > { %v1450_v8 = vadd.f32 %v1449_v5, %v1448_v3 }
 0x12c   : > { %v994_v9 = vadd.f32 %v1447_v1, %v945_v6  ;;  %v948_v10 = vadd.f32 %v1422_v7, %v899_v45 }
 0x12e   : > { %1010 = vst [vmem:[%s1009_s29] sm:$0xff] %v994_v9  ;;  %v997_v11 = vadd.f32 %v1450_v8, %v948_v10  ;;  %v1423_v12 = vpop.f32.mrb[12].mxu0 }
 0x12f   : > { %v1451_v13 = vpop.f32.mrb[12].mxu1  ;;  %v1424_v14 = vpop.f32.mrb[13].mxu0 }
 0x130   : > { %v1452_v15 = vpop.f32.mrb[13].mxu1  ;;  %1011 = vst [vmem:[%s1009_s29 + $0x8] sm:$0xff] %v997_v11  ;;  %v1425_v16 = vadd.f32 %v1424_v14, %v1423_v12  ;;  %v1426_v18 = vpop.f32.mrb[14].mxu0 }
 0x131   : > { %v1453_v17 = vadd.f32 %v1452_v15, %v1451_v13  ;;  %v1454_v19 = vpop.f32.mrb[14].mxu1  ;;  %v1427_v20 = vpop.f32.mrb[15].mxu0 }
 0x132   : > { %v1455_v21 = vpop.f32.mrb[15].mxu1  ;;  %v953_v22 = vadd.f32 %v1425_v16, %v904_v57  ;;  %v1428_v23 = vadd.f32 %v1427_v20, %v1426_v18  ;;  %1017 = sbr.rel (%p1338_p4) target bundleno = 415 (0x19f), region = 40 }
 0x133   : > { %v1456_v24 = vadd.f32 %v1455_v21, %v1454_v19 }
 0x134   : > { %v1002_v25 = vadd.f32 %v1453_v17, %v953_v22  ;;  %v956_v26 = vadd.f32 %v1428_v23, %v907_v59 }
 0x136   : > { %1012 = vst [vmem:[%s1009_s29 + $0x10] sm:$0xff] %v1002_v25  ;;  %v1005_v27 = vadd.f32 %v1456_v24, %v956_v26 }
 0x138   : > { %1013 = vst [vmem:[%s1009_s29 + $0x18] sm:$0xff] %v1005_v27 }
 0x13f   : > { %v1018_v28 = vld [vmem:[%s1824_s4] sm:$0xff]  ;;  %v1019_v29 = vld [vmem:[%s1824_s4 + $0x8] sm:$0xff]  ;;  %v1020_v30 = vld [vmem:[%s1824_s4 + $0x10] sm:$0xff] }
 0x140   : > { %v1021_v31 = vld [vmem:[%s1824_s4 + $0x18] sm:$0xff]  ;;  %v1022_v32 = vld [vmem:[%s1824_s4 + $0x20] sm:$0xff]  ;;  %v1023_v33 = vld [vmem:[%s1824_s4 + $0x28] sm:$0xff] }
 0x141   : > { %v1024_v34 = vld [vmem:[%s1824_s4 + $0x30] sm:$0xff]  ;;  %v1025_v35 = vld [vmem:[%s1824_s4 + $0x38] sm:$0xff]  ;;  %v1026_v36 = vld [vmem:[%s1824_s4 + $0x40] sm:$0xff]  ;;  %v1034_v37 = vadd.f32 %v1022_v32, %v1018_v28  ;;  %v1037_v38 = vadd.f32 %v1023_v33, %v1019_v29 }
 0x142   : > { %v1027_v39 = vld [vmem:[%s1824_s4 + $0x48] sm:$0xff]  ;;  %v1028_v40 = vld [vmem:[%s1824_s4 + $0x50] sm:$0xff]  ;;  %v1029_v41 = vld [vmem:[%s1824_s4 + $0x58] sm:$0xff]  ;;  %v1040_v42 = vadd.f32 %v1024_v34, %v1020_v30  ;;  %v1043_v43 = vadd.f32 %v1025_v35, %v1021_v31 }
 0x143   : > { %v1030_v44 = vld [vmem:[%s1824_s4 + $0x60] sm:$0xff]  ;;  %v1031_v45 = vld [vmem:[%s1824_s4 + $0x68] sm:$0xff]  ;;  %v1032_v46 = vld [vmem:[%s1824_s4 + $0x70] sm:$0xff]  ;;  %v1035_v47 = vadd.f32 %v1034_v37, %v1026_v36  ;;  %v1038_v48 = vadd.f32 %v1037_v38, %v1027_v39 }
 0x144   : > { %v1033_v49 = vld [vmem:[%s1824_s4 + $0x78] sm:$0xff]  ;;  %v1041_v50 = vadd.f32 %v1040_v42, %v1028_v40  ;;  %v1044_v51 = vadd.f32 %v1043_v43, %v1029_v41 }
 0x145   : > { %v1036_v52 = vadd.f32 %v1035_v47, %v1030_v44  ;;  %v1039_v53 = vadd.f32 %v1038_v48, %v1031_v45 }
 0x146   : > { %v1042_v54 = vadd.f32 %v1041_v50, %v1032_v46  ;;  %v1045_v55 = vadd.f32 %v1044_v51, %v1033_v49 }
 0x147   : > { %v1046_v56 = vadd.f32 %v1039_v53, %v1036_v52 }
 0x149   : > { %v1047_v57 = vadd.f32 %v1046_v56, %v1042_v54 }
 0x14b   : > { %v1048_v58 = vadd.f32 %v1047_v57, %v1045_v55 }
 0x14d   : > { %v1049_v59 = vrot.slane %v1048_v58, 4 }
 0x14f   : > { %v1050_v60 = vadd.f32 %v1049_v59, %v1048_v58  ;;  %v1339_v58 = vld [vmem:[%s1822_s2] ss:$0 sm:$0xff] }
 0x151   : > { %v1051_v61 = vrot.slane %v1050_v60, 2 }
 0x153   : > { %v1052_v62 = vadd.f32 %v1051_v61, %v1050_v60 }
 0x155   : > { %v1053_v63 = vrot.slane %v1052_v62, 1 }
 0x157   : > { %v1054_v0 = vadd.f32 %v1053_v63, %v1052_v62  ;;  %v1340_v63 = vld [vmem:[%s1823_s3] ss:$0 sm:$0xff] }
 0x159   : > { %v1056_v1 = vmul.f32 0.0078125, %v1054_v0 }
 0x15b   : > { %v1057_v2 = vsub.f32 %v1018_v28, %v1056_v1  ;;  %v1058_v3 = vsub.f32 %v1019_v29, %v1056_v1  ;;  %v1059_v4 = vsub.f32 %v1020_v30, %v1056_v1  ;;  %v1060_v5 = vsub.f32 %v1021_v31, %v1056_v1 }
 0x15c   : > { %v1061_v6 = vsub.f32 %v1022_v32, %v1056_v1  ;;  %v1062_v7 = vsub.f32 %v1023_v33, %v1056_v1  ;;  %v1063_v8 = vsub.f32 %v1024_v34, %v1056_v1  ;;  %v1064_v9 = vsub.f32 %v1025_v35, %v1056_v1 }
 0x15d   : > { %v1723_v10 = vsub.f32 %v1026_v36, %v1056_v1  ;;  %v1725_v11 = vsub.f32 %v1027_v39, %v1056_v1  ;;  %v1727_v12 = vsub.f32 %v1028_v40, %v1056_v1  ;;  %v1729_v13 = vsub.f32 %v1029_v41, %v1056_v1 }
 0x15e   : > { %v1731_v14 = vsub.f32 %v1030_v44, %v1056_v1  ;;  %v1733_v15 = vsub.f32 %v1031_v45, %v1056_v1  ;;  %v1735_v16 = vsub.f32 %v1032_v46, %v1056_v1  ;;  %v1737_v17 = vsub.f32 %v1033_v49, %v1056_v1 }
 0x15f   : > { %v1073_v18 = vmul.f32 %v1057_v2, %v1057_v2  ;;  %v1074_v19 = vmul.f32 %v1058_v3, %v1058_v3  ;;  %v1075_v20 = vmul.f32 %v1059_v4, %v1059_v4  ;;  %v1076_v21 = vmul.f32 %v1060_v5, %v1060_v5 }
 0x160   : > { %v1077_v22 = vmul.f32 %v1061_v6, %v1061_v6  ;;  %v1078_v23 = vmul.f32 %v1062_v7, %v1062_v7  ;;  %v1079_v24 = vmul.f32 %v1063_v8, %v1063_v8  ;;  %v1080_v25 = vmul.f32 %v1064_v9, %v1064_v9 }
 0x161   : > { %v1081_v26 = vmul.f32 %v1723_v10, %v1723_v10  ;;  %v1082_v27 = vmul.f32 %v1725_v11, %v1725_v11  ;;  %v1083_v28 = vmul.f32 %v1727_v12, %v1727_v12  ;;  %v1084_v29 = vmul.f32 %v1729_v13, %v1729_v13 }
 0x162   : > { %v1085_v30 = vmul.f32 %v1731_v14, %v1731_v14  ;;  %v1086_v31 = vmul.f32 %v1733_v15, %v1733_v15  ;;  %v1087_v32 = vmul.f32 %v1735_v16, %v1735_v16  ;;  %v1089_v33 = vadd.f32 %v1077_v22, %v1073_v18 }
 0x163   : > { %v1092_v34 = vadd.f32 %v1078_v23, %v1074_v19  ;;  %v1095_v35 = vadd.f32 %v1079_v24, %v1075_v20  ;;  %v1098_v36 = vadd.f32 %v1080_v25, %v1076_v21  ;;  %v1088_v37 = vmul.f32 %v1737_v17, %v1737_v17 }
 0x164   : > { %v1090_v38 = vadd.f32 %v1089_v33, %v1081_v26 }
 0x165   : > { %v1093_v39 = vadd.f32 %v1092_v34, %v1082_v27  ;;  %v1096_v40 = vadd.f32 %v1095_v35, %v1083_v28  ;;  %v1099_v41 = vadd.f32 %v1098_v36, %v1084_v29 }
 0x166   : > { %v1091_v42 = vadd.f32 %v1090_v38, %v1085_v30 }
 0x167   : > { %v1094_v43 = vadd.f32 %v1093_v39, %v1086_v31  ;;  %v1097_v44 = vadd.f32 %v1096_v40, %v1087_v32  ;;  %v1100_v45 = vadd.f32 %v1099_v41, %v1088_v37 }
 0x169   : > { %v1101_v46 = vadd.f32 %v1094_v43, %v1091_v42 }
 0x16b   : > { %v1102_v47 = vadd.f32 %v1101_v46, %v1097_v44 }
 0x16d   : > { %v1103_v48 = vadd.f32 %v1102_v47, %v1100_v45 }
 0x16f   : > { %v1104_v49 = vrot.slane %v1103_v48, 4 }
 0x171   : > { %v1105_v50 = vadd.f32 %v1104_v49, %v1103_v48 }
 0x173   : > { %v1106_v51 = vrot.slane %v1105_v50, 2 }
 0x175   : > { %v1107_v52 = vadd.f32 %v1106_v51, %v1105_v50 }
 0x177   : > { %v1108_v53 = vrot.slane %v1107_v52, 1 }
 0x179   : > { %v1109_v54 = vadd.f32 %v1108_v53, %v1107_v52 }
 0x17b   : > { %v1110_v55 = vmul.f32 0.0078125, %v1109_v54 }
 0x17d   : > { %v1111_v56 = vadd.f32 1e-05, %v1110_v55 }
 0x17f   : > { %1529 = vrsqrt.f32 %v1111_v56 }
 0x189   : > { %v1530_v57 = vpop.eup %1529 }
 0x18a   : > { %v1113_v59 = vmul.f32 %v1530_v57, %v1057_v2  ;;  %v1114_v60 = vmul.f32 %v1530_v57, %v1058_v3  ;;  %v1115_v61 = vmul.f32 %v1530_v57, %v1059_v4  ;;  %v1116_v62 = vmul.f32 %v1530_v57, %v1060_v5 }
 0x18b   : > { %v1117_v0 = vmul.f32 %v1530_v57, %v1061_v6  ;;  %v1118_v1 = vmul.f32 %v1530_v57, %v1062_v7  ;;  %v1119_v18 = vmul.f32 %v1530_v57, %v1063_v8  ;;  %v1120_v19 = vmul.f32 %v1530_v57, %v1064_v9 }
 0x18c   : > { %v1136_v20 = vmul.f32 %v1339_v58, %v1113_v59  ;;  %v1137_v21 = vmul.f32 %v1339_v58, %v1114_v60  ;;  %v1138_v22 = vmul.f32 %v1339_v58, %v1115_v61  ;;  %v1139_v23 = vmul.f32 %v1339_v58, %v1116_v62 }
 0x18d   : > { %v1140_v24 = vmul.f32 %v1339_v58, %v1117_v0  ;;  %v1141_v25 = vmul.f32 %v1339_v58, %v1118_v1  ;;  %v1142_v26 = vmul.f32 %v1339_v58, %v1119_v18  ;;  %v1143_v27 = vmul.f32 %v1339_v58, %v1120_v19 }
 0x18e   : > { %v1159_v2 = vadd.f32 %v1340_v63, %v1136_v20  ;;  %v1160_v3 = vadd.f32 %v1340_v63, %v1137_v21  ;;  %v1161_v4 = vadd.f32 %v1340_v63, %v1138_v22  ;;  %v1162_v5 = vadd.f32 %v1340_v63, %v1139_v23 }
 0x18f   : > { %v1163_v28 = vadd.f32 %v1340_v63, %v1140_v24  ;;  %v1164_v29 = vadd.f32 %v1340_v63, %v1141_v25  ;;  %v1165_v30 = vadd.f32 %v1340_v63, %v1142_v26  ;;  %v1166_v31 = vadd.f32 %v1340_v63, %v1143_v27 }
 0x190   : > { %v1175_v6 = vmax.f32 %v1159_v2, 0.0  ;;  %v1176_v7 = vmax.f32 %v1160_v3, 0.0  ;;  %v1177_v8 = vmax.f32 %v1161_v4, 0.0  ;;  %v1178_v9 = vmax.f32 %v1162_v5, 0.0 }
 0x191   : > { %v1179_v32 = vmax.f32 %v1163_v28, 0.0  ;;  %v1180_v33 = vmax.f32 %v1164_v29, 0.0  ;;  %v1181_v34 = vmax.f32 %v1165_v30, 0.0  ;;  %v1182_v35 = vmax.f32 %v1166_v31, 0.0 }
 0x192   : > { %1191 = vst [vmem:[%s1824_s4] sm:$0xff] %v1175_v6  ;;  %1192 = vst [vmem:[%s1824_s4 + $0x8] sm:$0xff] %v1176_v7  ;;  %v1121_v36 = vmul.f32 %v1530_v57, %v1723_v10  ;;  %v1122_v37 = vmul.f32 %v1530_v57, %v1725_v11  ;;  %v1123_v38 = vmul.f32 %v1530_v57, %v1727_v12 }
 0x193   : > { %1193 = vst [vmem:[%s1824_s4 + $0x10] sm:$0xff] %v1177_v8  ;;  %1194 = vst [vmem:[%s1824_s4 + $0x18] sm:$0xff] %v1178_v9  ;;  %v1124_v39 = vmul.f32 %v1530_v57, %v1729_v13  ;;  %v1125_v10 = vmul.f32 %v1530_v57, %v1731_v14  ;;  %v1126_v11 = vmul.f32 %v1530_v57, %v1733_v15 }
 0x194   : > { %1195 = vst [vmem:[%s1824_s4 + $0x20] sm:$0xff] %v1179_v32  ;;  %1196 = vst [vmem:[%s1824_s4 + $0x28] sm:$0xff] %v1180_v33  ;;  %v1127_v12 = vmul.f32 %v1530_v57, %v1735_v16  ;;  %v1128_v13 = vmul.f32 %v1530_v57, %v1737_v17  ;;  %v1144_v40 = vmul.f32 %v1339_v58, %v1121_v36 }
 0x195   : > { %1197 = vst [vmem:[%s1824_s4 + $0x30] sm:$0xff] %v1181_v34  ;;  %1198 = vst [vmem:[%s1824_s4 + $0x38] sm:$0xff] %v1182_v35  ;;  %v1145_v41 = vmul.f32 %v1339_v58, %v1122_v37  ;;  %v1146_v42 = vmul.f32 %v1339_v58, %v1123_v38  ;;  %v1147_v43 = vmul.f32 %v1339_v58, %v1124_v39 }
 0x196   : > { %v1148_v44 = vmul.f32 %v1339_v58, %v1125_v10  ;;  %v1149_v45 = vmul.f32 %v1339_v58, %v1126_v11  ;;  %v1150_v46 = vmul.f32 %v1339_v58, %v1127_v12  ;;  %v1151_v47 = vmul.f32 %v1339_v58, %v1128_v13 }
 0x197   : > { %v1167_v48 = vadd.f32 %v1340_v63, %v1144_v40  ;;  %v1168_v49 = vadd.f32 %v1340_v63, %v1145_v41  ;;  %v1169_v50 = vadd.f32 %v1340_v63, %v1146_v42  ;;  %v1170_v51 = vadd.f32 %v1340_v63, %v1147_v43 }
 0x198   : > { %v1171_v52 = vadd.f32 %v1340_v63, %v1148_v44  ;;  %v1172_v14 = vadd.f32 %v1340_v63, %v1149_v45  ;;  %v1173_v53 = vadd.f32 %v1340_v63, %v1150_v46  ;;  %v1174_v15 = vadd.f32 %v1340_v63, %v1151_v47 }
 0x199   : > { %v1183_v54 = vmax.f32 %v1167_v48, 0.0  ;;  %v1184_v16 = vmax.f32 %v1168_v49, 0.0  ;;  %v1185_v55 = vmax.f32 %v1169_v50, 0.0  ;;  %v1186_v17 = vmax.f32 %v1170_v51, 0.0 }
 0x19a   : > { %v1187_v56 = vmax.f32 %v1171_v52, 0.0  ;;  %v1188_v57 = vmax.f32 %v1172_v14, 0.0  ;;  %v1189_v59 = vmax.f32 %v1173_v53, 0.0  ;;  %v1190_v60 = vmax.f32 %v1174_v15, 0.0 }
 0x19b   : > { %1199 = vst [vmem:[%s1824_s4 + $0x40] sm:$0xff] %v1183_v54  ;;  %1200 = vst [vmem:[%s1824_s4 + $0x48] sm:$0xff] %v1184_v16 }
 0x19c   : > { %1201 = vst [vmem:[%s1824_s4 + $0x50] sm:$0xff] %v1185_v55  ;;  %1202 = vst [vmem:[%s1824_s4 + $0x58] sm:$0xff] %v1186_v17 }
 0x19d   : > { %1203 = vst [vmem:[%s1824_s4 + $0x60] sm:$0xff] %v1187_v56  ;;  %1204 = vst [vmem:[%s1824_s4 + $0x68] sm:$0xff] %v1188_v57 }
 0x19e   : > { %1205 = vst [vmem:[%s1824_s4 + $0x70] sm:$0xff] %v1189_v59  ;;  %1206 = vst [vmem:[%s1824_s4 + $0x78] sm:$0xff] %v1190_v60 }
 0x19f PF: > { %s14_s15 = sadd.s32 1, %s1537_s15  }
 0x1a0   : > { %p11_p5 = scmp.ge.s32.totalorder %s14_s15, 6  }
 0x1a2   :  { %13 = sbr.rel (!%p11_p5) target bundleno = 1 (0x1), region = 70 }

// kernel: generator_forward.6
= control target key start
LH: loop header
LB: loop body
LE: loop exit
PB: predicated region body
PF: predicated region fallthrough
CT: control target
= control target key end

     0   :  { %s1910_s15 = smov 0   ;;  %s3255_s0 = inlined_call_operand.vmem [shape: bf16[4,128,512], index: 0, kind: input, shape index: {}]   ;;  %s3256_s1 = inlined_call_operand.vmem [shape: bf16[4,512,128], index: 1, kind: input, shape index: {}]   ;;  %s3257_s2 = inlined_call_operand.vmem [shape: f32[1,1,128], index: 2, kind: input, shape index: {}]   ;;  %s3258_s3 = inlined_call_operand.vmem [shape: f32[1,1,128], index: 3, kind: input, shape index: {}]   ;;  %s3259_s4 = inlined_call_operand.vmem [shape: f32[4,128,128], index: 4, kind: output, shape index: {}]  }
   0x1 LB: > { %s1916_s16 = sadd.s32 4294967295, %s1883_s15   ;;  %p1582_p0 = scmp.ge.s32.totalorder %s1883_s15, 1  ;;  %s1883_s15 = sphi %s1910_s15, %s14_s15  }
   0x2   : > { %p167_p1 = scmp.lt.s32.totalorder %s1883_s15, 5 }
   0x4   : > { %p168_p2 = pnand %p1582_p0, %p167_p1 }
   0x5   : > { %p193_p3 = scmp.lt.s32.totalorder (!%p168_p2), %s1916_s16, 3  ;;  %s1651_s25 = sshll.u32 (!%p168_p2), %s1916_s16, 7 }
   0x6   : > { %171 = sbr.rel (%p168_p2) target bundleno = 552 (0x228), region = 36  ;;  %s2007_s28 = scalar_lea.vmem (!%p168_p2), %s3259_s4, %s1651_s25 }
   0x7   : > { %p1652_p4 = scmp.ne.s32.totalorder (!%p168_p2), %s1916_s16, 3 }
   0xd   : > { %s1922_s17 = scalar_select %p193_p3, %s1916_s16, 3 }
   0xf   : > { %s1657_s18 = sshll.u32 %s1922_s17, 8 }
  0x10   : > { %s1930_s21 = scalar_lea.vmem %s3256_s1, %s1657_s18  ;;  %s1967_s24 = scalar_lea.vmem %s3255_s0, %s1657_s18 }
  0x11   : > { %v1795_v0 = vld [vmem:[%s1930_s21 + $0x40] sm:$0xff]   ;;  %v1799_v4 = vld [vmem:[%s1930_s21 + $0x48] sm:$0xff]   ;;  %v1803_v8 = vld [vmem:[%s1930_s21 + $0x50] sm:$0xff]  }
  0x12   : > { %v1796_v1 = vld [vmem:[%s1930_s21 + $0xc0] sm:$0xff]   ;;  %1659 = vmatprep.subr.bf16.mxu0 %v1795_v0  ;;  %v1800_v5 = vld [vmem:[%s1930_s21 + $0xc8] sm:$0xff]   ;;  %v1804_v9 = vld [vmem:[%s1930_s21 + $0xd0] sm:$0xff]  }
  0x13   : > { %v1797_v2 = vld [vmem:[%s1930_s21] sm:$0xff]   ;;  %1723 = vmatprep.subr.bf16.mxu1 %v1796_v1  ;;  %v1801_v6 = vld [vmem:[%s1930_s21 + $0x8] sm:$0xff]   ;;  %v1805_v10 = vld [vmem:[%s1930_s21 + $0x10] sm:$0xff]  }
  0x14   : > { %v1798_v3 = vld [vmem:[%s1930_s21 + $0x80] sm:$0xff]   ;;  %1660 = vmatpush3.bf16.msra.mxu0 %v1797_v2  ;;  %v1802_v7 = vld [vmem:[%s1930_s21 + $0x88] sm:$0xff]   ;;  %v1806_v11 = vld [vmem:[%s1930_s21 + $0x90] sm:$0xff]  }
  0x15   : > { %1724 = vmatpush3.bf16.msra.mxu1 %v1798_v3  ;;  %1661 = vmatprep.subr.bf16.mxu0 %v1799_v4  ;;  %v1807_v12 = vld [vmem:[%s1930_s21 + $0x58] sm:$0xff]   ;;  %v1811_v16 = vld [vmem:[%s1930_s21 + $0x60] sm:$0xff]   ;;  %v1815_v20 = vld [vmem:[%s1930_s21 + $0x68] sm:$0xff]  }
  0x16   : > { %1725 = vmatprep.subr.bf16.mxu1 %v1800_v5  ;;  %v1808_v13 = vld [vmem:[%s1930_s21 + $0xd8] sm:$0xff]   ;;  %v1812_v17 = vld [vmem:[%s1930_s21 + $0xe0] sm:$0xff]   ;;  %v1816_v21 = vld [vmem:[%s1930_s21 + $0xe8] sm:$0xff]  }
  0x17   : > { %v1809_v14 = vld [vmem:[%s1930_s21 + $0x18] sm:$0xff]   ;;  %v1813_v18 = vld [vmem:[%s1930_s21 + $0x20] sm:$0xff]   ;;  %v1817_v22 = vld [vmem:[%s1930_s21 + $0x28] sm:$0xff]  }
  0x18   : > { %1662 = vmatpush3.bf16.msra.mxu0 %v1801_v6  ;;  %v1810_v15 = vld [vmem:[%s1930_s21 + $0x98] sm:$0xff]   ;;  %v1814_v19 = vld [vmem:[%s1930_s21 + $0xa0] sm:$0xff]   ;;  %v1818_v23 = vld [vmem:[%s1930_s21 + $0xa8] sm:$0xff]  }
  0x19   : > { %1726 = vmatpush3.bf16.msra.mxu1 %v1802_v7  ;;  %1663 = vmatprep.subr.bf16.mxu0 %v1803_v8  ;;  %v1819_v24 = vld [vmem:[%s1930_s21 + $0x70] sm:$0xff]   ;;  %v1823_v28 = vld [vmem:[%s1930_s21 + $0x78] sm:$0xff]  }
  0x1a   : > { %1727 = vmatprep.subr.bf16.mxu1 %v1804_v9  ;;  %v1820_v25 = vld [vmem:[%s1930_s21 + $0xf0] sm:$0xff]   ;;  %v1824_v29 = vld [vmem:[%s1930_s21 + $0xf8] sm:$0xff]  }
  0x1b   : > { %v1821_v26 = vld [vmem:[%s1930_s21 + $0x30] sm:$0xff]   ;;  %v1825_v30 = vld [vmem:[%s1930_s21 + $0x38] sm:$0xff]  }
  0x1c   : > { %1664 = vmatpush3.bf16.msra.mxu0 %v1805_v10  ;;  %v1822_v27 = vld [vmem:[%s1930_s21 + $0xb0] sm:$0xff]   ;;  %v1826_v31 = vld [vmem:[%s1930_s21 + $0xb8] sm:$0xff]  }
  0x1d   : > { %1728 = vmatpush3.bf16.msra.mxu1 %v1806_v11  ;;  %1665 = vmatprep.subr.bf16.mxu0 %v1807_v12  ;;  %v1827_v32 = vld [vmem:[%s1967_s24] ss:$16 sps:$4 sm:$0xff]   ;;  %v1829_v33 = vld [vmem:[%s1967_s24 + $0x4] ss:$16 sps:$4 sm:$0xff]   ;;  %v1830_v34 = vld [vmem:[%s1967_s24 + $0x8] ss:$16 sps:$4 sm:$0xff]  }
  0x1e   : > { %1729 = vmatprep.subr.bf16.mxu1 %v1808_v13  ;;  %v1832_v35 = vld [vmem:[%s1967_s24 + $0xc] ss:$16 sps:$4 sm:$0xff]   ;;  %684 = vmatprep.mubr.bf16.mxu0 %v1829_v33  ;;  %v1833_v36 = vld [vmem:[%s1967_s24 + $0x24] ss:$16 sps:$4 sm:$0xff]   ;;  %v1837_v38 = vld [vmem:[%s1967_s24 + $0x20] ss:$16 sps:$4 sm:$0xff]  }
  0x1f   : > { %781 = vmatprep.mubr.bf16.mxu1 %v1832_v35  ;;  %v1835_v37 = vld [vmem:[%s1967_s24 + $0x2c] ss:$16 sps:$4 sm:$0xff]   ;;  %v1838_v39 = vld [vmem:[%s1967_s24 + $0x28] ss:$16 sps:$4 sm:$0xff]   ;;  %v1839_v40 = vld [vmem:[%s1967_s24 + $0x44] ss:$16 sps:$4 sm:$0xff]  }
  0x20   : > { %1666 = vmatpush3.bf16.msra.mxu0 %v1809_v14  ;;  %v1841_v41 = vld [vmem:[%s1967_s24 + $0x4c] ss:$16 sps:$4 sm:$0xff]   ;;  %v1843_v42 = vld [vmem:[%s1967_s24 + $0x40] ss:$16 sps:$4 sm:$0xff]   ;;  %v1844_v43 = vld [vmem:[%s1967_s24 + $0x48] ss:$16 sps:$4 sm:$0xff]  }
  0x21   : > { %1730 = vmatpush3.bf16.msra.mxu1 %v1810_v15  ;;  %1667 = vmatprep.subr.bf16.mxu0 %v1811_v16  ;;  %v1845_v44 = vld [vmem:[%s1967_s24 + $0x64] ss:$16 sps:$4 sm:$0xff]   ;;  %v1847_v45 = vld [vmem:[%s1967_s24 + $0x6c] ss:$16 sps:$4 sm:$0xff]   ;;  %v1849_v46 = vld [vmem:[%s1967_s24 + $0x60] ss:$16 sps:$4 sm:$0xff]  }
  0x22   : > { %1731 = vmatprep.subr.bf16.mxu1 %v1812_v17  ;;  %v1850_v47 = vld [vmem:[%s1967_s24 + $0x68] ss:$16 sps:$4 sm:$0xff]   ;;  %v1851_v48 = vld [vmem:[%s1967_s24 + $0x84] ss:$16 sps:$4 sm:$0xff]   ;;  %v1853_v49 = vld [vmem:[%s1967_s24 + $0x8c] ss:$16 sps:$4 sm:$0xff]  }
  0x23   : > { %v1855_v50 = vld [vmem:[%s1967_s24 + $0x80] ss:$16 sps:$4 sm:$0xff]   ;;  %v1856_v51 = vld [vmem:[%s1967_s24 + $0x88] ss:$16 sps:$4 sm:$0xff]   ;;  %v1857_v52 = vld [vmem:[%s1967_s24 + $0xa4] ss:$16 sps:$4 sm:$0xff]  }
  0x24   : > { %1668 = vmatpush3.bf16.msra.mxu0 %v1813_v18  ;;  %v1859_v53 = vld [vmem:[%s1967_s24 + $0xac] ss:$16 sps:$4 sm:$0xff]   ;;  %v1861_v54 = vld [vmem:[%s1967_s24 + $0xa0] ss:$16 sps:$4 sm:$0xff]   ;;  %v1862_v55 = vld [vmem:[%s1967_s24 + $0xa8] ss:$16 sps:$4 sm:$0xff]  }
  0x25   : > { %1732 = vmatpush3.bf16.msra.mxu1 %v1814_v19  ;;  %1669 = vmatprep.subr.bf16.mxu0 %v1815_v20  ;;  %v1863_v56 = vld [vmem:[%s1967_s24 + $0xc4] ss:$16 sps:$4 sm:$0xff]   ;;  %v1865_v57 = vld [vmem:[%s1967_s24 + $0xcc] ss:$16 sps:$4 sm:$0xff]   ;;  %v1867_v58 = vld [vmem:[%s1967_s24 + $0xc0] ss:$16 sps:$4 sm:$0xff]  }
  0x26   : > { %1733 = vmatprep.subr.bf16.mxu1 %v1816_v21  ;;  %v1868_v59 = vld [vmem:[%s1967_s24 + $0xc8] ss:$16 sps:$4 sm:$0xff]   ;;  %v1869_v60 = vld [vmem:[%s1967_s24 + $0xe4] ss:$16 sps:$4 sm:$0xff]   ;;  %v1871_v61 = vld [vmem:[%s1967_s24 + $0xec] ss:$16 sps:$4 sm:$0xff]  }
  0x27   : > { %v1873_v62 = vld [vmem:[%s1967_s24 + $0xe0] ss:$16 sps:$4 sm:$0xff]   ;;  %v1874_v63 = vld [vmem:[%s1967_s24 + $0xe8] ss:$16 sps:$4 sm:$0xff]  }
  0x28   : > { %1670 = vmatpush3.bf16.msra.mxu0 %v1817_v22 }
  0x29   : > { %1734 = vmatpush3.bf16.msra.mxu1 %v1818_v23  ;;  %1671 = vmatprep.subr.bf16.mxu0 %v1819_v24 }
  0x2a   : > { %1735 = vmatprep.subr.bf16.mxu1 %v1820_v25 }
  0x2c   : > { %1672 = vmatpush3.bf16.msra.mxu0 %v1821_v26 }
  0x2d   : > { %1736 = vmatpush3.bf16.msra.mxu1 %v1822_v27  ;;  %1673 = vmatprep.subr.bf16.mxu0 %v1823_v28 }
  0x2e   : > { %1737 = vmatprep.subr.bf16.mxu1 %v1824_v29 }
  0x30   : > { %1674 = vmatpush3.bf16.msra.mxu0 %v1825_v30 }
  0x31   : > { %1738 = vmatpush3.bf16.msra.mxu1 %v1826_v31 }
  0x33   : > { %685 = vmatmul.mubr.bf16.vlgmr.msra.gmra.mrb[0].mxu0 %v1827_v32 }
  0x34   : > { %782 = vmatmul.mubr.bf16.vlgmr.msra.gmra.mrb[0].mxu1 %v1830_v34  ;;  %692 = vmatprep.mubr.bf16.mxu0 %v1833_v36 }
  0x35   : > { %789 = vmatprep.mubr.bf16.mxu1 %v1835_v37 }
  0x3b   : > { %693 = vmatmul.mubr.bf16.gmra.mrb[4].mxu0 %v1837_v38 }
  0x3c   : > { %790 = vmatmul.mubr.bf16.gmra.mrb[4].mxu1 %v1838_v39  ;;  %700 = vmatprep.mubr.bf16.mxu0 %v1839_v40 }
  0x3d   : > { %797 = vmatprep.mubr.bf16.mxu1 %v1841_v41 }
  0x43   : > { %701 = vmatmul.mubr.bf16.gmra.mrb[8].mxu0 %v1843_v42 }
  0x44   : > { %798 = vmatmul.mubr.bf16.gmra.mrb[8].mxu1 %v1844_v43  ;;  %708 = vmatprep.mubr.bf16.mxu0 %v1845_v44 }
  0x45   : > { %805 = vmatprep.mubr.bf16.mxu1 %v1847_v45 }
  0x4b   : > { %709 = vmatmul.mubr.bf16.gmra.mrb[12].mxu0 %v1849_v46 }
  0x4c   : > { %806 = vmatmul.mubr.bf16.gmra.mrb[12].mxu1 %v1850_v47  ;;  %716 = vmatprep.mubr.bf16.mxu0 %v1851_v48 }
  0x4d   : > { %813 = vmatprep.mubr.bf16.mxu1 %v1853_v49 }
  0x53   : > { %717 = vmatmul.mubr.bf16.gmra.mrb[16].mxu0 %v1855_v50 }
  0x54   : > { %814 = vmatmul.mubr.bf16.gmra.mrb[16].mxu1 %v1856_v51  ;;  %724 = vmatprep.mubr.bf16.mxu0 %v1857_v52 }
  0x55   : > { %821 = vmatprep.mubr.bf16.mxu1 %v1859_v53 }
  0x5b   : > { %725 = vmatmul.mubr.bf16.gmra.mrb[20].mxu0 %v1861_v54 }
  0x5c   : > { %822 = vmatmul.mubr.bf16.gmra.mrb[20].mxu1 %v1862_v55  ;;  %732 = vmatprep.mubr.bf16.mxu0 %v1863_v56 }
  0x5d   : > { %829 = vmatprep.mubr.bf16.mxu1 %v1865_v57 }
  0x63   : > { %733 = vmatmul.mubr.bf16.gmra.mrb[24].mxu0 %v1867_v58 }
  0x64   : > { %830 = vmatmul.mubr.bf16.gmra.mrb[24].mxu1 %v1868_v59  ;;  %740 = vmatprep.mubr.bf16.mxu0 %v1869_v60 }
  0x65   : > { %837 = vmatprep.mubr.bf16.mxu1 %v1871_v61 }
  0x6b   : > { %741 = vmatmul.mubr.bf16.gmra.mrb[28].mxu0 %v1873_v62 }
  0x6c   : > { %838 = vmatmul.mubr.bf16.gmra.mrb[28].mxu1 %v1874_v63 }
 0x106   : > { %v1675_v0 = vpop.f32.mrb[0].mxu0 }
 0x107   : > { %v1739_v1 = vpop.f32.mrb[0].mxu1  ;;  %v1676_v2 = vpop.f32.mrb[1].mxu0 }
 0x108   : > { %v1677_v3 = vadd.f32 %v1676_v2, %v1675_v0  ;;  %v1740_v4 = vpop.f32.mrb[1].mxu1  ;;  %v1678_v5 = vpop.f32.mrb[2].mxu0 }
 0x109   : > { %v1741_v6 = vadd.f32 %v1740_v4, %v1739_v1  ;;  %v1742_v7 = vpop.f32.mrb[2].mxu1  ;;  %v1679_v8 = vpop.f32.mrb[3].mxu0 }
 0x10a   : > { %v1680_v9 = vadd.f32 %v1679_v8, %v1678_v5  ;;  %v1743_v10 = vpop.f32.mrb[3].mxu1 }
 0x10b   : > { %v784_v11 = vadd.f32 %v1741_v6, %v1677_v3  ;;  %v1744_v12 = vadd.f32 %v1743_v10, %v1742_v7 }
 0x10d   : > { %848 = vst [vmem:[%s2007_s28] sm:$0xff] %v784_v11  ;;  %v787_v13 = vadd.f32 %v1744_v12, %v1680_v9 }
 0x10e   : > { %v1681_v14 = vpop.f32.mrb[4].mxu0 }
 0x10f   : > { %849 = vst [vmem:[%s2007_s28 + $0x8] sm:$0xff] %v787_v13  ;;  %v1745_v15 = vpop.f32.mrb[4].mxu1  ;;  %v1682_v16 = vpop.f32.mrb[5].mxu0 }
 0x110   : > { %v1683_v17 = vadd.f32 %v1682_v16, %v1681_v14  ;;  %v1746_v18 = vpop.f32.mrb[5].mxu1  ;;  %v1684_v19 = vpop.f32.mrb[6].mxu0 }
 0x111   : > { %v1747_v20 = vadd.f32 %v1746_v18, %v1745_v15  ;;  %v1748_v21 = vpop.f32.mrb[6].mxu1  ;;  %v1685_v22 = vpop.f32.mrb[7].mxu0 }
 0x112   : > { %v1686_v23 = vadd.f32 %v1685_v22, %v1684_v19  ;;  %v1749_v24 = vpop.f32.mrb[7].mxu1 }
 0x113   : > { %v792_v25 = vadd.f32 %v1747_v20, %v1683_v17  ;;  %v1750_v26 = vadd.f32 %v1749_v24, %v1748_v21 }
 0x115   : > { %850 = vst [vmem:[%s2007_s28 + $0x10] sm:$0xff] %v792_v25  ;;  %v795_v27 = vadd.f32 %v1750_v26, %v1686_v23 }
 0x116   : > { %v1687_v28 = vpop.f32.mrb[8].mxu0 }
 0x117   : > { %851 = vst [vmem:[%s2007_s28 + $0x18] sm:$0xff] %v795_v27  ;;  %v1751_v29 = vpop.f32.mrb[8].mxu1  ;;  %v1688_v30 = vpop.f32.mrb[9].mxu0 }
 0x118   : > { %v1689_v31 = vadd.f32 %v1688_v30, %v1687_v28  ;;  %v1752_v32 = vpop.f32.mrb[9].mxu1  ;;  %v1690_v33 = vpop.f32.mrb[10].mxu0 }
 0x119   : > { %v1753_v34 = vadd.f32 %v1752_v32, %v1751_v29  ;;  %v1754_v35 = vpop.f32.mrb[10].mxu1  ;;  %v1691_v36 = vpop.f32.mrb[11].mxu0 }
 0x11a   : > { %v1692_v37 = vadd.f32 %v1691_v36, %v1690_v33  ;;  %v1755_v38 = vpop.f32.mrb[11].mxu1 }
 0x11b   : > { %v800_v39 = vadd.f32 %v1753_v34, %v1689_v31  ;;  %v1756_v40 = vadd.f32 %v1755_v38, %v1754_v35 }
 0x11d   : > { %852 = vst [vmem:[%s2007_s28 + $0x20] sm:$0xff] %v800_v39  ;;  %v803_v41 = vadd.f32 %v1756_v40, %v1692_v37 }
 0x11e   : > { %v1693_v42 = vpop.f32.mrb[12].mxu0 }
 0x11f   : > { %853 = vst [vmem:[%s2007_s28 + $0x28] sm:$0xff] %v803_v41  ;;  %v1757_v43 = vpop.f32.mrb[12].mxu1  ;;  %v1694_v44 = vpop.f32.mrb[13].mxu0 }
 0x120   : > { %v1695_v45 = vadd.f32 %v1694_v44, %v1693_v42  ;;  %v1758_v46 = vpop.f32.mrb[13].mxu1  ;;  %v1696_v47 = vpop.f32.mrb[14].mxu0 }
 0x121   : > { %v1759_v48 = vadd.f32 %v1758_v46, %v1757_v43  ;;  %v1760_v49 = vpop.f32.mrb[14].mxu1  ;;  %v1697_v50 = vpop.f32.mrb[15].mxu0 }
 0x122   : > { %v1698_v51 = vadd.f32 %v1697_v50, %v1696_v47  ;;  %v1761_v52 = vpop.f32.mrb[15].mxu1 }
 0x123   : > { %v808_v53 = vadd.f32 %v1759_v48, %v1695_v45  ;;  %v1762_v54 = vadd.f32 %v1761_v52, %v1760_v49 }
 0x125   : > { %854 = vst [vmem:[%s2007_s28 + $0x30] sm:$0xff] %v808_v53  ;;  %v811_v55 = vadd.f32 %v1762_v54, %v1698_v51 }
 0x126   : > { %v1699_v56 = vpop.f32.mrb[16].mxu0 }
 0x127   : > { %855 = vst [vmem:[%s2007_s28 + $0x38] sm:$0xff] %v811_v55  ;;  %v1763_v57 = vpop.f32.mrb[16].mxu1  ;;  %v1700_v58 = vpop.f32.mrb[17].mxu0 }
 0x128   : > { %v1701_v59 = vadd.f32 %v1700_v58, %v1699_v56  ;;  %v1764_v60 = vpop.f32.mrb[17].mxu1  ;;  %v1702_v61 = vpop.f32.mrb[18].mxu0 }
 0x129   : > { %v1765_v62 = vadd.f32 %v1764_v60, %v1763_v57  ;;  %v1766_v63 = vpop.f32.mrb[18].mxu1  ;;  %v1703_v0 = vpop.f32.mrb[19].mxu0 }
 0x12a   : > { %v1704_v1 = vadd.f32 %v1703_v0, %v1702_v61  ;;  %v1767_v2 = vpop.f32.mrb[19].mxu1 }
 0x12b   : > { %v816_v3 = vadd.f32 %v1765_v62, %v1701_v59  ;;  %v1768_v4 = vadd.f32 %v1767_v2, %v1766_v63 }
 0x12d   : > { %856 = vst [vmem:[%s2007_s28 + $0x40] sm:$0xff] %v816_v3  ;;  %v819_v5 = vadd.f32 %v1768_v4, %v1704_v1 }
 0x12e   : > { %v1705_v6 = vpop.f32.mrb[20].mxu0 }
 0x12f   : > { %857 = vst [vmem:[%s2007_s28 + $0x48] sm:$0xff] %v819_v5  ;;  %v1769_v7 = vpop.f32.mrb[20].mxu1  ;;  %v1706_v8 = vpop.f32.mrb[21].mxu0 }
 0x130   : > { %v1707_v9 = vadd.f32 %v1706_v8, %v1705_v6  ;;  %v1770_v10 = vpop.f32.mrb[21].mxu1  ;;  %v1708_v11 = vpop.f32.mrb[22].mxu0 }
 0x131   : > { %v1771_v12 = vadd.f32 %v1770_v10, %v1769_v7  ;;  %v1772_v13 = vpop.f32.mrb[22].mxu1  ;;  %v1709_v14 = vpop.f32.mrb[23].mxu0 }
 0x132   : > { %v1710_v15 = vadd.f32 %v1709_v14, %v1708_v11  ;;  %v1773_v16 = vpop.f32.mrb[23].mxu1 }
 0x133   : > { %v824_v17 = vadd.f32 %v1771_v12, %v1707_v9  ;;  %v1774_v18 = vadd.f32 %v1773_v16, %v1772_v13 }
 0x135   : > { %858 = vst [vmem:[%s2007_s28 + $0x50] sm:$0xff] %v824_v17  ;;  %v827_v19 = vadd.f32 %v1774_v18, %v1710_v15 }
 0x136   : > { %v1711_v20 = vpop.f32.mrb[24].mxu0 }
 0x137   : > { %859 = vst [vmem:[%s2007_s28 + $0x58] sm:$0xff] %v827_v19  ;;  %v1775_v21 = vpop.f32.mrb[24].mxu1  ;;  %v1712_v22 = vpop.f32.mrb[25].mxu0 }
 0x138   : > { %v1713_v23 = vadd.f32 %v1712_v22, %v1711_v20  ;;  %v1776_v24 = vpop.f32.mrb[25].mxu1  ;;  %v1714_v25 = vpop.f32.mrb[26].mxu0 }
 0x139   : > { %v1777_v26 = vadd.f32 %v1776_v24, %v1775_v21  ;;  %v1778_v27 = vpop.f32.mrb[26].mxu1  ;;  %v1715_v28 = vpop.f32.mrb[27].mxu0 }
 0x13a   : > { %v1716_v29 = vadd.f32 %v1715_v28, %v1714_v25  ;;  %v1779_v30 = vpop.f32.mrb[27].mxu1 }
 0x13b   : > { %v832_v31 = vadd.f32 %v1777_v26, %v1713_v23  ;;  %v1780_v32 = vadd.f32 %v1779_v30, %v1778_v27 }
 0x13d   : > { %860 = vst [vmem:[%s2007_s28 + $0x60] sm:$0xff] %v832_v31  ;;  %v835_v33 = vadd.f32 %v1780_v32, %v1716_v29 }
 0x13e   : > { %v1717_v34 = vpop.f32.mrb[28].mxu0 }
 0x13f   : > { %861 = vst [vmem:[%s2007_s28 + $0x68] sm:$0xff] %v835_v33  ;;  %v1781_v35 = vpop.f32.mrb[28].mxu1  ;;  %v1718_v36 = vpop.f32.mrb[29].mxu0 }
 0x140   : > { %v1719_v37 = vadd.f32 %v1718_v36, %v1717_v34  ;;  %v1782_v38 = vpop.f32.mrb[29].mxu1  ;;  %v1720_v39 = vpop.f32.mrb[30].mxu0 }
 0x141   : > { %v1783_v40 = vadd.f32 %v1782_v38, %v1781_v35  ;;  %v1784_v41 = vpop.f32.mrb[30].mxu1  ;;  %v1721_v42 = vpop.f32.mrb[31].mxu0  ;;  %867 = sbr.rel (%p1652_p4) target bundleno = 552 (0x228), region = 40 }
 0x142   : > { %v1722_v43 = vadd.f32 %v1721_v42, %v1720_v39  ;;  %v1785_v44 = vpop.f32.mrb[31].mxu1 }
 0x143   : > { %v840_v45 = vadd.f32 %v1783_v40, %v1719_v37  ;;  %v1786_v46 = vadd.f32 %v1785_v44, %v1784_v41 }
 0x145   : > { %862 = vst [vmem:[%s2007_s28 + $0x70] sm:$0xff] %v840_v45  ;;  %v843_v47 = vadd.f32 %v1786_v46, %v1722_v43 }
 0x147   : > { %863 = vst [vmem:[%s2007_s28 + $0x78] sm:$0xff] %v843_v47 }
 0x14e   : > { %v2029_v48 = vld [vmem:[%s3259_s4] sm:$0xff]  ;;  %v2034_v49 = vld [vmem:[%s3259_s4 + $0x8] sm:$0xff]  ;;  %v2039_v50 = vld [vmem:[%s3259_s4 + $0x10] sm:$0xff] }
 0x14f   : > { %v2044_v51 = vld [vmem:[%s3259_s4 + $0x80] sm:$0xff]  ;;  %v2049_v52 = vld [vmem:[%s3259_s4 + $0x88] sm:$0xff]  ;;  %v2054_v53 = vld [vmem:[%s3259_s4 + $0x90] sm:$0xff] }
 0x150   : > { %v2059_v54 = vld [vmem:[%s3259_s4 + $0x18] sm:$0xff]  ;;  %v932_v56 = vadd.f32 %v2044_v51, %v2029_v48  ;;  %v935_v57 = vadd.f32 %v2049_v52, %v2034_v49  ;;  %v938_v58 = vadd.f32 %v2054_v53, %v2039_v50  ;;  %v2075_v59 = vld [vmem:[%s3259_s4 + $0x20] sm:$0xff]  ;;  %v2090_v62 = vld [vmem:[%s3259_s4 + $0x108] sm:$0xff] }
 0x151   : > { %v2064_v55 = vld [vmem:[%s3259_s4 + $0x98] sm:$0xff]  ;;  %v2080_v60 = vld [vmem:[%s3259_s4 + $0xa0] sm:$0xff]  ;;  %v2095_v63 = vld [vmem:[%s3259_s4 + $0x110] sm:$0xff] }
 0x152   : > { %v2085_v61 = vld [vmem:[%s3259_s4 + $0x100] sm:$0xff]  ;;  %v941_v0 = vadd.f32 %v2064_v55, %v2059_v54  ;;  %v2102_v1 = vld [vmem:[%s3259_s4 + $0x28] sm:$0xff]  ;;  %v2112_v3 = vld [vmem:[%s3259_s4 + $0x118] sm:$0xff]  ;;  %v936_v7 = vadd.f32 %v935_v57, %v2090_v62  ;;  %v939_v8 = vadd.f32 %v938_v58, %v2095_v63  ;;  %v944_v9 = vadd.f32 %v2080_v60, %v2075_v59 }
 0x153   : > { %v2107_v2 = vld [vmem:[%s3259_s4 + $0xa8] sm:$0xff]  ;;  %v2117_v4 = vld [vmem:[%s3259_s4 + $0x30] sm:$0xff]  ;;  %v933_v6 = vadd.f32 %v932_v56, %v2085_v61  ;;  %v2132_v10 = vld [vmem:[%s3259_s4 + $0x120] sm:$0xff] }
 0x154   : > { %v2122_v5 = vld [vmem:[%s3259_s4 + $0xb0] sm:$0xff]  ;;  %v2137_v11 = vld [vmem:[%s3259_s4 + $0x38] sm:$0xff]  ;;  %v2147_v13 = vld [vmem:[%s3259_s4 + $0x128] sm:$0xff]  ;;  %v942_v14 = vadd.f32 %v941_v0, %v2112_v3  ;;  %v947_v15 = vadd.f32 %v2107_v2, %v2102_v1  ;;  %v945_v25 = vadd.f32 %v944_v9, %v2132_v10 }
 0x155   : > { %v2142_v12 = vld [vmem:[%s3259_s4 + $0xb8] sm:$0xff]  ;;  %v2155_v16 = vld [vmem:[%s3259_s4 + $0x180] sm:$0xff]  ;;  %v2160_v17 = vld [vmem:[%s3259_s4 + $0x188] sm:$0xff]  ;;  %v950_v19 = vadd.f32 %v2122_v5, %v2117_v4 }
 0x156   : > { %3316 = vst [vmem:[#allocation2_spill] sm:$0xff] %v2155_v16  ;;  %3317 = vst [vmem:[#allocation3_spill] sm:$0xff] %v2160_v17  ;;  %v2165_v18 = vld [vmem:[%s3259_s4 + $0x190] sm:$0xff]  ;;  %v2172_v20 = vld [vmem:[%s3259_s4 + $0x40] sm:$0xff]  ;;  %v934_v22 = vadd.f32 %v933_v6, %v2155_v16  ;;  %v937_v23 = vadd.f32 %v936_v7, %v2160_v17  ;;  %v948_v31 = vadd.f32 %v947_v15, %v2147_v13 }
 0x157   : > { %3318 = vst [vmem:[#allocation4_spill] sm:$0xff] %v2165_v18  ;;  %v2177_v21 = vld [vmem:[%s3259_s4 + $0x198] sm:$0xff]  ;;  %v940_v24 = vadd.f32 %v939_v8, %v2165_v18  ;;  %v2186_v26 = vld [vmem:[%s3259_s4 + $0xc0] sm:$0xff]  ;;  %v2191_v27 = vld [vmem:[%s3259_s4 + $0x130] sm:$0xff]  ;;  %v953_v32 = vadd.f32 %v2142_v12, %v2137_v11 }
 0x158   : > { %3319 = vst [vmem:[#allocation5_spill] sm:$0xff] %v2177_v21  ;;  %v2196_v28 = vld [vmem:[%s3259_s4 + $0x1a0] sm:$0xff]  ;;  %v2201_v29 = vld [vmem:[%s3259_s4 + $0x48] sm:$0xff]  ;;  %v943_v30 = vadd.f32 %v942_v14, %v2177_v21  ;;  %v980_v33 = vadd.f32 %v937_v23, %v934_v22  ;;  %v2215_v35 = vld [vmem:[%s3259_s4 + $0x138] sm:$0xff]  ;;  %v951_v39 = vadd.f32 %v950_v19, %v2191_v27  ;;  %v956_v40 = vadd.f32 %v2186_v26, %v2172_v20 }
 0x159   : > { %3320 = vst [vmem:[#allocation6_spill] sm:$0xff] %v2196_v28  ;;  %v2210_v34 = vld [vmem:[%s3259_s4 + $0xc8] sm:$0xff]  ;;  %v2225_v37 = vld [vmem:[%s3259_s4 + $0x50] sm:$0xff]  ;;  %v946_v38 = vadd.f32 %v945_v25, %v2196_v28  ;;  %v2239_v43 = vld [vmem:[%s3259_s4 + $0x140] sm:$0xff]  ;;  %v954_v47 = vadd.f32 %v953_v32, %v2215_v35 }
 0x15a   : > { %v2220_v36 = vld [vmem:[%s3259_s4 + $0x1a8] sm:$0xff]  ;;  %v981_v41 = vadd.f32 %v980_v33, %v940_v24  ;;  %v2234_v42 = vld [vmem:[%s3259_s4 + $0xd0] sm:$0xff]  ;;  %v2249_v45 = vld [vmem:[%s3259_s4 + $0x58] sm:$0xff]  ;;  %v959_v56 = vadd.f32 %v2210_v34, %v2201_v29  ;;  %v957_v9 = vadd.f32 %v956_v40, %v2239_v43 }
 0x15b   : > { %3321 = vst [vmem:[#allocation7_spill] sm:$0xff] %v2220_v36  ;;  %v2244_v44 = vld [vmem:[%s3259_s4 + $0x1b0] sm:$0xff]  ;;  %v949_v46 = vadd.f32 %v948_v31, %v2220_v36  ;;  %v2258_v58 = vld [vmem:[%s3259_s4 + $0xd8] sm:$0xff]  ;;  %v2263_v0 = vld [vmem:[%s3259_s4 + $0x148] sm:$0xff]  ;;  %v962_v14 = vadd.f32 %v2234_v42, %v2225_v37 }
 0x15c   : > { %3322 = vst [vmem:[#allocation8_spill] sm:$0xff] %v2244_v44  ;;  %v982_v57 = vadd.f32 %v981_v41, %v943_v30  ;;  %v2268_v6 = vld [vmem:[%s3259_s4 + $0x1b8] sm:$0xff]  ;;  %v2273_v7 = vld [vmem:[%s3259_s4 + $0x60] sm:$0xff]  ;;  %v952_v8 = vadd.f32 %v951_v39, %v2244_v44  ;;  %v2287_v22 = vld [vmem:[%s3259_s4 + $0x150] sm:$0xff]  ;;  %v960_v30 = vadd.f32 %v959_v56, %v2263_v0  ;;  %v965_v31 = vadd.f32 %v2258_v58, %v2249_v45 }
 0x15d   : > { %3323 = vst [vmem:[#allocation9_spill] sm:$0xff] %v2268_v6  ;;  %v2282_v19 = vld [vmem:[%s3259_s4 + $0xe0] sm:$0xff]  ;;  %3324 = vst [vmem:[#allocation10_spill] sm:$0xff] %v2287_v22  ;;  %v2297_v24 = vld [vmem:[%s3259_s4 + $0x68] sm:$0xff]  ;;  %v955_v25 = vadd.f32 %v954_v47, %v2268_v6 }
 0x15e   : > { %v983_v15 = vadd.f32 %v982_v57, %v946_v38  ;;  %v2292_v23 = vld [vmem:[%s3259_s4 + $0x1c0] sm:$0xff]  ;;  %v2306_v33 = vld [vmem:[%s3259_s4 + $0xe8] sm:$0xff]  ;;  %v2311_v38 = vld [vmem:[%s3259_s4 + $0x158] sm:$0xff]  ;;  %v968_v47 = vadd.f32 %v2282_v19, %v2273_v7 }
 0x15f   : > { %3325 = vst [vmem:[#allocation11_spill] sm:$0xff] %v2292_v23  ;;  %3326 = vst [vmem:[#allocation12_spill] sm:$0xff] %v2311_v38  ;;  %v2316_v39 = vld [vmem:[%s3259_s4 + $0x1c8] sm:$0xff]  ;;  %v2321_v40 = vld [vmem:[%s3259_s4 + $0x70] sm:$0xff]  ;;  %v958_v41 = vadd.f32 %v957_v9, %v2292_v23  ;;  %v971_v23 = vadd.f32 %v2306_v33, %v2297_v24 }
 0x160   : > { %v984_v32 = vadd.f32 %v983_v15, %v949_v46  ;;  %3327 = vst [vmem:[#allocation13_spill] sm:$0xff] %v2316_v39  ;;  %v963_v46 = vadd.f32 %v962_v14, %v2287_v22  ;;  %v2330_v57 = vld [vmem:[%s3259_s4 + $0xf0] sm:$0xff]  ;;  %v2335_v15 = vld [vmem:[%s3259_s4 + $0x160] sm:$0xff]  ;;  %v883_v14 = vld [vmem:[%s3259_s4 + $0x78] sm:$0xff] }
 0x161   : > { %3328 = vst [vmem:[#allocation14_spill] sm:$0xff] %v2335_v15  ;;  %v2340_v9 = vld [vmem:[%s3259_s4 + $0x1d0] sm:$0xff]  ;;  %v2352_v44 = vld [vmem:[%s3259_s4 + $0xf8] sm:$0xff]  ;;  %v2357_v36 = vld [vmem:[%s3259_s4 + $0x168] sm:$0xff] }
 0x162   : > { %v985_v56 = vadd.f32 %v984_v32, %v952_v8  ;;  %3329 = vst [vmem:[#allocation15_spill] sm:$0xff] %v2340_v9  ;;  %v961_v8 = vadd.f32 %v960_v30, %v2316_v39  ;;  %v966_v32 = vadd.f32 %v965_v31, %v2311_v38  ;;  %3330 = vst [vmem:[#allocation16_spill] sm:$0xff] %v2357_v36  ;;  %v2362_v30 = vld [vmem:[%s3259_s4 + $0x1d8] sm:$0xff]  ;;  %v2371_v28 = vld [vmem:[%s3259_s4 + $0x170] sm:$0xff] }
 0x163   : > { %3331 = vst [vmem:[#allocation17_spill] sm:$0xff] %v2362_v30  ;;  %v964_v31 = vadd.f32 %v963_v46, %v2340_v9  ;;  %v969_v39 = vadd.f32 %v968_v47, %v2335_v15  ;;  %3332 = vst [vmem:[#allocation18_spill] sm:$0xff] %v2371_v28  ;;  %v2376_v21 = vld [vmem:[%s3259_s4 + $0x1e0] sm:$0xff]  ;;  %v972_v46 = vadd.f32 %v971_v23, %v2357_v36  ;;  %v2396_v23 = vld [vmem:[%s3259_s4 + $0x1f0] sm:$0xff] }
 0x164   : > { %v986_v6 = vadd.f32 %v985_v56, %v955_v25  ;;  %v974_v25 = vadd.f32 %v2330_v57, %v2321_v40  ;;  %3333 = vst [vmem:[#allocation19_spill] sm:$0xff] %v2376_v21  ;;  %v967_v18 = vadd.f32 %v966_v32, %v2362_v30  ;;  %v977_v47 = vadd.f32 %v2352_v44, %v883_v14  ;;  %v2403_v36 = vld [vmem:[%s3259_s4 + $0x1f8] sm:$0xff] }
 0x165   : > { %v970_v17 = vadd.f32 %v969_v39, %v2376_v21  ;;  %3335 = vst [vmem:[#allocation21_spill] sm:$0xff] %v2396_v23  ;;  %3336 = vst [vmem:[#allocation22_spill] sm:$0xff] %v2403_v36 }
 0x166   : > { %v987_v56 = vadd.f32 %v986_v6, %v958_v41  ;;  %v2384_v6 = vld [vmem:[%s3259_s4 + $0x178] sm:$0xff]  ;;  %v2389_v41 = vld [vmem:[%s3259_s4 + $0x1e8] sm:$0xff]  ;;  %v975_v16 = vadd.f32 %v974_v25, %v2371_v28 }
 0x167   : > { %3334 = vst [vmem:[#allocation20_spill] sm:$0xff] %v2389_v41 }
 0x168   : > { %v988_v9 = vadd.f32 %v987_v56, %v961_v8  ;;  %v973_v8 = vadd.f32 %v972_v46, %v2389_v41  ;;  %v978_v56 = vadd.f32 %v977_v47, %v2384_v6  ;;  %v976_v39 = vadd.f32 %v975_v16, %v2396_v23 }
 0x16a   : > { %v989_v32 = vadd.f32 %v988_v9, %v964_v31  ;;  %v979_v9 = vadd.f32 %v978_v56, %v2403_v36 }
 0x16c   : > { %v990_v30 = vadd.f32 %v989_v32, %v967_v18 }
 0x16e   : > { %v991_v21 = vadd.f32 %v990_v30, %v970_v17  ;;  %v3361_v30 = vld [vmem:[#allocation16_spill] sm:$0xff] }
 0x170   : > { %v992_v31 = vadd.f32 %v991_v21, %v973_v8 }
 0x172   : > { %v993_v25 = vadd.f32 %v992_v31, %v976_v39 }
 0x174   : > { %v994_v28 = vadd.f32 %v993_v25, %v979_v9  ;;  %v3366_v25 = vld [vmem:[#allocation2_spill] sm:$0xff] }
 0x176   : > { %v995_v15 = vrot.slane %v994_v28, 4 }
 0x178   : > { %v996_v38 = vadd.f32 %v995_v15, %v994_v28  ;;  %v3359_v15 = vld [vmem:[#allocation12_spill] sm:$0xff] }
 0x17a   : > { %v997_v22 = vrot.slane %v996_v38, 2 }
 0x17c   : > { %v998_v46 = vadd.f32 %v997_v22, %v996_v38 }
 0x17e   : > { %v999_v41 = vrot.slane %v998_v46, 1 }
 0x180   : > { %v1000_v47 = vadd.f32 %v999_v41, %v998_v46  ;;  %v3363_v41 = vld [vmem:[#allocation18_spill] sm:$0xff] }
 0x182   : > { %v2407_v18 = vmul.f32 0.001953125, %v1000_v47  ;;  %v3368_v47 = vld [vmem:[#allocation3_spill] sm:$0xff] }
 0x184   : > { %v2411_v32 = vsub.f32 %v2029_v48, %v2407_v18  ;;  %v2415_v16 = vsub.f32 %v2034_v49, %v2407_v18  ;;  %v2419_v17 = vsub.f32 %v2039_v50, %v2407_v18  ;;  %v2423_v21 = vsub.f32 %v2059_v54, %v2407_v18 }
 0x185   : > { %v2427_v28 = vsub.f32 %v2075_v59, %v2407_v18  ;;  %v2431_v48 = vsub.f32 %v2102_v1, %v2407_v18  ;;  %v2435_v49 = vsub.f32 %v2117_v4, %v2407_v18  ;;  %v2439_v50 = vsub.f32 %v2137_v11, %v2407_v18 }
 0x186   : > { %3337 = vst [vmem:[#allocation23_spill] sm:$0xff] %v2411_v32  ;;  %3338 = vst [vmem:[#allocation24_spill] sm:$0xff] %v2415_v16  ;;  %v2443_v54 = vsub.f32 %v2172_v20, %v2407_v18  ;;  %v2447_v59 = vsub.f32 %v2201_v29, %v2407_v18  ;;  %v2451_v1 = vsub.f32 %v2225_v37, %v2407_v18 }
 0x187   : > { %3339 = vst [vmem:[#allocation25_spill] sm:$0xff] %v2419_v17  ;;  %3340 = vst [vmem:[#allocation26_spill] sm:$0xff] %v2423_v21  ;;  %v2455_v4 = vsub.f32 %v2249_v45, %v2407_v18  ;;  %v2459_v11 = vsub.f32 %v2273_v7, %v2407_v18  ;;  %v2463_v20 = vsub.f32 %v2297_v24, %v2407_v18 }
 0x188   : > { %3341 = vst [vmem:[#allocation27_spill] sm:$0xff] %v2427_v28  ;;  %3342 = vst [vmem:[#allocation28_spill] sm:$0xff] %v2431_v48  ;;  %v2467_v29 = vsub.f32 %v2321_v40, %v2407_v18  ;;  %v2470_v22 = vsub.f32 %v883_v14, %v2407_v18  ;;  %v2474_v37 = vsub.f32 %v2044_v51, %v2407_v18  ;;  %v3360_v14 = vld [vmem:[#allocation14_spill] sm:$0xff] }
 0x189   : > { %v2478_v45 = vsub.f32 %v2049_v52, %v2407_v18  ;;  %v2482_v7 = vsub.f32 %v2054_v53, %v2407_v18  ;;  %v2486_v24 = vsub.f32 %v2064_v55, %v2407_v18  ;;  %v2490_v38 = vsub.f32 %v2080_v60, %v2407_v18 }
 0x18a   : > { %3343 = vst [vmem:[#allocation29_spill] sm:$0xff] %v2474_v37  ;;  %v2494_v51 = vsub.f32 %v2107_v2, %v2407_v18  ;;  %v2498_v52 = vsub.f32 %v2122_v5, %v2407_v18  ;;  %v2502_v53 = vsub.f32 %v2142_v12, %v2407_v18  ;;  %v2506_v55 = vsub.f32 %v2186_v26, %v2407_v18 }
 0x18b   : > { %3344 = vst [vmem:[#allocation30_spill] sm:$0xff] %v2478_v45  ;;  %3345 = vst [vmem:[#allocation31_spill] sm:$0xff] %v2482_v7  ;;  %v2510_v60 = vsub.f32 %v2210_v34, %v2407_v18  ;;  %v2514_v2 = vsub.f32 %v2234_v42, %v2407_v18  ;;  %v2518_v5 = vsub.f32 %v2258_v58, %v2407_v18 }
 0x18c   : > { %3346 = vst [vmem:[#allocation32_spill] sm:$0xff] %v2486_v24  ;;  %3347 = vst [vmem:[#allocation33_spill] sm:$0xff] %v2490_v38  ;;  %v2522_v12 = vsub.f32 %v2282_v19, %v2407_v18  ;;  %v2526_v26 = vsub.f32 %v2306_v33, %v2407_v18  ;;  %v2530_v34 = vsub.f32 %v2330_v57, %v2407_v18  ;;  %v3358_v57 = vld [vmem:[#allocation10_spill] sm:$0xff] }
 0x18d   : > { %3348 = vst [vmem:[#allocation34_spill] sm:$0xff] %v2494_v51  ;;  %3349 = vst [vmem:[#allocation35_spill] sm:$0xff] %v2498_v52  ;;  %v2534_v42 = vsub.f32 %v2352_v44, %v2407_v18  ;;  %v2538_v58 = vsub.f32 %v2085_v61, %v2407_v18  ;;  %v2542_v19 = vsub.f32 %v2090_v62, %v2407_v18 }
 0x18e   : > { %v2546_v33 = vsub.f32 %v2095_v63, %v2407_v18  ;;  %v2550_v40 = vsub.f32 %v2112_v3, %v2407_v18  ;;  %v2554_v44 = vsub.f32 %v2132_v10, %v2407_v18  ;;  %v2558_v61 = vsub.f32 %v2147_v13, %v2407_v18 }
 0x18f   : > { %3350 = vst [vmem:[#allocation36_spill] sm:$0xff] %v2534_v42  ;;  %3351 = vst [vmem:[#allocation37_spill] sm:$0xff] %v2538_v58  ;;  %v2562_v62 = vsub.f32 %v2191_v27, %v2407_v18  ;;  %v2566_v63 = vsub.f32 %v2215_v35, %v2407_v18  ;;  %v2570_v3 = vsub.f32 %v2239_v43, %v2407_v18 }
 0x190   : > { %3352 = vst [vmem:[#allocation38_spill] sm:$0xff] %v2542_v19  ;;  %3353 = vst [vmem:[#allocation39_spill] sm:$0xff] %v2546_v33  ;;  %v2574_v10 = vsub.f32 %v2263_v0, %v2407_v18  ;;  %v2578_v13 = vsub.f32 %v3358_v57, %v2407_v18  ;;  %v2582_v27 = vsub.f32 %v3359_v15, %v2407_v18  ;;  %v3370_v15 = vld [vmem:[#allocation4_spill] sm:$0xff] }
 0x191   : > { %3354 = vst [vmem:[#allocation40_spill] sm:$0xff] %v2550_v40  ;;  %3355 = vst [vmem:[#allocation41_spill] sm:$0xff] %v2554_v44  ;;  %v2586_v35 = vsub.f32 %v3360_v14, %v2407_v18  ;;  %v2590_v43 = vsub.f32 %v3361_v30, %v2407_v18  ;;  %v2594_v0 = vsub.f32 %v3363_v41, %v2407_v18  ;;  %v3372_v30 = vld [vmem:[#allocation5_spill] sm:$0xff] }
 0x192   : > { %3356 = vst [vmem:[#allocation42_spill] sm:$0xff] %v2558_v61  ;;  %3357 = vst [vmem:[#allocation43_spill] sm:$0xff] %v2562_v62  ;;  %v1067_v8 = vmul.f32 %v2411_v32, %v2411_v32  ;;  %v1068_v56 = vmul.f32 %v2415_v16, %v2415_v16  ;;  %v1083_v39 = vmul.f32 %v2474_v37, %v2474_v37 }
 0x193   : > { %3362 = vst [vmem:[#allocation10_spill] sm:$0xff] %v2590_v43  ;;  %3364 = vst [vmem:[#allocation12_spill] sm:$0xff] %v2594_v0  ;;  %v1084_v9 = vmul.f32 %v2478_v45, %v2478_v45  ;;  %v2606_v31 = vsub.f32 %v2384_v6, %v2407_v18  ;;  %v2610_v46 = vsub.f32 %v3366_v25, %v2407_v18  ;;  %v3374_v45 = vld [vmem:[#allocation6_spill] sm:$0xff] }
 0x194   : > { %v2614_v57 = vsub.f32 %v3368_v47, %v2407_v18  ;;  %v2618_v14 = vsub.f32 %v3370_v15, %v2407_v18  ;;  %v2622_v41 = vsub.f32 %v3372_v30, %v2407_v18  ;;  %v2626_v6 = vsub.f32 %v3374_v45, %v2407_v18  ;;  %v3376_v47 = vld [vmem:[#allocation7_spill] sm:$0xff]  ;;  %v3378_v15 = vld [vmem:[#allocation8_spill] sm:$0xff] }
 0x195   : > { %3365 = vst [vmem:[#allocation14_spill] sm:$0xff] %v2606_v31  ;;  %3367 = vst [vmem:[#allocation16_spill] sm:$0xff] %v2610_v46  ;;  %v1069_v25 = vmul.f32 %v2419_v17, %v2419_v17  ;;  %v1085_v37 = vmul.f32 %v2482_v7, %v2482_v7  ;;  %v2634_v16 = vsub.f32 %v3376_v47, %v2407_v18  ;;  %v3379_v47 = vld [vmem:[#allocation9_spill] sm:$0xff] }
 0x196   : > { %3369 = vst [vmem:[#allocation18_spill] sm:$0xff] %v2614_v57  ;;  %3371 = vst [vmem:[#allocation2_spill] sm:$0xff] %v2618_v14  ;;  %v2638_v32 = vsub.f32 %v3378_v15, %v2407_v18  ;;  %v1070_v30 = vmul.f32 %v2423_v21, %v2423_v21  ;;  %v1086_v45 = vmul.f32 %v2486_v24, %v2486_v24  ;;  %v3380_v15 = vld [vmem:[#allocation11_spill] sm:$0xff]  ;;  %v3382_v21 = vld [vmem:[#allocation13_spill] sm:$0xff] }
 0x197   : > { %3373 = vst [vmem:[#allocation3_spill] sm:$0xff] %v2622_v41  ;;  %3375 = vst [vmem:[#allocation4_spill] sm:$0xff] %v2626_v6  ;;  %v1099_v17 = vmul.f32 %v2538_v58, %v2538_v58  ;;  %v1100_v7 = vmul.f32 %v2542_v19, %v2542_v19  ;;  %v1131_v31 = vadd.f32 %v1083_v39, %v1067_v8  ;;  %v3384_v24 = vld [vmem:[#allocation15_spill] sm:$0xff] }
 0x198   : > { %3377 = vst [vmem:[#allocation5_spill] sm:$0xff] %v2634_v16  ;;  %v1134_v36 = vadd.f32 %v1084_v9, %v1068_v56  ;;  %v2650_v0 = vsub.f32 %v3379_v47, %v2407_v18  ;;  %v2654_v23 = vsub.f32 %v3380_v15, %v2407_v18  ;;  %v2658_v43 = vsub.f32 %v3382_v21, %v2407_v18 }
 0x199   : > { %v2662_v58 = vsub.f32 %v3384_v24, %v2407_v18  ;;  %v1071_v8 = vmul.f32 %v2427_v28, %v2427_v28  ;;  %v1087_v56 = vmul.f32 %v2490_v38, %v2490_v38  ;;  %v1101_v39 = vmul.f32 %v2546_v33, %v2546_v33  ;;  %v3388_v33 = vld [vmem:[#allocation19_spill] sm:$0xff] }
 0x19a   : > { %3381 = vst [vmem:[#allocation6_spill] sm:$0xff] %v2654_v23  ;;  %3383 = vst [vmem:[#allocation7_spill] sm:$0xff] %v2658_v43  ;;  %v1137_v9 = vadd.f32 %v1085_v37, %v1069_v25  ;;  %v1072_v47 = vmul.f32 %v2431_v48, %v2431_v48  ;;  %v1088_v21 = vmul.f32 %v2494_v51, %v2494_v51  ;;  %v3386_v37 = vld [vmem:[#allocation17_spill] sm:$0xff] }
 0x19b   : > { %3385 = vst [vmem:[#allocation8_spill] sm:$0xff] %v2662_v58  ;;  %v1102_v24 = vmul.f32 %v2550_v40, %v2550_v40  ;;  %v1115_v15 = vmul.f32 %v2610_v46, %v2610_v46  ;;  %v1116_v19 = vmul.f32 %v2614_v57, %v2614_v57  ;;  %v1132_v38 = vadd.f32 %v1131_v31, %v1099_v17 }
 0x19c   : > { %v1135_v28 = vadd.f32 %v1134_v36, %v1100_v7  ;;  %v1140_v42 = vadd.f32 %v1086_v45, %v1070_v30  ;;  %v2682_v25 = vsub.f32 %v3386_v37, %v2407_v18  ;;  %v2686_v48 = vsub.f32 %v3388_v33, %v2407_v18 }
 0x19d   : > { %v1073_v40 = vmul.f32 %v2435_v49, %v2435_v49  ;;  %v1089_v46 = vmul.f32 %v2498_v52, %v2498_v52  ;;  %v1103_v57 = vmul.f32 %v2554_v44, %v2554_v44  ;;  %v1117_v36 = vmul.f32 %v2618_v14, %v2618_v14  ;;  %v3389_v14 = vld [vmem:[#allocation20_spill] sm:$0xff] }
 0x19e   : > { %3387 = vst [vmem:[#allocation9_spill] sm:$0xff] %v2682_v25  ;;  %v1138_v17 = vadd.f32 %v1137_v9, %v1101_v39  ;;  %v1143_v7 = vadd.f32 %v1087_v56, %v1071_v8  ;;  %v1074_v31 = vmul.f32 %v2439_v50, %v2439_v50  ;;  %v1090_v33 = vmul.f32 %v2502_v53, %v2502_v53 }
 0x19f   : > { %v1104_v30 = vmul.f32 %v2558_v61, %v2558_v61  ;;  %v1118_v45 = vmul.f32 %v2622_v41, %v2622_v41  ;;  %v1133_v37 = vadd.f32 %v1132_v38, %v1115_v15  ;;  %v1136_v52 = vadd.f32 %v1135_v28, %v1116_v19 }
 0x1a0   : > { %v1141_v44 = vadd.f32 %v1140_v42, %v1102_v24  ;;  %v1146_v51 = vadd.f32 %v1088_v21, %v1072_v47  ;;  %v2706_v39 = vsub.f32 %v3389_v14, %v2407_v18  ;;  %v1075_v8 = vmul.f32 %v2443_v54, %v2443_v54 }
 0x1a1   : > { %v1091_v56 = vmul.f32 %v2506_v55, %v2506_v55  ;;  %v1105_v9 = vmul.f32 %v2562_v62, %v2562_v62  ;;  %v1119_v41 = vmul.f32 %v2626_v6, %v2626_v6  ;;  %v1139_v38 = vadd.f32 %v1138_v17, %v1117_v36 }
 0x1a2   : > { %3390 = vst [vmem:[#allocation11_spill] sm:$0xff] %v2706_v39  ;;  %v1144_v28 = vadd.f32 %v1143_v7, %v1103_v57  ;;  %v1149_v42 = vadd.f32 %v1089_v46, %v1073_v40  ;;  %v1076_v19 = vmul.f32 %v2447_v59, %v2447_v59  ;;  %v1092_v14 = vmul.f32 %v2510_v60, %v2510_v60 }
 0x1a3   : > { %v1106_v47 = vmul.f32 %v2566_v63, %v2566_v63  ;;  %v1120_v21 = vmul.f32 %v2634_v16, %v2634_v16  ;;  %v1142_v24 = vadd.f32 %v1141_v44, %v1118_v45  ;;  %v1147_v15 = vadd.f32 %v1146_v51, %v1104_v30 }
 0x1a4   : > { %v1152_v62 = vadd.f32 %v1090_v33, %v1074_v31  ;;  %v1179_v61 = vadd.f32 %v1136_v52, %v1133_v37  ;;  %v1077_v57 = vmul.f32 %v2451_v1, %v2451_v1  ;;  %v1093_v40 = vmul.f32 %v2514_v2, %v2514_v2 }
 0x1a5   : > { %v1107_v46 = vmul.f32 %v2570_v3, %v2570_v3  ;;  %v1121_v36 = vmul.f32 %v2638_v32, %v2638_v32  ;;  %v1145_v17 = vadd.f32 %v1144_v28, %v1119_v41  ;;  %v1150_v7 = vadd.f32 %v1149_v42, %v1105_v9 }
 0x1a6   : > { %v1155_v6 = vadd.f32 %v1091_v56, %v1075_v8  ;;  %v1180_v16 = vadd.f32 %v1179_v61, %v1139_v38  ;;  %v1078_v51 = vmul.f32 %v2455_v4, %v2455_v4  ;;  %v1094_v52 = vmul.f32 %v2518_v5, %v2518_v5 }
 0x1a7   : > { %v1108_v44 = vmul.f32 %v2574_v10, %v2574_v10  ;;  %v1122_v31 = vmul.f32 %v2650_v0, %v2650_v0  ;;  %v1148_v33 = vadd.f32 %v1147_v15, %v1120_v21  ;;  %v1153_v30 = vadd.f32 %v1152_v62, %v1106_v47 }
 0x1a8   : > { %v1158_v45 = vadd.f32 %v1092_v14, %v1076_v19  ;;  %v1181_v37 = vadd.f32 %v1180_v16, %v1142_v24  ;;  %v1079_v41 = vmul.f32 %v2459_v11, %v2459_v11  ;;  %v1095_v61 = vmul.f32 %v2522_v12, %v2522_v12 }
 0x1a9   : > { %v1109_v8 = vmul.f32 %v2578_v13, %v2578_v13  ;;  %v1123_v56 = vmul.f32 %v2654_v23, %v2654_v23  ;;  %v1151_v9 = vadd.f32 %v1150_v7, %v1121_v36  ;;  %v1156_v38 = vadd.f32 %v1155_v6, %v1107_v46 }
 0x1aa   : > { %v1161_v28 = vadd.f32 %v1093_v40, %v1077_v57  ;;  %v1182_v42 = vadd.f32 %v1181_v37, %v1145_v17  ;;  %v1080_v62 = vmul.f32 %v2463_v20, %v2463_v20  ;;  %v1096_v16 = vmul.f32 %v2526_v26, %v2526_v26 }
 0x1ab   : > { %v1110_v19 = vmul.f32 %v2582_v27, %v2582_v27  ;;  %v1124_v14 = vmul.f32 %v2658_v43, %v2658_v43  ;;  %v1154_v47 = vadd.f32 %v1153_v30, %v1122_v31  ;;  %v1159_v21 = vadd.f32 %v1158_v45, %v1108_v44  ;;  %v3392_v31 = vld [vmem:[#allocation10_spill] sm:$0xff] }
 0x1ac   : > { %v1164_v24 = vadd.f32 %v1094_v52, %v1078_v51  ;;  %v1183_v15 = vadd.f32 %v1182_v42, %v1148_v33  ;;  %v1081_v6 = vmul.f32 %v2467_v29, %v2467_v29  ;;  %v1097_v57 = vmul.f32 %v2530_v34, %v2530_v34  ;;  %v3391_v52 = vld [vmem:[#allocation36_spill] sm:$0xff] }
 0x1ad   : > { %v1111_v40 = vmul.f32 %v2586_v35, %v2586_v35  ;;  %v1125_v46 = vmul.f32 %v2662_v58, %v2662_v58  ;;  %v1157_v36 = vadd.f32 %v1156_v38, %v1123_v56  ;;  %v1162_v17 = vadd.f32 %v1161_v28, %v1109_v8  ;;  %v3393_v8 = vld [vmem:[#allocation21_spill] sm:$0xff] }
 0x1ae   : > { %v1167_v7 = vadd.f32 %v1095_v61, %v1079_v41  ;;  %v1184_v37 = vadd.f32 %v1183_v15, %v1151_v9  ;;  %v1082_v51 = vmul.f32 %v2470_v22, %v2470_v22  ;;  %v1098_v44 = vmul.f32 %v3391_v52, %v3391_v52  ;;  %v3394_v61 = vld [vmem:[#allocation12_spill] sm:$0xff] }
 0x1af   : > { %v1112_v33 = vmul.f32 %v3392_v31, %v3392_v31  ;;  %v1126_v30 = vmul.f32 %v2682_v25, %v2682_v25  ;;  %v1160_v45 = vadd.f32 %v1159_v21, %v1124_v14  ;;  %v1165_v42 = vadd.f32 %v1164_v24, %v1110_v19  ;;  %v3395_v25 = vld [vmem:[#allocation22_spill] sm:$0xff] }
 0x1b0   : > { %v1170_v43 = vadd.f32 %v1096_v16, %v1080_v62  ;;  %v1185_v58 = vadd.f32 %v1184_v37, %v1154_v47  ;;  %v2774_v41 = vsub.f32 %v3393_v8, %v2407_v18  ;;  %v1113_v56 = vmul.f32 %v3394_v61, %v3394_v61  ;;  %v3396_v62 = vld [vmem:[#allocation14_spill] sm:$0xff] }
 0x1b1   : > { %v1127_v9 = vmul.f32 %v2686_v48, %v2686_v48  ;;  %v1163_v38 = vadd.f32 %v1162_v17, %v1125_v46  ;;  %v1168_v28 = vadd.f32 %v1167_v7, %v1111_v40  ;;  %v1173_v15 = vadd.f32 %v1097_v57, %v1081_v6 }
 0x1b2   : > { %v1186_v23 = vadd.f32 %v1185_v58, %v1157_v36  ;;  %v2782_v14 = vsub.f32 %v3395_v25, %v2407_v18  ;;  %v1114_v16 = vmul.f32 %v3396_v62, %v3396_v62  ;;  %v1128_v19 = vmul.f32 %v2706_v39, %v2706_v39 }
 0x1b3   : > { %v1166_v47 = vadd.f32 %v1165_v42, %v1126_v30  ;;  %v1171_v21 = vadd.f32 %v1170_v43, %v1112_v33  ;;  %v1176_v24 = vadd.f32 %v1098_v44, %v1082_v51  ;;  %v1129_v46 = vmul.f32 %v2774_v41, %v2774_v41 }
 0x1b4   : > { %v1187_v37 = vadd.f32 %v1186_v23, %v1160_v45  ;;  %v1169_v40 = vadd.f32 %v1168_v28, %v1127_v9  ;;  %v1174_v6 = vadd.f32 %v1173_v15, %v1113_v56  ;;  %v1130_v18 = vmul.f32 %v2782_v14, %v2782_v14  ;;  %v2797_v28 = vld [vmem:[%s3257_s2] ss:$0 sm:$0xff]  ;;  %v3397_v15 = vld [vmem:[#allocation23_spill] sm:$0xff] }
 0x1b5   : > { %v1172_v25 = vadd.f32 %v1171_v21, %v1128_v19  ;;  %v1177_v57 = vadd.f32 %v1176_v24, %v1114_v16  ;;  %v3398_v16 = vld [vmem:[#allocation24_spill] sm:$0xff]  ;;  %v3400_v24 = vld [vmem:[#allocation26_spill] sm:$0xff] }
 0x1b6   : > { %v1188_v58 = vadd.f32 %v1187_v37, %v1163_v38  ;;  %v1175_v17 = vadd.f32 %v1174_v6, %v1129_v46  ;;  %v2810_v46 = vld [vmem:[%s3258_s3] ss:$0 sm:$0xff] }
 0x1b7   : > { %v1178_v8 = vadd.f32 %v1177_v57, %v1130_v18 }
 0x1b8   : > { %v1189_v36 = vadd.f32 %v1188_v58, %v1166_v47  ;;  %v3399_v47 = vld [vmem:[#allocation25_spill] sm:$0xff]  ;;  %v3402_v58 = vld [vmem:[#allocation28_spill] sm:$0xff] }
 0x1ba   : > { %v1190_v7 = vadd.f32 %v1189_v36, %v1169_v40  ;;  %v3401_v40 = vld [vmem:[#allocation27_spill] sm:$0xff] }
 0x1bc   : > { %v1191_v39 = vadd.f32 %v1190_v7, %v1172_v25 }
 0x1be   : > { %v1192_v30 = vadd.f32 %v1191_v39, %v1175_v17 }
 0x1c0   : > { %v1193_v43 = vadd.f32 %v1192_v30, %v1178_v8 }
 0x1c2   : > { %v1194_v51 = vrot.slane %v1193_v43, 4 }
 0x1c4   : > { %v1195_v23 = vadd.f32 %v1194_v51, %v1193_v43 }
 0x1c6   : > { %v1196_v44 = vrot.slane %v1195_v23, 2 }
 0x1c8   : > { %v1197_v33 = vadd.f32 %v1196_v44, %v1195_v23 }
 0x1ca   : > { %v1198_v45 = vrot.slane %v1197_v33, 1 }
 0x1cc   : > { %v1199_v42 = vadd.f32 %v1198_v45, %v1197_v33 }
 0x1ce   : > { %v1200_v56 = vmul.f32 0.001953125, %v1199_v42 }
 0x1d0   : > { %v1201_v9 = vadd.f32 1e-05, %v1200_v56 }
 0x1d2   : > { %1875 = vrsqrt.f32 %v1201_v9 }
 0x1dc   : > { %v2792_v38 = vpop.eup %1875 }
 0x1dd   : > { %v1203_v39 = vmul.f32 %v2792_v38, %v3397_v15  ;;  %v1204_v19 = vmul.f32 %v2792_v38, %v3398_v16  ;;  %v1205_v21 = vmul.f32 %v2792_v38, %v3399_v47  ;;  %v1206_v37 = vmul.f32 %v2792_v38, %v3400_v24 }
 0x1de   : > { %v1207_v6 = vmul.f32 %v2792_v38, %v3401_v40  ;;  %v1208_v18 = vmul.f32 %v2792_v38, %v3402_v58  ;;  %v1209_v25 = vmul.f32 %v2792_v38, %v2435_v49  ;;  %v1210_v57 = vmul.f32 %v2792_v38, %v2439_v50 }
 0x1df   : > { %v1274_v36 = vmul.f32 %v2797_v28, %v1203_v39  ;;  %v1275_v17 = vmul.f32 %v2797_v28, %v1204_v19  ;;  %v1276_v7 = vmul.f32 %v2797_v28, %v1205_v21  ;;  %v1277_v8 = vmul.f32 %v2797_v28, %v1206_v37 }
 0x1e0   : > { %v1278_v30 = vmul.f32 %v2797_v28, %v1207_v6  ;;  %v1279_v43 = vmul.f32 %v2797_v28, %v1208_v18  ;;  %v1280_v51 = vmul.f32 %v2797_v28, %v1209_v25  ;;  %v1281_v23 = vmul.f32 %v2797_v28, %v1210_v57 }
 0x1e1   : > { %v1345_v49 = vadd.f32 %v2810_v46, %v1274_v36  ;;  %v1346_v50 = vadd.f32 %v2810_v46, %v1275_v17  ;;  %v1347_v44 = vadd.f32 %v2810_v46, %v1276_v7  ;;  %v1348_v33 = vadd.f32 %v2810_v46, %v1277_v8 }
 0x1e2   : > { %v1349_v45 = vadd.f32 %v2810_v46, %v1278_v30  ;;  %v1350_v42 = vadd.f32 %v2810_v46, %v1279_v43  ;;  %v1351_v56 = vadd.f32 %v2810_v46, %v1280_v51  ;;  %v1352_v9 = vadd.f32 %v2810_v46, %v1281_v23 }
 0x1e3   : > { %v1409_v15 = vmax.f32 %v1345_v49, 0.0  ;;  %v1410_v39 = vmax.f32 %v1346_v50, 0.0  ;;  %v1411_v16 = vmax.f32 %v1347_v44, 0.0  ;;  %v1412_v19 = vmax.f32 %v1348_v33, 0.0 }
 0x1e4   : > { %v1413_v47 = vmax.f32 %v1349_v45, 0.0  ;;  %v1414_v21 = vmax.f32 %v1350_v42, 0.0  ;;  %v1415_v24 = vmax.f32 %v1351_v56, 0.0  ;;  %v1416_v37 = vmax.f32 %v1352_v9, 0.0 }
 0x1e5   : > { %1473 = vst [vmem:[%s3259_s4] sm:$0xff] %v1409_v15  ;;  %1474 = vst [vmem:[%s3259_s4 + $0x8] sm:$0xff] %v1410_v39  ;;  %v1211_v40 = vmul.f32 %v2792_v38, %v2443_v54  ;;  %v1212_v6 = vmul.f32 %v2792_v38, %v2447_v59  ;;  %v1213_v58 = vmul.f32 %v2792_v38, %v2451_v1 }
 0x1e6   : > { %1475 = vst [vmem:[%s3259_s4 + $0x10] sm:$0xff] %v1411_v16  ;;  %1476 = vst [vmem:[%s3259_s4 + $0x18] sm:$0xff] %v1412_v19  ;;  %v1214_v18 = vmul.f32 %v2792_v38, %v2455_v4  ;;  %v1215_v54 = vmul.f32 %v2792_v38, %v2459_v11  ;;  %v1216_v59 = vmul.f32 %v2792_v38, %v2463_v20  ;;  %v3403_v16 = vld [vmem:[#allocation29_spill] sm:$0xff] }
 0x1e7   : > { %1477 = vst [vmem:[%s3259_s4 + $0x20] sm:$0xff] %v1413_v47  ;;  %1478 = vst [vmem:[%s3259_s4 + $0x28] sm:$0xff] %v1414_v21  ;;  %v1217_v1 = vmul.f32 %v2792_v38, %v2467_v29  ;;  %v1218_v4 = vmul.f32 %v2792_v38, %v2470_v22  ;;  %v1282_v25 = vmul.f32 %v2797_v28, %v1211_v40  ;;  %v3404_v47 = vld [vmem:[#allocation30_spill] sm:$0xff]  ;;  %v3406_v40 = vld [vmem:[#allocation32_spill] sm:$0xff] }
 0x1e8   : > { %1479 = vst [vmem:[%s3259_s4 + $0x30] sm:$0xff] %v1415_v24  ;;  %1480 = vst [vmem:[%s3259_s4 + $0x38] sm:$0xff] %v1416_v37  ;;  %v1283_v57 = vmul.f32 %v2797_v28, %v1212_v6  ;;  %v1284_v36 = vmul.f32 %v2797_v28, %v1213_v58  ;;  %v1285_v17 = vmul.f32 %v2797_v28, %v1214_v18  ;;  %v3405_v24 = vld [vmem:[#allocation31_spill] sm:$0xff]  ;;  %v3407_v58 = vld [vmem:[#allocation33_spill] sm:$0xff] }
 0x1e9   : > { %v1286_v7 = vmul.f32 %v2797_v28, %v1215_v54  ;;  %v1287_v11 = vmul.f32 %v2797_v28, %v1216_v59  ;;  %v1288_v20 = vmul.f32 %v2797_v28, %v1217_v1  ;;  %v1289_v8 = vmul.f32 %v2797_v28, %v1218_v4  ;;  %v3408_v54 = vld [vmem:[#allocation34_spill] sm:$0xff]  ;;  %v3409_v1 = vld [vmem:[#allocation35_spill] sm:$0xff] }
 0x1ea   : > { %v1353_v29 = vadd.f32 %v2810_v46, %v1282_v25  ;;  %v1354_v22 = vadd.f32 %v2810_v46, %v1283_v57  ;;  %v1355_v30 = vadd.f32 %v2810_v46, %v1284_v36  ;;  %v1356_v43 = vadd.f32 %v2810_v46, %v1285_v17 }
 0x1eb   : > { %v1357_v51 = vadd.f32 %v2810_v46, %v1286_v7  ;;  %v1358_v23 = vadd.f32 %v2810_v46, %v1287_v11  ;;  %v1359_v49 = vadd.f32 %v2810_v46, %v1288_v20  ;;  %v1360_v50 = vadd.f32 %v2810_v46, %v1289_v8 }
 0x1ec   : > { %v1417_v44 = vmax.f32 %v1353_v29, 0.0  ;;  %v1418_v33 = vmax.f32 %v1354_v22, 0.0  ;;  %v1419_v45 = vmax.f32 %v1355_v30, 0.0  ;;  %v1420_v42 = vmax.f32 %v1356_v43, 0.0 }
 0x1ed   : > { %v1421_v56 = vmax.f32 %v1357_v51, 0.0  ;;  %v1422_v9 = vmax.f32 %v1358_v23, 0.0  ;;  %v1423_v15 = vmax.f32 %v1359_v49, 0.0  ;;  %v1424_v39 = vmax.f32 %v1360_v50, 0.0 }
 0x1ee   : > { %1481 = vst [vmem:[%s3259_s4 + $0x40] sm:$0xff] %v1417_v44  ;;  %1482 = vst [vmem:[%s3259_s4 + $0x48] sm:$0xff] %v1418_v33  ;;  %v1219_v19 = vmul.f32 %v2792_v38, %v3403_v16  ;;  %v1220_v21 = vmul.f32 %v2792_v38, %v3404_v47  ;;  %v1221_v37 = vmul.f32 %v2792_v38, %v3405_v24 }
 0x1ef   : > { %1483 = vst [vmem:[%s3259_s4 + $0x50] sm:$0xff] %v1419_v45  ;;  %1484 = vst [vmem:[%s3259_s4 + $0x58] sm:$0xff] %v1420_v42  ;;  %v1222_v6 = vmul.f32 %v2792_v38, %v3406_v40  ;;  %v1223_v18 = vmul.f32 %v2792_v38, %v3407_v58  ;;  %v1224_v59 = vmul.f32 %v2792_v38, %v3408_v54 }
 0x1f0   : > { %1485 = vst [vmem:[%s3259_s4 + $0x60] sm:$0xff] %v1421_v56  ;;  %1486 = vst [vmem:[%s3259_s4 + $0x68] sm:$0xff] %v1422_v9  ;;  %v1225_v4 = vmul.f32 %v2792_v38, %v3409_v1  ;;  %v1226_v25 = vmul.f32 %v2792_v38, %v2502_v53  ;;  %v1290_v57 = vmul.f32 %v2797_v28, %v1219_v19 }
 0x1f1   : > { %1487 = vst [vmem:[%s3259_s4 + $0x70] sm:$0xff] %v1423_v15  ;;  %1488 = vst [vmem:[%s3259_s4 + $0x78] sm:$0xff] %v1424_v39  ;;  %v1291_v36 = vmul.f32 %v2797_v28, %v1220_v21  ;;  %v1292_v17 = vmul.f32 %v2797_v28, %v1221_v37  ;;  %v1293_v7 = vmul.f32 %v2797_v28, %v1222_v6 }
 0x1f2   : > { %v1294_v11 = vmul.f32 %v2797_v28, %v1223_v18  ;;  %v1295_v20 = vmul.f32 %v2797_v28, %v1224_v59  ;;  %v1296_v8 = vmul.f32 %v2797_v28, %v1225_v4  ;;  %v1297_v29 = vmul.f32 %v2797_v28, %v1226_v25 }
 0x1f3   : > { %v1361_v22 = vadd.f32 %v2810_v46, %v1290_v57  ;;  %v1362_v53 = vadd.f32 %v2810_v46, %v1291_v36  ;;  %v1363_v30 = vadd.f32 %v2810_v46, %v1292_v17  ;;  %v1364_v43 = vadd.f32 %v2810_v46, %v1293_v7 }
 0x1f4   : > { %v1365_v51 = vadd.f32 %v2810_v46, %v1294_v11  ;;  %v1366_v23 = vadd.f32 %v2810_v46, %v1295_v20  ;;  %v1367_v49 = vadd.f32 %v2810_v46, %v1296_v8  ;;  %v1368_v50 = vadd.f32 %v2810_v46, %v1297_v29 }
 0x1f5   : > { %v1425_v44 = vmax.f32 %v1361_v22, 0.0  ;;  %v1426_v33 = vmax.f32 %v1362_v53, 0.0  ;;  %v1427_v45 = vmax.f32 %v1363_v30, 0.0  ;;  %v1428_v42 = vmax.f32 %v1364_v43, 0.0  ;;  %v3410_v53 = vld [vmem:[#allocation37_spill] sm:$0xff]  ;;  %v3411_v43 = vld [vmem:[#allocation38_spill] sm:$0xff] }
 0x1f6   : > { %v1429_v56 = vmax.f32 %v1365_v51, 0.0  ;;  %v1430_v9 = vmax.f32 %v1366_v23, 0.0  ;;  %v1431_v15 = vmax.f32 %v1367_v49, 0.0  ;;  %v1432_v39 = vmax.f32 %v1368_v50, 0.0  ;;  %v3412_v23 = vld [vmem:[#allocation39_spill] sm:$0xff]  ;;  %v3413_v50 = vld [vmem:[#allocation40_spill] sm:$0xff] }
 0x1f7   : > { %1489 = vst [vmem:[%s3259_s4 + $0x80] sm:$0xff] %v1425_v44  ;;  %1490 = vst [vmem:[%s3259_s4 + $0x88] sm:$0xff] %v1426_v33  ;;  %v1227_v16 = vmul.f32 %v2792_v38, %v2506_v55  ;;  %v1228_v19 = vmul.f32 %v2792_v38, %v2510_v60  ;;  %v1229_v47 = vmul.f32 %v2792_v38, %v2514_v2  ;;  %v3414_v33 = vld [vmem:[#allocation41_spill] sm:$0xff] }
 0x1f8   : > { %1491 = vst [vmem:[%s3259_s4 + $0x90] sm:$0xff] %v1427_v45  ;;  %1492 = vst [vmem:[%s3259_s4 + $0x98] sm:$0xff] %v1428_v42  ;;  %v1230_v21 = vmul.f32 %v2792_v38, %v2518_v5  ;;  %v1231_v55 = vmul.f32 %v2792_v38, %v2522_v12  ;;  %v1232_v60 = vmul.f32 %v2792_v38, %v2526_v26  ;;  %v3415_v42 = vld [vmem:[#allocation42_spill] sm:$0xff] }
 0x1f9   : > { %1493 = vst [vmem:[%s3259_s4 + $0xa0] sm:$0xff] %v1429_v56  ;;  %1494 = vst [vmem:[%s3259_s4 + $0xa8] sm:$0xff] %v1430_v9  ;;  %v1233_v2 = vmul.f32 %v2792_v38, %v2530_v34  ;;  %v1234_v5 = vmul.f32 %v2792_v38, %v3391_v52  ;;  %v1298_v24 = vmul.f32 %v2797_v28, %v1227_v16  ;;  %v3416_v9 = vld [vmem:[#allocation43_spill] sm:$0xff] }
 0x1fa   : > { %1495 = vst [vmem:[%s3259_s4 + $0xb0] sm:$0xff] %v1431_v15  ;;  %1496 = vst [vmem:[%s3259_s4 + $0xb8] sm:$0xff] %v1432_v39  ;;  %v1299_v37 = vmul.f32 %v2797_v28, %v1228_v19  ;;  %v1300_v40 = vmul.f32 %v2797_v28, %v1229_v47  ;;  %v1301_v6 = vmul.f32 %v2797_v28, %v1230_v21 }
 0x1fb   : > { %v1302_v58 = vmul.f32 %v2797_v28, %v1231_v55  ;;  %v1303_v12 = vmul.f32 %v2797_v28, %v1232_v60  ;;  %v1304_v26 = vmul.f32 %v2797_v28, %v1233_v2  ;;  %v1305_v18 = vmul.f32 %v2797_v28, %v1234_v5 }
 0x1fc   : > { %v1369_v34 = vadd.f32 %v2810_v46, %v1298_v24  ;;  %v1370_v52 = vadd.f32 %v2810_v46, %v1299_v37  ;;  %v1371_v54 = vadd.f32 %v2810_v46, %v1300_v40  ;;  %v1372_v59 = vadd.f32 %v2810_v46, %v1301_v6 }
 0x1fd   : > { %v1373_v1 = vadd.f32 %v2810_v46, %v1302_v58  ;;  %v1374_v4 = vadd.f32 %v2810_v46, %v1303_v12  ;;  %v1375_v25 = vadd.f32 %v2810_v46, %v1304_v26  ;;  %v1376_v57 = vadd.f32 %v2810_v46, %v1305_v18 }
 0x1fe   : > { %v1433_v36 = vmax.f32 %v1369_v34, 0.0  ;;  %v1434_v17 = vmax.f32 %v1370_v52, 0.0  ;;  %v1435_v7 = vmax.f32 %v1371_v54, 0.0  ;;  %v1436_v11 = vmax.f32 %v1372_v59, 0.0 }
 0x1ff   : > { %v1437_v20 = vmax.f32 %v1373_v1, 0.0  ;;  %v1438_v8 = vmax.f32 %v1374_v4, 0.0  ;;  %v1439_v29 = vmax.f32 %v1375_v25, 0.0  ;;  %v1440_v22 = vmax.f32 %v1376_v57, 0.0 }
 0x200   : > { %1497 = vst [vmem:[%s3259_s4 + $0xc0] sm:$0xff] %v1433_v36  ;;  %1498 = vst [vmem:[%s3259_s4 + $0xc8] sm:$0xff] %v1434_v17  ;;  %v1235_v30 = vmul.f32 %v2792_v38, %v3410_v53  ;;  %v1236_v51 = vmul.f32 %v2792_v38, %v3411_v43  ;;  %v1237_v49 = vmul.f32 %v2792_v38, %v3412_v23 }
 0x201   : > { %1499 = vst [vmem:[%s3259_s4 + $0xd0] sm:$0xff] %v1435_v7  ;;  %1500 = vst [vmem:[%s3259_s4 + $0xd8] sm:$0xff] %v1436_v11  ;;  %v1238_v44 = vmul.f32 %v2792_v38, %v3413_v50  ;;  %v1239_v45 = vmul.f32 %v2792_v38, %v3414_v33  ;;  %v1240_v56 = vmul.f32 %v2792_v38, %v3415_v42 }
 0x202   : > { %1501 = vst [vmem:[%s3259_s4 + $0xe0] sm:$0xff] %v1437_v20  ;;  %1502 = vst [vmem:[%s3259_s4 + $0xe8] sm:$0xff] %v1438_v8  ;;  %v1241_v15 = vmul.f32 %v2792_v38, %v3416_v9  ;;  %v1242_v39 = vmul.f32 %v2792_v38, %v2566_v63  ;;  %v1306_v16 = vmul.f32 %v2797_v28, %v1235_v30 }
 0x203   : > { %1503 = vst [vmem:[%s3259_s4 + $0xf0] sm:$0xff] %v1439_v29  ;;  %1504 = vst [vmem:[%s3259_s4 + $0xf8] sm:$0xff] %v1440_v22  ;;  %v1307_v19 = vmul.f32 %v2797_v28, %v1236_v51  ;;  %v1308_v47 = vmul.f32 %v2797_v28, %v1237_v49  ;;  %v1309_v21 = vmul.f32 %v2797_v28, %v1238_v44 }
 0x204   : > { %v1310_v55 = vmul.f32 %v2797_v28, %v1239_v45  ;;  %v1311_v60 = vmul.f32 %v2797_v28, %v1240_v56  ;;  %v1312_v2 = vmul.f32 %v2797_v28, %v1241_v15  ;;  %v1313_v5 = vmul.f32 %v2797_v28, %v1242_v39 }
 0x205   : > { %v1377_v24 = vadd.f32 %v2810_v46, %v1306_v16  ;;  %v1378_v63 = vadd.f32 %v2810_v46, %v1307_v19  ;;  %v1379_v37 = vadd.f32 %v2810_v46, %v1308_v47  ;;  %v1380_v40 = vadd.f32 %v2810_v46, %v1309_v21  ;;  %v3417_v16 = vld [vmem:[#allocation16_spill] sm:$0xff]  ;;  %v3418_v47 = vld [vmem:[#allocation18_spill] sm:$0xff] }
 0x206   : > { %v1381_v6 = vadd.f32 %v2810_v46, %v1310_v55  ;;  %v1382_v58 = vadd.f32 %v2810_v46, %v1311_v60  ;;  %v1383_v12 = vadd.f32 %v2810_v46, %v1312_v2  ;;  %v1384_v26 = vadd.f32 %v2810_v46, %v1313_v5  ;;  %v3419_v55 = vld [vmem:[#allocation2_spill] sm:$0xff]  ;;  %v3420_v2 = vld [vmem:[#allocation3_spill] sm:$0xff] }
 0x207   : > { %v1441_v18 = vmax.f32 %v1377_v24, 0.0  ;;  %v1442_v34 = vmax.f32 %v1378_v63, 0.0  ;;  %v1443_v52 = vmax.f32 %v1379_v37, 0.0  ;;  %v1444_v54 = vmax.f32 %v1380_v40, 0.0  ;;  %v3421_v24 = vld [vmem:[#allocation4_spill] sm:$0xff]  ;;  %v3422_v37 = vld [vmem:[#allocation5_spill] sm:$0xff] }
 0x208   : > { %v1445_v59 = vmax.f32 %v1381_v6, 0.0  ;;  %v1446_v1 = vmax.f32 %v1382_v58, 0.0  ;;  %v1447_v4 = vmax.f32 %v1383_v12, 0.0  ;;  %v1448_v25 = vmax.f32 %v1384_v26, 0.0 }
 0x209   : > { %1505 = vst [vmem:[%s3259_s4 + $0x100] sm:$0xff] %v1441_v18  ;;  %1506 = vst [vmem:[%s3259_s4 + $0x108] sm:$0xff] %v1442_v34  ;;  %v1243_v57 = vmul.f32 %v2792_v38, %v2570_v3  ;;  %v1244_v36 = vmul.f32 %v2792_v38, %v2574_v10  ;;  %v1245_v17 = vmul.f32 %v2792_v38, %v2578_v13 }
 0x20a   : > { %1507 = vst [vmem:[%s3259_s4 + $0x110] sm:$0xff] %v1443_v52  ;;  %1508 = vst [vmem:[%s3259_s4 + $0x118] sm:$0xff] %v1444_v54  ;;  %v1246_v7 = vmul.f32 %v2792_v38, %v2582_v27  ;;  %v1247_v3 = vmul.f32 %v2792_v38, %v2586_v35  ;;  %v1248_v10 = vmul.f32 %v2792_v38, %v3392_v31 }
 0x20b   : > { %1509 = vst [vmem:[%s3259_s4 + $0x120] sm:$0xff] %v1445_v59  ;;  %1510 = vst [vmem:[%s3259_s4 + $0x128] sm:$0xff] %v1446_v1  ;;  %v1249_v13 = vmul.f32 %v2792_v38, %v3394_v61  ;;  %v1250_v27 = vmul.f32 %v2792_v38, %v3396_v62  ;;  %v1314_v11 = vmul.f32 %v2797_v28, %v1243_v57 }
 0x20c   : > { %1511 = vst [vmem:[%s3259_s4 + $0x130] sm:$0xff] %v1447_v4  ;;  %1512 = vst [vmem:[%s3259_s4 + $0x138] sm:$0xff] %v1448_v25  ;;  %v1315_v20 = vmul.f32 %v2797_v28, %v1244_v36  ;;  %v1316_v8 = vmul.f32 %v2797_v28, %v1245_v17  ;;  %v1317_v29 = vmul.f32 %v2797_v28, %v1246_v7 }
 0x20d   : > { %v1318_v22 = vmul.f32 %v2797_v28, %v1247_v3  ;;  %v1319_v35 = vmul.f32 %v2797_v28, %v1248_v10  ;;  %v1320_v31 = vmul.f32 %v2797_v28, %v1249_v13  ;;  %v1321_v53 = vmul.f32 %v2797_v28, %v1250_v27 }
 0x20e   : > { %v1385_v61 = vadd.f32 %v2810_v46, %v1314_v11  ;;  %v1386_v62 = vadd.f32 %v2810_v46, %v1315_v20  ;;  %v1387_v30 = vadd.f32 %v2810_v46, %v1316_v8  ;;  %v1388_v43 = vadd.f32 %v2810_v46, %v1317_v29 }
 0x20f   : > { %v1389_v51 = vadd.f32 %v2810_v46, %v1318_v22  ;;  %v1390_v23 = vadd.f32 %v2810_v46, %v1319_v35  ;;  %v1391_v49 = vadd.f32 %v2810_v46, %v1320_v31  ;;  %v1392_v50 = vadd.f32 %v2810_v46, %v1321_v53  ;;  %v3423_v22 = vld [vmem:[#allocation6_spill] sm:$0xff]  ;;  %v3424_v31 = vld [vmem:[#allocation7_spill] sm:$0xff] }
 0x210   : > { %v1449_v44 = vmax.f32 %v1385_v61, 0.0  ;;  %v1450_v33 = vmax.f32 %v1386_v62, 0.0  ;;  %v1451_v45 = vmax.f32 %v1387_v30, 0.0  ;;  %v1452_v42 = vmax.f32 %v1388_v43, 0.0  ;;  %v3425_v61 = vld [vmem:[#allocation8_spill] sm:$0xff]  ;;  %v3426_v30 = vld [vmem:[#allocation9_spill] sm:$0xff] }
 0x211   : > { %v1453_v56 = vmax.f32 %v1389_v51, 0.0  ;;  %v1454_v9 = vmax.f32 %v1390_v23, 0.0  ;;  %v1455_v15 = vmax.f32 %v1391_v49, 0.0  ;;  %v1456_v39 = vmax.f32 %v1392_v50, 0.0  ;;  %v3427_v23 = vld [vmem:[#allocation11_spill] sm:$0xff] }
 0x212   : > { %1513 = vst [vmem:[%s3259_s4 + $0x140] sm:$0xff] %v1449_v44  ;;  %1514 = vst [vmem:[%s3259_s4 + $0x148] sm:$0xff] %v1450_v33  ;;  %v1251_v19 = vmul.f32 %v2792_v38, %v3417_v16  ;;  %v1252_v21 = vmul.f32 %v2792_v38, %v3418_v47  ;;  %v1253_v60 = vmul.f32 %v2792_v38, %v3419_v55 }
 0x213   : > { %1515 = vst [vmem:[%s3259_s4 + $0x150] sm:$0xff] %v1451_v45  ;;  %1516 = vst [vmem:[%s3259_s4 + $0x158] sm:$0xff] %v1452_v42  ;;  %v1254_v5 = vmul.f32 %v2792_v38, %v3420_v2  ;;  %v1255_v63 = vmul.f32 %v2792_v38, %v3421_v24  ;;  %v1256_v40 = vmul.f32 %v2792_v38, %v3422_v37 }
 0x214   : > { %1517 = vst [vmem:[%s3259_s4 + $0x160] sm:$0xff] %v1453_v56  ;;  %1518 = vst [vmem:[%s3259_s4 + $0x168] sm:$0xff] %v1454_v9  ;;  %v1257_v6 = vmul.f32 %v2792_v38, %v2638_v32  ;;  %v1258_v58 = vmul.f32 %v2792_v38, %v2650_v0  ;;  %v1322_v12 = vmul.f32 %v2797_v28, %v1251_v19 }
 0x215   : > { %1519 = vst [vmem:[%s3259_s4 + $0x170] sm:$0xff] %v1455_v15  ;;  %1520 = vst [vmem:[%s3259_s4 + $0x178] sm:$0xff] %v1456_v39  ;;  %v1323_v26 = vmul.f32 %v2797_v28, %v1252_v21  ;;  %v1324_v18 = vmul.f32 %v2797_v28, %v1253_v60  ;;  %v1325_v34 = vmul.f32 %v2797_v28, %v1254_v5 }
 0x216   : > { %v1326_v52 = vmul.f32 %v2797_v28, %v1255_v63  ;;  %v1327_v54 = vmul.f32 %v2797_v28, %v1256_v40  ;;  %v1328_v59 = vmul.f32 %v2797_v28, %v1257_v6  ;;  %v1329_v1 = vmul.f32 %v2797_v28, %v1258_v58 }
 0x217   : > { %v1393_v32 = vadd.f32 %v2810_v46, %v1322_v12  ;;  %v1394_v0 = vadd.f32 %v2810_v46, %v1323_v26  ;;  %v1395_v4 = vadd.f32 %v2810_v46, %v1324_v18  ;;  %v1396_v25 = vadd.f32 %v2810_v46, %v1325_v34 }
 0x218   : > { %v1397_v57 = vadd.f32 %v2810_v46, %v1326_v52  ;;  %v1398_v36 = vadd.f32 %v2810_v46, %v1327_v54  ;;  %v1399_v17 = vadd.f32 %v2810_v46, %v1328_v59  ;;  %v1400_v7 = vadd.f32 %v2810_v46, %v1329_v1 }
 0x219   : > { %v1457_v3 = vmax.f32 %v1393_v32, 0.0  ;;  %v1458_v10 = vmax.f32 %v1394_v0, 0.0  ;;  %v1459_v13 = vmax.f32 %v1395_v4, 0.0  ;;  %v1460_v27 = vmax.f32 %v1396_v25, 0.0 }
 0x21a   : > { %v1461_v11 = vmax.f32 %v1397_v57, 0.0  ;;  %v1462_v20 = vmax.f32 %v1398_v36, 0.0  ;;  %v1463_v8 = vmax.f32 %v1399_v17, 0.0  ;;  %v1464_v29 = vmax.f32 %v1400_v7, 0.0 }
 0x21b   : > { %1521 = vst [vmem:[%s3259_s4 + $0x180] sm:$0xff] %v1457_v3  ;;  %1522 = vst [vmem:[%s3259_s4 + $0x188] sm:$0xff] %v1458_v10  ;;  %v1259_v35 = vmul.f32 %v2792_v38, %v3423_v22  ;;  %v1260_v53 = vmul.f32 %v2792_v38, %v3424_v31  ;;  %v1261_v62 = vmul.f32 %v2792_v38, %v3425_v61 }
 0x21c   : > { %1523 = vst [vmem:[%s3259_s4 + $0x190] sm:$0xff] %v1459_v13  ;;  %1524 = vst [vmem:[%s3259_s4 + $0x198] sm:$0xff] %v1460_v27  ;;  %v1262_v43 = vmul.f32 %v2792_v38, %v3426_v30  ;;  %v1263_v51 = vmul.f32 %v2792_v38, %v2686_v48  ;;  %v1264_v49 = vmul.f32 %v2792_v38, %v3427_v23 }
 0x21d   : > { %1525 = vst [vmem:[%s3259_s4 + $0x1a0] sm:$0xff] %v1461_v11  ;;  %1526 = vst [vmem:[%s3259_s4 + $0x1a8] sm:$0xff] %v1462_v20  ;;  %v1265_v50 = vmul.f32 %v2792_v38, %v2774_v41  ;;  %v1266_v44 = vmul.f32 %v2792_v38, %v2782_v14  ;;  %v1330_v33 = vmul.f32 %v2797_v28, %v1259_v35 }
 0x21e   : > { %1527 = vst [vmem:[%s3259_s4 + $0x1b0] sm:$0xff] %v1463_v8  ;;  %1528 = vst [vmem:[%s3259_s4 + $0x1b8] sm:$0xff] %v1464_v29  ;;  %v1331_v45 = vmul.f32 %v2797_v28, %v1260_v53  ;;  %v1332_v42 = vmul.f32 %v2797_v28, %v1261_v62  ;;  %v1333_v56 = vmul.f32 %v2797_v28, %v1262_v43 }
 0x21f   : > { %v1334_v9 = vmul.f32 %v2797_v28, %v1263_v51  ;;  %v1335_v48 = vmul.f32 %v2797_v28, %v1264_v49  ;;  %v1336_v15 = vmul.f32 %v2797_v28, %v1265_v50  ;;  %v1337_v39 = vmul.f32 %v2797_v28, %v1266_v44 }
 0x220   : > { %v1401_v41 = vadd.f32 %v2810_v46, %v1330_v33  ;;  %v1402_v14 = vadd.f32 %v2810_v46, %v1331_v45  ;;  %v1403_v38 = vadd.f32 %v2810_v46, %v1332_v42  ;;  %v1404_v16 = vadd.f32 %v2810_v46, %v1333_v56 }
 0x221   : > { %v1405_v19 = vadd.f32 %v2810_v46, %v1334_v9  ;;  %v1406_v47 = vadd.f32 %v2810_v46, %v1335_v48  ;;  %v1407_v21 = vadd.f32 %v2810_v46, %v1336_v15  ;;  %v1408_v55 = vadd.f32 %v2810_v46, %v1337_v39 }
 0x222   : > { %v1465_v60 = vmax.f32 %v1401_v41, 0.0  ;;  %v1466_v2 = vmax.f32 %v1402_v14, 0.0  ;;  %v1467_v5 = vmax.f32 %v1403_v38, 0.0  ;;  %v1468_v28 = vmax.f32 %v1404_v16, 0.0 }
 0x223   : > { %v1469_v24 = vmax.f32 %v1405_v19, 0.0  ;;  %v1470_v63 = vmax.f32 %v1406_v47, 0.0  ;;  %v1471_v37 = vmax.f32 %v1407_v21, 0.0  ;;  %v1472_v40 = vmax.f32 %v1408_v55, 0.0 }
 0x224   : > { %1529 = vst [vmem:[%s3259_s4 + $0x1c0] sm:$0xff] %v1465_v60  ;;  %1530 = vst [vmem:[%s3259_s4 + $0x1c8] sm:$0xff] %v1466_v2 }
 0x225   : > { %1531 = vst [vmem:[%s3259_s4 + $0x1d0] sm:$0xff] %v1467_v5  ;;  %1532 = vst [vmem:[%s3259_s4 + $0x1d8] sm:$0xff] %v1468_v28 }
 0x226   : > { %1533 = vst [vmem:[%s3259_s4 + $0x1e0] sm:$0xff] %v1469_v24  ;;  %1534 = vst [vmem:[%s3259_s4 + $0x1e8] sm:$0xff] %v1470_v63 }
 0x227   : > { %1535 = vst [vmem:[%s3259_s4 + $0x1f0] sm:$0xff] %v1471_v37  ;;  %1536 = vst [vmem:[%s3259_s4 + $0x1f8] sm:$0xff] %v1472_v40 }
 0x228 PF: > { %s14_s15 = sadd.s32 1, %s1883_s15  }
 0x229   : > { %p11_p5 = scmp.ge.s32.totalorder %s14_s15, 6  }
 0x22b   :  { %13 = sbr.rel (!%p11_p5) target bundleno = 1 (0x1), region = 70 }

// kernel: generator_forward.7
= control target key start
LH: loop header
LB: loop body
LE: loop exit
PB: predicated region body
PF: predicated region fallthrough
CT: control target
= control target key end

     0   :  { %s1318_s9 = smov 0   ;;  %s1498_s0 = inlined_call_operand.vmem [shape: bf16[4,392,256], index: 0, kind: input, shape index: {}]   ;;  %s1499_s1 = inlined_call_operand.vmem [shape: bf16[4,256,128], index: 1, kind: input, shape index: {}]   ;;  %s1500_s2 = inlined_call_operand.vmem [shape: f32[4,392,128], index: 2, kind: output, shape index: {}]  }
   0x1 LB: > { %s986_s10 = sadd.s32 4294967295, %s1300_s9   ;;  %p990_p0 = scmp.ge.s32.totalorder %s1300_s9, 1  ;;  %s1300_s9 = sphi %s1318_s9, %s12_s9  }
   0x2   : > { %p122_p1 = scmp.lt.s32.totalorder %s1300_s9, 5 }
   0x4   : > { %p123_p2 = pnand %p990_p0, %p122_p1 }
   0x5   : > { %p149_p3 = scmp.lt.s32.totalorder (!%p123_p2), %s986_s10, 3  ;;  %v1302_v0 = vmov (!%p123_p2), 0  }
   0x6   : > { %126 = sbr.rel (%p123_p2) target bundleno = 402 (0x192), region = 28  ;;  %589 = vmatprep.subr.bf16.mxu0 (!%p123_p2), %v1302_v0  ;;  %1064 = vmatprep.subr.bf16.mxu1 (!%p123_p2), %v1302_v0 }
   0xd   : > { %s1502_s10 = smov (!%p149_p3, %s986_s10), 3 }
   0xe   : > { %s1063_s11 = sshll.u32 %s1502_s10, 7  ;;  %s1096_s15 = smul.u32 392, %s1502_s10 }
   0xf   : > { %s1334_s14 = scalar_lea.vmem %s1499_s1, %s1063_s11 }
  0x10   : > { %v1106_v1 = vld [vmem:[%s1334_s14] sm:$0xff]   ;;  %v1107_v2 = vld [vmem:[%s1334_s14 + $0x8] sm:$0xff]   ;;  %v1108_v3 = vld [vmem:[%s1334_s14 + $0x10] sm:$0xff]   ;;  %s1352_s18 = scalar_lea.vmem %s1498_s0, %s1096_s15  ;;  %s1444_s21 = scalar_lea.vmem %s1500_s2, %s1096_s15 }
  0x11   : > { %590 = vmatpush1.bf16.msra.mxu0 %v1106_v1  ;;  %1080 = vmatpush1.bf16.msra.mxu1 %v1106_v1  ;;  %v1109_v4 = vld [vmem:[%s1334_s14 + $0x18] sm:$0xff]   ;;  %v1110_v5 = vld [vmem:[%s1334_s14 + $0x20] sm:$0xff]   ;;  %v1111_v7 = vld [vmem:[%s1334_s14 + $0x28] sm:$0xff]  }
  0x12   : > { %591 = vmatprep.subr.bf16.mxu0 %v1302_v0  ;;  %1065 = vmatprep.subr.bf16.mxu1 %v1302_v0  ;;  %v1124_v6 = vld [vmem:[%s1352_s18 + $0x4] ss:$8 sps:$4 sm:$0xff]   ;;  %v1127_v8 = vld [vmem:[%s1352_s18 + $0xd4] ss:$8 sps:$4 sm:$0xff]   ;;  %v1122_v19 = vld [vmem:[%s1352_s18] ss:$8 sps:$4 sm:$0xff]  }
  0x13   : > { %621 = vmatprep.mubr.bf16.mxu0 %v1124_v6  ;;  %725 = vmatprep.mubr.bf16.mxu1 %v1127_v8  ;;  %v1112_v9 = vld [vmem:[%s1334_s14 + $0x30] sm:$0xff]   ;;  %v1113_v10 = vld [vmem:[%s1334_s14 + $0x38] sm:$0xff]   ;;  %v1114_v11 = vld [vmem:[%s1334_s14 + $0x40] sm:$0xff]  }
  0x14   : > { %v1115_v12 = vld [vmem:[%s1334_s14 + $0x48] sm:$0xff]   ;;  %v1116_v13 = vld [vmem:[%s1334_s14 + $0x50] sm:$0xff]   ;;  %v1117_v14 = vld [vmem:[%s1334_s14 + $0x58] sm:$0xff]  }
  0x15   : > { %592 = vmatpush1.bf16.msra.mxu0 %v1107_v2  ;;  %1081 = vmatpush1.bf16.msra.mxu1 %v1107_v2  ;;  %v1118_v15 = vld [vmem:[%s1334_s14 + $0x60] sm:$0xff]   ;;  %v1119_v16 = vld [vmem:[%s1334_s14 + $0x68] sm:$0xff]   ;;  %v1120_v17 = vld [vmem:[%s1334_s14 + $0x70] sm:$0xff]  }
  0x16   : > { %593 = vmatprep.subr.bf16.mxu0 %v1302_v0  ;;  %1066 = vmatprep.subr.bf16.mxu1 %v1302_v0  ;;  %v1121_v18 = vld [vmem:[%s1334_s14 + $0x78] sm:$0xff]   ;;  %v1131_v22 = vld [vmem:[%s1352_s18 + $0xe4] ss:$8 sps:$4 sm:$0xff]   ;;  %v1135_v24 = vld [vmem:[%s1352_s18 + $0xe0] ss:$8 sps:$4 sm:$0xff]  }
  0x17   : > { %v1125_v20 = vld [vmem:[%s1352_s18 + $0xd0] ss:$8 sps:$4 sm:$0xff]   ;;  %v1128_v21 = vld [vmem:[%s1352_s18 + $0x14] ss:$8 sps:$4 sm:$0xff]   ;;  %v1133_v25 = vld [vmem:[%s1352_s18 + $0x24] ss:$8 sps:$4 sm:$0xff]  }
  0x18   : > { %v1130_v23 = vld [vmem:[%s1352_s18 + $0x10] ss:$8 sps:$4 sm:$0xff]   ;;  %v1137_v26 = vld [vmem:[%s1352_s18 + $0xf4] ss:$8 sps:$4 sm:$0xff]   ;;  %v1136_v27 = vld [vmem:[%s1352_s18 + $0x20] ss:$8 sps:$4 sm:$0xff]  }
  0x19   : > { %594 = vmatpush1.bf16.msra.mxu0 %v1108_v3  ;;  %1082 = vmatpush1.bf16.msra.mxu1 %v1108_v3  ;;  %v1141_v28 = vld [vmem:[%s1352_s18 + $0xf0] ss:$8 sps:$4 sm:$0xff]   ;;  %v1139_v29 = vld [vmem:[%s1352_s18 + $0x34] ss:$8 sps:$4 sm:$0xff]   ;;  %v1143_v30 = vld [vmem:[%s1352_s18 + $0x104] ss:$8 sps:$4 sm:$0xff]  }
  0x1a   : > { %595 = vmatprep.subr.bf16.mxu0 %v1302_v0  ;;  %1067 = vmatprep.subr.bf16.mxu1 %v1302_v0  ;;  %v1142_v31 = vld [vmem:[%s1352_s18 + $0x30] ss:$8 sps:$4 sm:$0xff]   ;;  %v1147_v32 = vld [vmem:[%s1352_s18 + $0x100] ss:$8 sps:$4 sm:$0xff]   ;;  %v1145_v33 = vld [vmem:[%s1352_s18 + $0x44] ss:$8 sps:$4 sm:$0xff]  }
  0x1b   : > { %v1149_v34 = vld [vmem:[%s1352_s18 + $0x114] ss:$8 sps:$4 sm:$0xff]   ;;  %v1148_v35 = vld [vmem:[%s1352_s18 + $0x40] ss:$8 sps:$4 sm:$0xff]   ;;  %v1153_v36 = vld [vmem:[%s1352_s18 + $0x110] ss:$8 sps:$4 sm:$0xff]  }
  0x1c   : > { %v1151_v37 = vld [vmem:[%s1352_s18 + $0x54] ss:$8 sps:$4 sm:$0xff]   ;;  %v1155_v38 = vld [vmem:[%s1352_s18 + $0x124] ss:$8 sps:$4 sm:$0xff]   ;;  %v1154_v39 = vld [vmem:[%s1352_s18 + $0x50] ss:$8 sps:$4 sm:$0xff]  }
  0x1d   : > { %596 = vmatpush1.bf16.msra.mxu0 %v1109_v4  ;;  %1083 = vmatpush1.bf16.msra.mxu1 %v1109_v4  ;;  %v1159_v40 = vld [vmem:[%s1352_s18 + $0x120] ss:$8 sps:$4 sm:$0xff]   ;;  %v1157_v41 = vld [vmem:[%s1352_s18 + $0x64] ss:$8 sps:$4 sm:$0xff]   ;;  %v1161_v42 = vld [vmem:[%s1352_s18 + $0x134] ss:$8 sps:$4 sm:$0xff]  }
  0x1e   : > { %597 = vmatprep.subr.bf16.mxu0 %v1302_v0  ;;  %1068 = vmatprep.subr.bf16.mxu1 %v1302_v0  ;;  %v1160_v43 = vld [vmem:[%s1352_s18 + $0x60] ss:$8 sps:$4 sm:$0xff]   ;;  %v1165_v44 = vld [vmem:[%s1352_s18 + $0x130] ss:$8 sps:$4 sm:$0xff]   ;;  %v1163_v45 = vld [vmem:[%s1352_s18 + $0x74] ss:$8 sps:$4 sm:$0xff]  }
  0x1f   : > { %v1167_v46 = vld [vmem:[%s1352_s18 + $0x144] ss:$8 sps:$4 sm:$0xff]   ;;  %v1166_v47 = vld [vmem:[%s1352_s18 + $0x70] ss:$8 sps:$4 sm:$0xff]   ;;  %v1171_v48 = vld [vmem:[%s1352_s18 + $0x140] ss:$8 sps:$4 sm:$0xff]  }
  0x20   : > { %v1169_v49 = vld [vmem:[%s1352_s18 + $0x84] ss:$8 sps:$4 sm:$0xff]   ;;  %v1173_v50 = vld [vmem:[%s1352_s18 + $0x154] ss:$8 sps:$4 sm:$0xff]   ;;  %v1172_v51 = vld [vmem:[%s1352_s18 + $0x80] ss:$8 sps:$4 sm:$0xff]  }
  0x21   : > { %598 = vmatpush1.bf16.msra.mxu0 %v1110_v5  ;;  %1084 = vmatpush1.bf16.msra.mxu1 %v1110_v5  ;;  %v1177_v52 = vld [vmem:[%s1352_s18 + $0x150] ss:$8 sps:$4 sm:$0xff]   ;;  %v1175_v53 = vld [vmem:[%s1352_s18 + $0x94] ss:$8 sps:$4 sm:$0xff]   ;;  %v1179_v54 = vld [vmem:[%s1352_s18 + $0x164] ss:$8 sps:$4 sm:$0xff]  }
  0x22   : > { %599 = vmatprep.subr.bf16.mxu0 %v1302_v0  ;;  %1069 = vmatprep.subr.bf16.mxu1 %v1302_v0  ;;  %v1178_v55 = vld [vmem:[%s1352_s18 + $0x90] ss:$8 sps:$4 sm:$0xff]   ;;  %v1183_v56 = vld [vmem:[%s1352_s18 + $0x160] ss:$8 sps:$4 sm:$0xff]   ;;  %v1181_v57 = vld [vmem:[%s1352_s18 + $0xa4] ss:$8 sps:$4 sm:$0xff]  }
  0x23   : > { %v1185_v58 = vld [vmem:[%s1352_s18 + $0x174] ss:$8 sps:$4 sm:$0xff]   ;;  %v213_v59 = vld [vmem:[%s1352_s18 + $0x180] sm:$0xff]  ;;  %v1189_v61 = vld [vmem:[%s1352_s18 + $0x170] ss:$8 sps:$4 sm:$0xff]  }
  0x24   : > { %v1184_v60 = vld [vmem:[%s1352_s18 + $0xa0] ss:$8 sps:$4 sm:$0xff]   ;;  %v1187_v62 = vld [vmem:[%s1352_s18 + $0xb4] ss:$8 sps:$4 sm:$0xff]   ;;  %v1044_v63 = vcombine.high %v213_v59, %v213_v59  ;;  %v1043_v1 = vcombine.low %v213_v59, %v213_v59  ;;  %v1192_v2 = vld [vmem:[%s1352_s18 + $0xc4] ss:$8 sps:$4 sm:$0xff]  }
  0x25   : > { %600 = vmatpush1.bf16.msra.mxu0 %v1111_v7  ;;  %1085 = vmatpush1.bf16.msra.mxu1 %v1111_v7  ;;  %v1195_v3 = vld [vmem:[%s1352_s18 + $0xc0] ss:$8 sps:$4 sm:$0xff]  }
  0x26   : > { %601 = vmatprep.subr.bf16.mxu0 %v1302_v0  ;;  %1070 = vmatprep.subr.bf16.mxu1 %v1302_v0 }
  0x29   : > { %602 = vmatpush1.bf16.msra.mxu0 %v1112_v9  ;;  %1086 = vmatpush1.bf16.msra.mxu1 %v1112_v9 }
  0x2a   : > { %603 = vmatprep.subr.bf16.mxu0 %v1302_v0  ;;  %1071 = vmatprep.subr.bf16.mxu1 %v1302_v0 }
  0x2d   : > { %604 = vmatpush1.bf16.msra.mxu0 %v1113_v10  ;;  %1087 = vmatpush1.bf16.msra.mxu1 %v1113_v10 }
  0x2e   : > { %605 = vmatprep.subr.bf16.mxu0 %v1302_v0  ;;  %1072 = vmatprep.subr.bf16.mxu1 %v1302_v0 }
  0x31   : > { %606 = vmatpush1.bf16.msra.mxu0 %v1114_v11  ;;  %1088 = vmatpush1.bf16.msra.mxu1 %v1114_v11 }
  0x32   : > { %607 = vmatprep.subr.bf16.mxu0 %v1302_v0  ;;  %1073 = vmatprep.subr.bf16.mxu1 %v1302_v0 }
  0x35   : > { %608 = vmatpush1.bf16.msra.mxu0 %v1115_v12  ;;  %1089 = vmatpush1.bf16.msra.mxu1 %v1115_v12 }
  0x36   : > { %609 = vmatprep.subr.bf16.mxu0 %v1302_v0  ;;  %1074 = vmatprep.subr.bf16.mxu1 %v1302_v0 }
  0x39   : > { %610 = vmatpush1.bf16.msra.mxu0 %v1116_v13  ;;  %1090 = vmatpush1.bf16.msra.mxu1 %v1116_v13 }
  0x3a   : > { %611 = vmatprep.subr.bf16.mxu0 %v1302_v0  ;;  %1075 = vmatprep.subr.bf16.mxu1 %v1302_v0 }
  0x3d   : > { %612 = vmatpush1.bf16.msra.mxu0 %v1117_v14  ;;  %1091 = vmatpush1.bf16.msra.mxu1 %v1117_v14 }
  0x3e   : > { %613 = vmatprep.subr.bf16.mxu0 %v1302_v0  ;;  %1076 = vmatprep.subr.bf16.mxu1 %v1302_v0 }
  0x41   : > { %614 = vmatpush1.bf16.msra.mxu0 %v1118_v15  ;;  %1092 = vmatpush1.bf16.msra.mxu1 %v1118_v15 }
  0x42   : > { %615 = vmatprep.subr.bf16.mxu0 %v1302_v0  ;;  %1077 = vmatprep.subr.bf16.mxu1 %v1302_v0 }
  0x45   : > { %616 = vmatpush1.bf16.msra.mxu0 %v1119_v16  ;;  %1093 = vmatpush1.bf16.msra.mxu1 %v1119_v16 }
  0x46   : > { %617 = vmatprep.subr.bf16.mxu0 %v1302_v0  ;;  %1078 = vmatprep.subr.bf16.mxu1 %v1302_v0 }
  0x49   : > { %618 = vmatpush1.bf16.msra.mxu0 %v1120_v17  ;;  %1094 = vmatpush1.bf16.msra.mxu1 %v1120_v17 }
  0x4a   : > { %619 = vmatprep.subr.bf16.mxu0 %v1302_v0  ;;  %1079 = vmatprep.subr.bf16.mxu1 %v1302_v0  ;;  %v1190_v0 = vld [vmem:[%s1352_s18 + $0xb0] ss:$8 sps:$4 sm:$0xff]  }
  0x4d   : > { %620 = vmatpush1.bf16.msra.mxu0 %v1121_v18  ;;  %1095 = vmatpush1.bf16.msra.mxu1 %v1121_v18 }
  0x50   : > { %622 = vmatmul.mubr.bf16.vlgmr.msra.gmra.mrb[0].mxu0 %v1122_v19  ;;  %726 = vmatmul.mubr.bf16.vlgmr.msra.gmra.mrb[0].mxu1 %v1125_v20 }
  0x51   : > { %629 = vmatprep.mubr.bf16.mxu0 %v1128_v21  ;;  %733 = vmatprep.mubr.bf16.mxu1 %v1131_v22 }
  0x58   : > { %630 = vmatmul.mubr.bf16.gmra.mrb[4].mxu0 %v1130_v23  ;;  %734 = vmatmul.mubr.bf16.gmra.mrb[4].mxu1 %v1135_v24 }
  0x59   : > { %637 = vmatprep.mubr.bf16.mxu0 %v1133_v25  ;;  %741 = vmatprep.mubr.bf16.mxu1 %v1137_v26 }
  0x60   : > { %638 = vmatmul.mubr.bf16.gmra.mrb[8].mxu0 %v1136_v27  ;;  %742 = vmatmul.mubr.bf16.gmra.mrb[8].mxu1 %v1141_v28 }
  0x61   : > { %645 = vmatprep.mubr.bf16.mxu0 %v1139_v29  ;;  %749 = vmatprep.mubr.bf16.mxu1 %v1143_v30 }
  0x68   : > { %646 = vmatmul.mubr.bf16.gmra.mrb[12].mxu0 %v1142_v31  ;;  %750 = vmatmul.mubr.bf16.gmra.mrb[12].mxu1 %v1147_v32 }
  0x69   : > { %653 = vmatprep.mubr.bf16.mxu0 %v1145_v33  ;;  %757 = vmatprep.mubr.bf16.mxu1 %v1149_v34 }
  0x70   : > { %654 = vmatmul.mubr.bf16.gmra.mrb[16].mxu0 %v1148_v35  ;;  %758 = vmatmul.mubr.bf16.gmra.mrb[16].mxu1 %v1153_v36 }
  0x71   : > { %661 = vmatprep.mubr.bf16.mxu0 %v1151_v37  ;;  %765 = vmatprep.mubr.bf16.mxu1 %v1155_v38 }
  0x78   : > { %662 = vmatmul.mubr.bf16.gmra.mrb[20].mxu0 %v1154_v39  ;;  %766 = vmatmul.mubr.bf16.gmra.mrb[20].mxu1 %v1159_v40 }
  0x79   : > { %669 = vmatprep.mubr.bf16.mxu0 %v1157_v41  ;;  %773 = vmatprep.mubr.bf16.mxu1 %v1161_v42 }
  0x80   : > { %670 = vmatmul.mubr.bf16.gmra.mrb[24].mxu0 %v1160_v43  ;;  %774 = vmatmul.mubr.bf16.gmra.mrb[24].mxu1 %v1165_v44 }
  0x81   : > { %677 = vmatprep.mubr.bf16.mxu0 %v1163_v45  ;;  %781 = vmatprep.mubr.bf16.mxu1 %v1167_v46 }
  0x88   : > { %678 = vmatmul.mubr.bf16.gmra.mrb[28].mxu0 %v1166_v47  ;;  %782 = vmatmul.mubr.bf16.gmra.mrb[28].mxu1 %v1171_v48 }
  0x89   : > { %685 = vmatprep.mubr.bf16.mxu0 %v1169_v49  ;;  %789 = vmatprep.mubr.bf16.mxu1 %v1173_v50 }
  0x90   : > { %686 = vmatmul.mubr.bf16.gmra.mrb[32].mxu0 %v1172_v51  ;;  %790 = vmatmul.mubr.bf16.gmra.mrb[32].mxu1 %v1177_v52 }
  0x91   : > { %693 = vmatprep.mubr.bf16.mxu0 %v1175_v53  ;;  %797 = vmatprep.mubr.bf16.mxu1 %v1179_v54 }
  0x98   : > { %694 = vmatmul.mubr.bf16.gmra.mrb[36].mxu0 %v1178_v55  ;;  %798 = vmatmul.mubr.bf16.gmra.mrb[36].mxu1 %v1183_v56 }
  0x99   : > { %701 = vmatprep.mubr.bf16.mxu0 %v1181_v57  ;;  %805 = vmatprep.mubr.bf16.mxu1 %v1185_v58 }
  0xa0   : > { %702 = vmatmul.mubr.bf16.gmra.mrb[40].mxu0 %v1184_v60  ;;  %806 = vmatmul.mubr.bf16.gmra.mrb[40].mxu1 %v1189_v61 }
  0xa1   : > { %709 = vmatprep.mubr.bf16.mxu0 %v1187_v62  ;;  %813 = vmatprep.mubr.bf16.mxu1 %v1044_v63 }
  0xa8   : > { %710 = vmatmul.mubr.bf16.gmra.mrb[44].mxu0 %v1190_v0  ;;  %814 = vmatmul.mubr.bf16.gmra.mrb[44].mxu1 %v1043_v1 }
  0xa9   : > { %717 = vmatprep.mubr.bf16.mxu0 %v1192_v2 }
  0xb0   : > { %718 = vmatmul.mubr.bf16.gmra.mrb[48].mxu0 %v1195_v3 }
 0x123   : > { %v623_v4 = vpop.f32.mrb[0].mxu0  ;;  %v727_v5 = vpop.f32.mrb[0].mxu1 }
 0x124   : > { %1196 = vtanh.f32 %v623_v4  ;;  %v625_v6 = vpop.f32.mrb[1].mxu0  ;;  %v729_v7 = vpop.f32.mrb[1].mxu1 }
 0x125   : > { %v626_v8 = vpop.f32.mrb[2].mxu0  ;;  %1198 = vtanh.f32 %v727_v5  ;;  %v730_v9 = vpop.f32.mrb[2].mxu1 }
 0x126   : > { %1200 = vtanh.f32 %v626_v8  ;;  %v628_v10 = vpop.f32.mrb[3].mxu0  ;;  %v732_v11 = vpop.f32.mrb[3].mxu1 }
 0x127   : > { %1202 = vtanh.f32 %v730_v9 }
 0x12b   : > { %v631_v12 = vpop.f32.mrb[4].mxu0  ;;  %v735_v13 = vpop.f32.mrb[4].mxu1 }
 0x12c   : > { %1204 = vtanh.f32 %v631_v12  ;;  %v633_v14 = vpop.f32.mrb[5].mxu0  ;;  %v737_v15 = vpop.f32.mrb[5].mxu1 }
 0x12d   : > { %v634_v16 = vpop.f32.mrb[6].mxu0  ;;  %1206 = vtanh.f32 %v735_v13  ;;  %v738_v17 = vpop.f32.mrb[6].mxu1 }
 0x12e   : > { %v1197_v18 = vpop.eup %1196  ;;  %1208 = vtanh.f32 %v634_v16  ;;  %v636_v19 = vpop.f32.mrb[7].mxu0 }
 0x12f   : > { %v740_v20 = vpop.f32.mrb[7].mxu1  ;;  %v1199_v21 = vpop.eup %1198  ;;  %870 = vst [vmem:[%s1444_s21] sm:$0xff] %v1197_v18  ;;  %1210 = vtanh.f32 %v738_v17 }
 0x130   : > { %v1201_v22 = vpop.eup %1200  ;;  %896 = vst [vmem:[%s1444_s21 + $0xd0] sm:$0xff] %v1199_v21 }
 0x131   : > { %v1203_v23 = vpop.eup %1202  ;;  %871 = vst [vmem:[%s1444_s21 + $0x8] sm:$0xff] %v1201_v22 }
 0x132   : > { %897 = vst [vmem:[%s1444_s21 + $0xd8] sm:$0xff] %v1203_v23 }
 0x133   : > { %v639_v24 = vpop.f32.mrb[8].mxu0  ;;  %v743_v25 = vpop.f32.mrb[8].mxu1 }
 0x134   : > { %1212 = vtanh.f32 %v639_v24  ;;  %v641_v26 = vpop.f32.mrb[9].mxu0  ;;  %v745_v27 = vpop.f32.mrb[9].mxu1 }
 0x135   : > { %v642_v28 = vpop.f32.mrb[10].mxu0  ;;  %1214 = vtanh.f32 %v743_v25  ;;  %v746_v29 = vpop.f32.mrb[10].mxu1 }
 0x136   : > { %v1205_v30 = vpop.eup %1204  ;;  %1216 = vtanh.f32 %v642_v28  ;;  %v644_v31 = vpop.f32.mrb[11].mxu0 }
 0x137   : > { %v748_v32 = vpop.f32.mrb[11].mxu1  ;;  %v1207_v33 = vpop.eup %1206  ;;  %872 = vst [vmem:[%s1444_s21 + $0x10] sm:$0xff] %v1205_v30  ;;  %1218 = vtanh.f32 %v746_v29 }
 0x138   : > { %v1209_v34 = vpop.eup %1208  ;;  %898 = vst [vmem:[%s1444_s21 + $0xe0] sm:$0xff] %v1207_v33 }
 0x139   : > { %v1211_v35 = vpop.eup %1210  ;;  %873 = vst [vmem:[%s1444_s21 + $0x18] sm:$0xff] %v1209_v34 }
 0x13a   : > { %899 = vst [vmem:[%s1444_s21 + $0xe8] sm:$0xff] %v1211_v35 }
 0x13b   : > { %v647_v36 = vpop.f32.mrb[12].mxu0  ;;  %v751_v37 = vpop.f32.mrb[12].mxu1 }
 0x13c   : > { %1220 = vtanh.f32 %v647_v36  ;;  %v649_v38 = vpop.f32.mrb[13].mxu0  ;;  %v753_v39 = vpop.f32.mrb[13].mxu1 }
 0x13d   : > { %v650_v40 = vpop.f32.mrb[14].mxu0  ;;  %1222 = vtanh.f32 %v751_v37  ;;  %v754_v41 = vpop.f32.mrb[14].mxu1 }
 0x13e   : > { %v1213_v42 = vpop.eup %1212  ;;  %1224 = vtanh.f32 %v650_v40  ;;  %v652_v43 = vpop.f32.mrb[15].mxu0 }
 0x13f   : > { %v756_v44 = vpop.f32.mrb[15].mxu1  ;;  %v1215_v45 = vpop.eup %1214  ;;  %874 = vst [vmem:[%s1444_s21 + $0x20] sm:$0xff] %v1213_v42  ;;  %1226 = vtanh.f32 %v754_v41 }
 0x140   : > { %v1217_v46 = vpop.eup %1216  ;;  %900 = vst [vmem:[%s1444_s21 + $0xf0] sm:$0xff] %v1215_v45 }
 0x141   : > { %v1219_v47 = vpop.eup %1218  ;;  %875 = vst [vmem:[%s1444_s21 + $0x28] sm:$0xff] %v1217_v46 }
 0x142   : > { %901 = vst [vmem:[%s1444_s21 + $0xf8] sm:$0xff] %v1219_v47 }
 0x143   : > { %v655_v48 = vpop.f32.mrb[16].mxu0  ;;  %v759_v49 = vpop.f32.mrb[16].mxu1 }
 0x144   : > { %1228 = vtanh.f32 %v655_v48  ;;  %v657_v50 = vpop.f32.mrb[17].mxu0  ;;  %v761_v51 = vpop.f32.mrb[17].mxu1 }
 0x145   : > { %v658_v52 = vpop.f32.mrb[18].mxu0  ;;  %1230 = vtanh.f32 %v759_v49  ;;  %v762_v53 = vpop.f32.mrb[18].mxu1 }
 0x146   : > { %v1221_v54 = vpop.eup %1220  ;;  %1232 = vtanh.f32 %v658_v52  ;;  %v660_v55 = vpop.f32.mrb[19].mxu0 }
 0x147   : > { %v764_v56 = vpop.f32.mrb[19].mxu1  ;;  %v1223_v57 = vpop.eup %1222  ;;  %876 = vst [vmem:[%s1444_s21 + $0x30] sm:$0xff] %v1221_v54  ;;  %1234 = vtanh.f32 %v762_v53 }
 0x148   : > { %v1225_v58 = vpop.eup %1224  ;;  %902 = vst [vmem:[%s1444_s21 + $0x100] sm:$0xff] %v1223_v57 }
 0x149   : > { %v1227_v59 = vpop.eup %1226  ;;  %877 = vst [vmem:[%s1444_s21 + $0x38] sm:$0xff] %v1225_v58 }
 0x14a   : > { %903 = vst [vmem:[%s1444_s21 + $0x108] sm:$0xff] %v1227_v59 }
 0x14b   : > { %v663_v60 = vpop.f32.mrb[20].mxu0  ;;  %v767_v61 = vpop.f32.mrb[20].mxu1 }
 0x14c   : > { %1236 = vtanh.f32 %v663_v60  ;;  %v665_v62 = vpop.f32.mrb[21].mxu0  ;;  %v769_v63 = vpop.f32.mrb[21].mxu1 }
 0x14d   : > { %v666_v0 = vpop.f32.mrb[22].mxu0  ;;  %1238 = vtanh.f32 %v767_v61  ;;  %v770_v1 = vpop.f32.mrb[22].mxu1 }
 0x14e   : > { %v1229_v2 = vpop.eup %1228  ;;  %1240 = vtanh.f32 %v666_v0  ;;  %v668_v3 = vpop.f32.mrb[23].mxu0 }
 0x14f   : > { %v772_v4 = vpop.f32.mrb[23].mxu1  ;;  %v1231_v5 = vpop.eup %1230  ;;  %878 = vst [vmem:[%s1444_s21 + $0x40] sm:$0xff] %v1229_v2  ;;  %1242 = vtanh.f32 %v770_v1 }
 0x150   : > { %v1233_v6 = vpop.eup %1232  ;;  %904 = vst [vmem:[%s1444_s21 + $0x110] sm:$0xff] %v1231_v5 }
 0x151   : > { %v1235_v7 = vpop.eup %1234  ;;  %879 = vst [vmem:[%s1444_s21 + $0x48] sm:$0xff] %v1233_v6 }
 0x152   : > { %905 = vst [vmem:[%s1444_s21 + $0x118] sm:$0xff] %v1235_v7 }
 0x153   : > { %v671_v8 = vpop.f32.mrb[24].mxu0  ;;  %v775_v9 = vpop.f32.mrb[24].mxu1 }
 0x154   : > { %1244 = vtanh.f32 %v671_v8  ;;  %v673_v10 = vpop.f32.mrb[25].mxu0  ;;  %v777_v11 = vpop.f32.mrb[25].mxu1 }
 0x155   : > { %v674_v12 = vpop.f32.mrb[26].mxu0  ;;  %1246 = vtanh.f32 %v775_v9  ;;  %v778_v13 = vpop.f32.mrb[26].mxu1 }
 0x156   : > { %v1237_v14 = vpop.eup %1236  ;;  %1248 = vtanh.f32 %v674_v12  ;;  %v676_v15 = vpop.f32.mrb[27].mxu0 }
 0x157   : > { %v780_v16 = vpop.f32.mrb[27].mxu1  ;;  %v1239_v17 = vpop.eup %1238  ;;  %880 = vst [vmem:[%s1444_s21 + $0x50] sm:$0xff] %v1237_v14  ;;  %1250 = vtanh.f32 %v778_v13 }
 0x158   : > { %v1241_v18 = vpop.eup %1240  ;;  %906 = vst [vmem:[%s1444_s21 + $0x120] sm:$0xff] %v1239_v17 }
 0x159   : > { %v1243_v19 = vpop.eup %1242  ;;  %881 = vst [vmem:[%s1444_s21 + $0x58] sm:$0xff] %v1241_v18 }
 0x15a   : > { %907 = vst [vmem:[%s1444_s21 + $0x128] sm:$0xff] %v1243_v19 }
 0x15b   : > { %v679_v20 = vpop.f32.mrb[28].mxu0  ;;  %v783_v21 = vpop.f32.mrb[28].mxu1 }
 0x15c   : > { %1252 = vtanh.f32 %v679_v20  ;;  %v681_v22 = vpop.f32.mrb[29].mxu0  ;;  %v785_v23 = vpop.f32.mrb[29].mxu1 }
 0x15d   : > { %v682_v24 = vpop.f32.mrb[30].mxu0  ;;  %1254 = vtanh.f32 %v783_v21  ;;  %v786_v25 = vpop.f32.mrb[30].mxu1 }
 0x15e   : > { %v1245_v26 = vpop.eup %1244  ;;  %1256 = vtanh.f32 %v682_v24  ;;  %v684_v27 = vpop.f32.mrb[31].mxu0 }
 0x15f   : > { %v788_v28 = vpop.f32.mrb[31].mxu1  ;;  %v1247_v29 = vpop.eup %1246  ;;  %882 = vst [vmem:[%s1444_s21 + $0x60] sm:$0xff] %v1245_v26  ;;  %1258 = vtanh.f32 %v786_v25 }
 0x160   : > { %v1249_v30 = vpop.eup %1248  ;;  %908 = vst [vmem:[%s1444_s21 + $0x130] sm:$0xff] %v1247_v29 }
 0x161   : > { %v1251_v31 = vpop.eup %1250  ;;  %883 = vst [vmem:[%s1444_s21 + $0x68] sm:$0xff] %v1249_v30 }
 0x162   : > { %909 = vst [vmem:[%s1444_s21 + $0x138] sm:$0xff] %v1251_v31 }
 0x163   : > { %v687_v32 = vpop.f32.mrb[32].mxu0  ;;  %v791_v33 = vpop.f32.mrb[32].mxu1 }
 0x164   : > { %1260 = vtanh.f32 %v687_v32  ;;  %v689_v34 = vpop.f32.mrb[33].mxu0  ;;  %v793_v35 = vpop.f32.mrb[33].mxu1 }
 0x165   : > { %v690_v36 = vpop.f32.mrb[34].mxu0  ;;  %1262 = vtanh.f32 %v791_v33  ;;  %v794_v37 = vpop.f32.mrb[34].mxu1 }
 0x166   : > { %v1253_v38 = vpop.eup %1252  ;;  %1264 = vtanh.f32 %v690_v36  ;;  %v692_v39 = vpop.f32.mrb[35].mxu0 }
 0x167   : > { %v796_v40 = vpop.f32.mrb[35].mxu1  ;;  %v1255_v41 = vpop.eup %1254  ;;  %884 = vst [vmem:[%s1444_s21 + $0x70] sm:$0xff] %v1253_v38  ;;  %1266 = vtanh.f32 %v794_v37 }
 0x168   : > { %v1257_v42 = vpop.eup %1256  ;;  %910 = vst [vmem:[%s1444_s21 + $0x140] sm:$0xff] %v1255_v41 }
 0x169   : > { %v1259_v43 = vpop.eup %1258  ;;  %885 = vst [vmem:[%s1444_s21 + $0x78] sm:$0xff] %v1257_v42 }
 0x16a   : > { %911 = vst [vmem:[%s1444_s21 + $0x148] sm:$0xff] %v1259_v43 }
 0x16b   : > { %v695_v44 = vpop.f32.mrb[36].mxu0  ;;  %v799_v45 = vpop.f32.mrb[36].mxu1 }
 0x16c   : > { %1268 = vtanh.f32 %v695_v44  ;;  %v697_v46 = vpop.f32.mrb[37].mxu0  ;;  %v801_v47 = vpop.f32.mrb[37].mxu1 }
 0x16d   : > { %v698_v48 = vpop.f32.mrb[38].mxu0  ;;  %1270 = vtanh.f32 %v799_v45  ;;  %v802_v49 = vpop.f32.mrb[38].mxu1 }
 0x16e   : > { %v1261_v50 = vpop.eup %1260  ;;  %1272 = vtanh.f32 %v698_v48  ;;  %v700_v51 = vpop.f32.mrb[39].mxu0 }
 0x16f   : > { %v804_v52 = vpop.f32.mrb[39].mxu1  ;;  %v1263_v53 = vpop.eup %1262  ;;  %886 = vst [vmem:[%s1444_s21 + $0x80] sm:$0xff] %v1261_v50  ;;  %1274 = vtanh.f32 %v802_v49 }
 0x170   : > { %v1265_v54 = vpop.eup %1264  ;;  %912 = vst [vmem:[%s1444_s21 + $0x150] sm:$0xff] %v1263_v53 }
 0x171   : > { %v1267_v55 = vpop.eup %1266  ;;  %887 = vst [vmem:[%s1444_s21 + $0x88] sm:$0xff] %v1265_v54 }
 0x172   : > { %913 = vst [vmem:[%s1444_s21 + $0x158] sm:$0xff] %v1267_v55 }
 0x173   : > { %v703_v56 = vpop.f32.mrb[40].mxu0  ;;  %v807_v57 = vpop.f32.mrb[40].mxu1 }
 0x174   : > { %1276 = vtanh.f32 %v703_v56  ;;  %v705_v58 = vpop.f32.mrb[41].mxu0  ;;  %v809_v59 = vpop.f32.mrb[41].mxu1 }
 0x175   : > { %v706_v60 = vpop.f32.mrb[42].mxu0  ;;  %1278 = vtanh.f32 %v807_v57  ;;  %v810_v61 = vpop.f32.mrb[42].mxu1 }
 0x176   : > { %v1269_v62 = vpop.eup %1268  ;;  %1280 = vtanh.f32 %v706_v60  ;;  %v708_v63 = vpop.f32.mrb[43].mxu0 }
 0x177   : > { %v812_v0 = vpop.f32.mrb[43].mxu1  ;;  %v1271_v1 = vpop.eup %1270  ;;  %888 = vst [vmem:[%s1444_s21 + $0x90] sm:$0xff] %v1269_v62  ;;  %1282 = vtanh.f32 %v810_v61 }
 0x178   : > { %v1273_v2 = vpop.eup %1272  ;;  %914 = vst [vmem:[%s1444_s21 + $0x160] sm:$0xff] %v1271_v1 }
 0x179   : > { %v1275_v3 = vpop.eup %1274  ;;  %889 = vst [vmem:[%s1444_s21 + $0x98] sm:$0xff] %v1273_v2 }
 0x17a   : > { %915 = vst [vmem:[%s1444_s21 + $0x168] sm:$0xff] %v1275_v3 }
 0x17b   : > { %v711_v4 = vpop.f32.mrb[44].mxu0  ;;  %v815_v5 = vpop.f32.mrb[44].mxu1 }
 0x17c   : > { %1284 = vtanh.f32 %v711_v4  ;;  %v713_v6 = vpop.f32.mrb[45].mxu0  ;;  %v817_v7 = vpop.f32.mrb[45].mxu1 }
 0x17d   : > { %v714_v8 = vpop.f32.mrb[46].mxu0  ;;  %1286 = vtanh.f32 %v815_v5  ;;  %v818_v9 = vpop.f32.mrb[46].mxu1 }
 0x17e   : > { %v1277_v10 = vpop.eup %1276  ;;  %1288 = vtanh.f32 %v714_v8  ;;  %v716_v11 = vpop.f32.mrb[47].mxu0 }
 0x17f   : > { %v819_v12 = vpop.f32.mrb[47].mxu1  ;;  %v1279_v13 = vpop.eup %1278  ;;  %890 = vst [vmem:[%s1444_s21 + $0xa0] sm:$0xff] %v1277_v10 }
 0x180   : > { %v1281_v14 = vpop.eup %1280  ;;  %916 = vst [vmem:[%s1444_s21 + $0x170] sm:$0xff] %v1279_v13 }
 0x181   : > { %v1283_v15 = vpop.eup %1282  ;;  %891 = vst [vmem:[%s1444_s21 + $0xa8] sm:$0xff] %v1281_v14 }
 0x182   : > { %917 = vst [vmem:[%s1444_s21 + $0x178] sm:$0xff] %v1283_v15 }
 0x183   : > { %v719_v16 = vpop.f32.mrb[48].mxu0 }
 0x184   : > { %1290 = vtanh.f32 %v719_v16  ;;  %v721_v17 = vpop.f32.mrb[49].mxu0 }
 0x185   : > { %v722_v18 = vpop.f32.mrb[50].mxu0 }
 0x186   : > { %v1285_v19 = vpop.eup %1284  ;;  %1292 = vtanh.f32 %v722_v18  ;;  %v724_v20 = vpop.f32.mrb[51].mxu0 }
 0x187   : > { %v1287_v21 = vpop.eup %1286  ;;  %892 = vst [vmem:[%s1444_s21 + $0xb0] sm:$0xff] %v1285_v19 }
 0x188   : > { %v1289_v22 = vpop.eup %1288  ;;  %918 = vst [vmem:[%s1444_s21 + $0x180] sm:$0xff] %v1287_v21 }
 0x189   : > { %893 = vst [vmem:[%s1444_s21 + $0xb8] sm:$0xff] %v1289_v22 }
 0x18e   : > { %v1291_v23 = vpop.eup %1290 }
 0x18f   : > { %894 = vst [vmem:[%s1444_s21 + $0xc0] sm:$0xff] %v1291_v23 }
 0x190   : > { %v1293_v24 = vpop.eup %1292 }
 0x191   : > { %895 = vst [vmem:[%s1444_s21 + $0xc8] sm:$0xff] %v1293_v24 }
 0x192 PF: > { %s12_s9 = sadd.s32 1, %s1300_s9  }
 0x193   : > { %p9_p4 = scmp.ge.s32.totalorder %s12_s9, 6  }
 0x195   :  { %11 = sbr.rel (!%p9_p4) target bundleno = 1 (0x1), region = 61 }

</bundles_post_ra>
